<compile_context>
chip_gen: v7x
topology: tpu7x:2x2x1
jax: 0.10.0
libtpu: 0.0.40
codegen_flags: <defaults>
</compile_context>

<pallas_src>
import functools

import numpy as np

import jax
import jax.numpy as jnp
from jax import lax
from jax.experimental import pallas as pl
from jax.experimental.pallas import tpu as pltpu


# ----------------------------------------------------------------------------
# BlockSpec helpers
# ----------------------------------------------------------------------------
def _rep(shape):
  """Full-array block, constant block index (weights / small tensors)."""
  n = len(shape)
  return pl.BlockSpec(tuple(shape), lambda *args, _n=n: (0,) * _n)


def _tile_last(shape, tile):
  """Block tiled along the last (lane) axis."""
  n = len(shape)
  blk = tuple(shape[:-1]) + (tile,)
  return pl.BlockSpec(blk, lambda t, _n=n: (0,) * (_n - 1) + (t,))


_VMEM_LIMIT = 32 * 1024 * 1024


def _cparams(sem):
  return pltpu.CompilerParams(dimension_semantics=(sem,),
                              vmem_limit_bytes=_VMEM_LIMIT)


# ----------------------------------------------------------------------------
# Kernel 1: fused Q/K/V 1x1 convs for all 3 layers, affinity accumulation,
#           softmax, and the pooled dynamic-filter generation.
#   Accumulated over HW tiles:  aff += q @ k^T, vP += v @ P, qP += q @ P
#   Last step:  A = softmax(aff);  g = wf @ (A @ vP + qP) + bf
# ----------------------------------------------------------------------------
def _qkv_filter_kernel(enc_ref, x_ref, wq_ref, bq_ref, wk_ref, bk_ref,
                       wv_ref, bv_ref, wf_ref, bfl_ref, pool_ref,
                       v_ref, g_ref, aff_acc, vp_acc, qp_acc):
  t = pl.program_id(0)

  @pl.when(t == 0)
  def _init():
    aff_acc[...] = jnp.zeros_like(aff_acc)
    vp_acc[...] = jnp.zeros_like(vp_acc)
    qp_acc[...] = jnp.zeros_like(qp_acc)

  enc = enc_ref[...]                       # (2C, T) bf16
  x = x_ref[...]                           # (C,  T) bf16
  n_layers = wq_ref.shape[0]
  for l in range(n_layers):
    q = jnp.dot(wq_ref[l], enc, preferred_element_type=jnp.float32) + bq_ref[l]
    k = jnp.dot(wk_ref[l], x, preferred_element_type=jnp.float32) + bk_ref[l]
    v = jnp.dot(wv_ref[l], x, preferred_element_type=jnp.float32) + bv_ref[l]
    v_ref[l] = v.astype(v_ref.dtype)       # f_k1 feature map, reused downstream

    qb = q.astype(jnp.bfloat16)
    kb = k.astype(jnp.bfloat16)
    vb = v.astype(jnp.bfloat16)
    p = pool_ref[l]                        # (T, KK) bf16 pooling-matrix tile
    aff_acc[l] = aff_acc[l] + lax.dot_general(
        qb, kb, (((1,), (1,)), ((), ())), preferred_element_type=jnp.float32)
    vp_acc[l] = vp_acc[l] + jnp.dot(vb, p, preferred_element_type=jnp.float32)
    qp_acc[l] = qp_acc[l] + jnp.dot(qb, p, preferred_element_type=jnp.float32)

  @pl.when(t == pl.num_programs(0) - 1)
  def _finalize():
    for l in range(n_layers):
      a = aff_acc[l]                                         # (C2, C2)
      a = a - jnp.max(a, axis=-1, keepdims=True)
      e = jnp.exp(a)
      a = e / jnp.sum(e, axis=-1, keepdims=True)
      pooled = jnp.dot(a, vp_acc[l],
                       preferred_element_type=jnp.float32) + qp_acc[l]
      g_ref[l] = (jnp.dot(wf_ref[l], pooled,
                          preferred_element_type=jnp.float32) + bfl_ref[l])


def qkv_filter(enc, x, wq, bq, wk, bk, wv, bv, wf, bfl, pools, tile):
  L, C2, _ = wq.shape
  HW = enc.shape[1]
  KK = pools.shape[2]
  C2sq = wf.shape[1]
  nt = HW // tile
  args = (enc, x, wq, bq, wk, bk, wv, bv, wf, bfl, pools)
  return pl.pallas_call(
      _qkv_filter_kernel,
      grid=(nt,),
      in_specs=[
          _tile_last(enc.shape, tile),
          _tile_last(x.shape, tile),
          _rep(wq.shape), _rep(bq.shape),
          _rep(wk.shape), _rep(bk.shape),
          _rep(wv.shape), _rep(bv.shape),
          _rep(wf.shape), _rep(bfl.shape),
          pl.BlockSpec((L, tile, KK), lambda t: (0, t, 0)),
      ],
      out_specs=(_tile_last((L, C2, HW), tile), _rep((L, C2sq, KK))),
      out_shape=(jax.ShapeDtypeStruct((L, C2, HW), jnp.bfloat16),
                 jax.ShapeDtypeStruct((L, C2sq, KK), jnp.float32)),
      scratch_shapes=[pltpu.VMEM((L, C2, C2), jnp.float32),
                      pltpu.VMEM((L, C2, KK), jnp.float32),
                      pltpu.VMEM((L, C2, KK), jnp.float32)],
      compiler_params=_cparams("arbitrary"),
  )(*args)


# ----------------------------------------------------------------------------
# Kernel 2: 3x dynamic dilated conv as a single fused matmul per layer, with
#           Alpha channel-sum accumulation and the 3-way softmax gate.
# ----------------------------------------------------------------------------
def _dynconv_alpha_kernel(patches_ref, w_ref, b_ref, aw_ref, ab_ref,
                          acf_ref, alpha_ref, csum, *, inv_hw):
  t = pl.program_id(0)

  @pl.when(t == 0)
  def _init():
    csum[...] = jnp.zeros_like(csum)

  n_layers = w_ref.shape[0]
  for l in range(n_layers):
    acf = (jnp.dot(w_ref[l], patches_ref[l],
                   preferred_element_type=jnp.float32) + b_ref[l])   # (C2, T)
    acf_ref[l] = acf.astype(acf_ref.dtype)
    csum[l] = csum[l] + jnp.sum(acf, axis=1, keepdims=True)

  @pl.when(t == pl.num_programs(0) - 1)
  def _finalize():
    logits = []
    for l in range(n_layers):
      lg = (jnp.sum(aw_ref[l] * csum[l], axis=0, keepdims=True) * inv_hw
            + ab_ref[l])                                             # (1, 1)
      logits.append(lg)
    m = logits[0]
    for lg in logits[1:]:
      m = jnp.maximum(m, lg)
    es = [jnp.exp(lg - m) for lg in logits]
    s = es[0]
    for e in es[1:]:
      s = s + e
    for l in range(n_layers):
      alpha_ref[l] = es[l] / s


def dynconv_alpha(patches, w_mat, acf_b, alpha_w, alpha_b, tile, hw):
  L, C2, _ = w_mat.shape
  HW = patches.shape[2]
  nt = HW // tile
  kernel = functools.partial(_dynconv_alpha_kernel, inv_hw=1.0 / float(hw))
  return pl.pallas_call(
      kernel,
      grid=(nt,),
      in_specs=[_tile_last(patches.shape, tile), _rep(w_mat.shape),
                _rep(acf_b.shape), _rep(alpha_w.shape), _rep(alpha_b.shape)],
      out_specs=(_tile_last((L, C2, HW), tile), _rep((L, 1, 1))),
      out_shape=(jax.ShapeDtypeStruct((L, C2, HW), jnp.bfloat16),
                 jax.ShapeDtypeStruct((L, 1, 1), jnp.float32)),
      scratch_shapes=[pltpu.VMEM((L, C2, 1), jnp.float32)],
      compiler_params=_cparams("arbitrary"),
  )(patches, w_mat, acf_b, alpha_w, alpha_b)


# ----------------------------------------------------------------------------
# Kernel 3: gated mix of the three branch outputs (pure elementwise, parallel).
# ----------------------------------------------------------------------------
def _alpha_mix_kernel(alpha_ref, acf_ref, out_ref):
  n_layers = acf_ref.shape[0]
  acc = alpha_ref[0] * acf_ref[0].astype(jnp.float32)
  for l in range(1, n_layers):
    acc = acc + alpha_ref[l] * acf_ref[l].astype(jnp.float32)
  out_ref[...] = acc.astype(out_ref.dtype)


def alpha_mix(alpha, acf, tile):
  L, C2, HW = acf.shape
  nt = HW // tile
  return pl.pallas_call(
      _alpha_mix_kernel,
      grid=(nt,),
      in_specs=[_rep(alpha.shape), _tile_last(acf.shape, tile)],
      out_specs=_tile_last((C2, HW), tile),
      out_shape=jax.ShapeDtypeStruct((C2, HW), jnp.bfloat16),
      compiler_params=_cparams("parallel"),
  )(alpha, acf)


# ----------------------------------------------------------------------------
# Kernel 4: "fire" 3x3 conv (single fused tap matmul) + eval BatchNorm + ReLU.
# ----------------------------------------------------------------------------
def _fire_kernel(patches_ref, w_ref, b_ref, scale_ref, shift_ref, out_ref):
  y = jnp.dot(w_ref[...], patches_ref[...], preferred_element_type=jnp.float32)
  y = (y + b_ref[...]) * scale_ref[...] + shift_ref[...]
  out_ref[...] = jnp.maximum(y, 0.0).astype(out_ref.dtype)


def fire_conv(patches, w, bias, scale, shift, tile):
  _, HW = patches.shape
  Cout = w.shape[0]
  nt = HW // tile
  return pl.pallas_call(
      _fire_kernel,
      grid=(nt,),
      in_specs=[_tile_last(patches.shape, tile), _rep(w.shape),
                _rep(bias.shape), _rep(scale.shape), _rep(shift.shape)],
      out_specs=_tile_last((Cout, HW), tile),
      out_shape=jax.ShapeDtypeStruct((Cout, HW), jnp.float32),
      compiler_params=_cparams("parallel"),
  )(patches, w, bias, scale, shift)


# ----------------------------------------------------------------------------
# Plain-JAX glue: pooling matrix, im2col taps, reshapes
# ----------------------------------------------------------------------------
def pool_matrix(H, W, k, kk_max):
  """(H*W, kk_max) matrix P with PyTorch AdaptiveAvgPool2d(k) bin weights,
  so that pooled = x @ P for x of shape (C, H*W).  Unused columns are zero."""
  P = np.zeros((H * W, kk_max), np.float32)
  for i in range(k):
    r0, r1 = (i * H) // k, -(-((i + 1) * H) // k)
    for j in range(k):
      c0, c1 = (j * W) // k, -(-((j + 1) * W) // k)
      inv = 1.0 / float((r1 - r0) * (c1 - c0))
      for r in range(r0, r1):
        P[r * W + c0:r * W + c1, i * k + j] = inv
  return jnp.asarray(P)


def im2col(x, k, d):
  """x: (Cin, H, W); stride 1, padding d, dilation d -> (k*k, Cin, H*W)."""
  # TODO(synk): form taps in-kernel from a haloed VMEM tile to avoid the ~k*k
  # HBM read amplification of host-side im2col at large H*W.
  Cin, H, W = x.shape
  xp = jnp.pad(x, ((0, 0), (d, d), (d, d)))
  taps = []
  for i in range(k):
    for j in range(k):
      taps.append(xp[:, i * d:i * d + H, j * d:j * d + W].reshape(Cin, H * W))
  return jnp.stack(taps, axis=0)


# ----------------------------------------------------------------------------
# Full DCFM forward
# ----------------------------------------------------------------------------
def dcfm_forward(feats_encoder, feats_encode, params, *, ks, ds, lane_tile=128):
  N, C, H, W = feats_encode.shape
  assert N == 1, "reference DCFM only type-checks for batch size 1"
  C2 = C // 2
  HW = H * W
  tile = lane_tile if HW % lane_tile == 0 else HW
  L = len(ks)
  kk_max = max(k * k for k in ks)
  rp = kk_max * C2

  enc2d = feats_encoder[0].reshape(2 * C, HW).astype(jnp.bfloat16)
  x2d = feats_encode[0].reshape(C, HW).astype(jnp.bfloat16)
  pools = jnp.stack([pool_matrix(H, W, k, kk_max)
                     for k in ks]).astype(jnp.bfloat16)        # (L, HW, kk_max)

  # Attention + pooled dynamic-filter generation (one pass over HW).
  v, g = qkv_filter(enc2d, x2d,
                    params["wq"].astype(jnp.bfloat16), params["bq"],
                    params["wk"].astype(jnp.bfloat16), params["bk"],
                    params["wv"].astype(jnp.bfloat16), params["bv"],
                    params["wf"], params["bf"], pools, tile)
  # v: (L, C2, HW) bf16, g: (L, C2*C2, kk_max) f32

  # Pack dynamic-conv weights / patches; tap order t = i*k + j matches im2col.
  w_mats, patch_list = [], []
  for l in range(L):
    k_sz, dil = ks[l], ds[l]
    kk = k_sz * k_sz
    gl = g[l, :, :kk].reshape(C2, C2, kk).transpose(0, 2, 1).reshape(C2, kk * C2)
    w_mats.append(jnp.pad(gl, ((0, 0), (0, rp - kk * C2))))
    pch = im2col(v[l].reshape(C2, H, W), k_sz, dil).reshape(kk * C2, HW)
    patch_list.append(jnp.pad(pch, ((0, rp - kk * C2), (0, 0))))
  w_mat = jnp.stack(w_mats).astype(jnp.bfloat16)               # (L, C2, rp)
  patches = jnp.stack(patch_list).astype(jnp.bfloat16)         # (L, rp, HW)

  # Dynamic convs + Alpha gating, then gated mix.
  acf, alpha = dynconv_alpha(patches, w_mat, params["acf_b"],
                             params["alpha_w"], params["alpha_b"], tile, HW)
  f_mdk = alpha_mix(alpha, acf, tile)                          # (C2, HW) bf16

  # fire: Conv2d(C2->C, 3x3, pad 1) + eval-mode BatchNorm2d(C) + ReLU.
  eps = 1e-5
  scale = params["bn_gamma"] / jnp.sqrt(params["bn_var"] + eps)
  shift = params["bn_beta"] - params["bn_mean"] * scale
  fire_w = params["fire_w"].transpose(0, 2, 3, 1).reshape(C, 9 * C2)
  fire_w = fire_w.astype(jnp.bfloat16)
  fire_patches = im2col(f_mdk.reshape(C2, H, W), 3, 1).reshape(9 * C2, HW)
  fire_patches = fire_patches.astype(jnp.bfloat16)
  out = fire_conv(fire_patches, fire_w, params["fire_b"], scale, shift, tile)
  return out.reshape(1, C, H, W)


# ----------------------------------------------------------------------------
# Deterministic parameter init (synthetic; shapes follow DCFM.__init__)
# ----------------------------------------------------------------------------
def init_params(key, C, num_layers=3):
  C2 = C // 2
  keys = iter(jax.random.split(key, 32))

  def rand(shape, scale=0.1):
    return jax.random.normal(next(keys), shape, jnp.float32) * scale

  L = num_layers
  # TODO(synk): encode_conv_k1 and Alpha.dropout exist in __init__ but are
  # never used in forward(); omitted here.
  return dict(
      wq=rand((L, C2, 2 * C)), bq=rand((L, C2, 1)),
      wk=rand((L, C2, C)), bk=rand((L, C2, 1)),
      wv=rand((L, C2, C)), bv=rand((L, C2, 1)),
      wf=rand((L, C2 * C2, C2)), bf=rand((L, C2 * C2, 1)),
      acf_b=rand((L, C2, 1)),
      alpha_w=rand((L, C2, 1)), alpha_b=rand((L, 1, 1)),
      fire_w=rand((C, C2, 3, 3)), fire_b=rand((C, 1)),
      bn_gamma=jnp.ones((C, 1), jnp.float32),
      bn_beta=jnp.zeros((C, 1), jnp.float32),
      bn_mean=jnp.zeros((C, 1), jnp.float32),   # eval-mode BatchNorm stats
      bn_var=jnp.ones((C, 1), jnp.float32),
  )


if __name__ == "__main__":
  C, H, W = 8, 16, 16          # channel=8 -> C//2=4; k1=k2=k3=3; d=(1,3,5)
  ks, ds = (3, 3, 3), (1, 3, 5)
  key = jax.random.PRNGKey(0)
  k_enc, k_x, k_p = jax.random.split(key, 3)
  feats_encoder = jax.random.normal(k_enc, (1, 2 * C, H, W), jnp.float32)
  feats_encode = jax.random.normal(k_x, (1, C, H, W), jnp.float32)
  params = init_params(k_p, C)

  fwd = jax.jit(functools.partial(dcfm_forward, ks=ks, ds=ds, lane_tile=128))
  out = jax.block_until_ready(fwd(feats_encoder, feats_encode, params))
  assert out.shape == (1, C, H, W), out.shape
  assert bool(jnp.all(jnp.isfinite(out)))
  print("KERNEL_OK")
</pallas_src>

<mosaic_0001>
module attributes {stable_mosaic.version = 11 : i64} {
  func.func @_qkv_filter_kernel(%arg0: i32, %arg1: memref<16x128xbf16, #tpu.memory_space<vmem>>, %arg2: memref<8x128xbf16, #tpu.memory_space<vmem>>, %arg3: memref<3x4x16xbf16, #tpu.memory_space<vmem>>, %arg4: memref<3x4x1xf32, #tpu.memory_space<vmem>>, %arg5: memref<3x4x8xbf16, #tpu.memory_space<vmem>>, %arg6: memref<3x4x1xf32, #tpu.memory_space<vmem>>, %arg7: memref<3x4x8xbf16, #tpu.memory_space<vmem>>, %arg8: memref<3x4x1xf32, #tpu.memory_space<vmem>>, %arg9: memref<3x16x4xf32, #tpu.memory_space<vmem>>, %arg10: memref<3x16x1xf32, #tpu.memory_space<vmem>>, %arg11: memref<3x128x9xbf16, #tpu.memory_space<vmem>>, %arg12: memref<3x4x128xbf16, #tpu.memory_space<vmem>>, %arg13: memref<3x16x9xf32, #tpu.memory_space<vmem>>, %arg14: memref<3x4x4xf32, #tpu.memory_space<vmem>>, %arg15: memref<3x4x9xf32, #tpu.memory_space<vmem>>, %arg16: memref<3x4x9xf32, #tpu.memory_space<vmem>>) attributes {dimension_semantics = [#tpu.dimension_semantics<arbitrary>], iteration_bounds = array<i64: 2>, scalar_prefetch = 0 : i64, scratch_operands = 3 : i64, tpu.core_type = #tpu.core_type<tc>, window_params = [{transform_indices = @transform_0, window_bounds = array<i64: 16, 128>}, {transform_indices = @transform_1, window_bounds = array<i64: 8, 128>}, {pipeline_mode = #tpu.pipeline_mode<synchronous>, transform_indices = @transform_2, window_bounds = array<i64: 3, 4, 16>}, {pipeline_mode = #tpu.pipeline_mode<synchronous>, transform_indices = @transform_3, window_bounds = array<i64: 3, 4, 1>}, {pipeline_mode = #tpu.pipeline_mode<synchronous>, transform_indices = @transform_4, window_bounds = array<i64: 3, 4, 8>}, {pipeline_mode = #tpu.pipeline_mode<synchronous>, transform_indices = @transform_5, window_bounds = array<i64: 3, 4, 1>}, {pipeline_mode = #tpu.pipeline_mode<synchronous>, transform_indices = @transform_6, window_bounds = array<i64: 3, 4, 8>}, {pipeline_mode = #tpu.pipeline_mode<synchronous>, transform_indices = @transform_7, window_bounds = array<i64: 3, 4, 1>}, {pipeline_mode = #tpu.pipeline_mode<synchronous>, transform_indices = @transform_8, window_bounds = array<i64: 3, 16, 4>}, {pipeline_mode = #tpu.pipeline_mode<synchronous>, transform_indices = @transform_9, window_bounds = array<i64: 3, 16, 1>}, {transform_indices = @transform_10, window_bounds = array<i64: 3, 128, 9>}, {transform_indices = @transform_11, window_bounds = array<i64: 3, 4, 128>}, {pipeline_mode = #tpu.pipeline_mode<synchronous>, transform_indices = @transform_12, window_bounds = array<i64: 3, 16, 9>}]} {
    %c0_i32 = arith.constant 0 : i32
    %0 = arith.cmpi eq, %arg0, %c0_i32 : i32
    %1 = arith.extui %0 : i1 to i32
    %c0_i32_0 = arith.constant 0 : i32
    %2 = arith.cmpi ne, %1, %c0_i32_0 : i32
    scf.if %2 {
      %cst_146 = arith.constant 0.000000e+00 : f32
      %161 = vector.broadcast %cst_146 : f32 to vector<3x4x4xf32>
      %c0_147 = arith.constant 0 : index
      %c0_148 = arith.constant 0 : index
      %c0_149 = arith.constant 0 : index
      %162 = vector.load %arg14[%c0_147, %c0_148, %c0_149] : memref<3x4x4xf32, #tpu.memory_space<vmem>>, vector<3x4x4xf32>
      tpu.vector_store %arg14[%c0_147, %c0_148, %c0_149], %161 {strides = array<i32>} : memref<3x4x4xf32, #tpu.memory_space<vmem>>, vector<3x4x4xf32>,
      %cst_150 = arith.constant 0.000000e+00 : f32
      %163 = vector.broadcast %cst_150 : f32 to vector<3x4x9xf32>
      %c0_151 = arith.constant 0 : index
      %c0_152 = arith.constant 0 : index
      %c0_153 = arith.constant 0 : index
      %164 = vector.load %arg15[%c0_151, %c0_152, %c0_153] : memref<3x4x9xf32, #tpu.memory_space<vmem>>, vector<3x4x9xf32>
      tpu.vector_store %arg15[%c0_151, %c0_152, %c0_153], %163 {strides = array<i32>} : memref<3x4x9xf32, #tpu.memory_space<vmem>>, vector<3x4x9xf32>,
      %cst_154 = arith.constant 0.000000e+00 : f32
      %165 = vector.broadcast %cst_154 : f32 to vector<3x4x9xf32>
      %c0_155 = arith.constant 0 : index
      %c0_156 = arith.constant 0 : index
      %c0_157 = arith.constant 0 : index
      %166 = vector.load %arg16[%c0_155, %c0_156, %c0_157] : memref<3x4x9xf32, #tpu.memory_space<vmem>>, vector<3x4x9xf32>
      tpu.vector_store %arg16[%c0_155, %c0_156, %c0_157], %165 {strides = array<i32>} : memref<3x4x9xf32, #tpu.memory_space<vmem>>, vector<3x4x9xf32>,
    } else {
    }
    %c0 = arith.constant 0 : index
    %c0_1 = arith.constant 0 : index
    %3 = vector.load %arg1[%c0, %c0_1] : memref<16x128xbf16, #tpu.memory_space<vmem>>, vector<16x128xbf16>
    %c0_2 = arith.constant 0 : index
    %c0_3 = arith.constant 0 : index
    %4 = vector.load %arg2[%c0_2, %c0_3] : memref<8x128xbf16, #tpu.memory_space<vmem>>, vector<8x128xbf16>
    %c0_4 = arith.constant 0 : index
    %c0_5 = arith.constant 0 : index
    %c0_6 = arith.constant 0 : index
    %5 = vector.load %arg3[%c0_4, %c0_5, %c0_6] : memref<3x4x16xbf16, #tpu.memory_space<vmem>>, vector<1x4x16xbf16>
    %6 = vector.shape_cast %5 : vector<1x4x16xbf16> to vector<4x16xbf16>
    %cst = arith.constant dense<0.000000e+00> : vector<4x128xf32>
    %7 = tpu.matmul %6, %3, %cst {dimension_numbers = #tpu.dot_dimension_numbers<[1], [0], [0], [1], [0, 0, 1, 1], [], []>} : vector<4x16xbf16>, vector<16x128xbf16>, vector<4x128xf32> -> vector<4x128xf32>
    %c0_7 = arith.constant 0 : index
    %c0_8 = arith.constant 0 : index
    %c0_9 = arith.constant 0 : index
    %8 = vector.load %arg4[%c0_7, %c0_8, %c0_9] : memref<3x4x1xf32, #tpu.memory_space<vmem>>, vector<1x4x1xf32>
    %9 = vector.shape_cast %8 : vector<1x4x1xf32> to vector<4x1xf32>
    %10 = vector.broadcast %9 : vector<4x1xf32> to vector<4x128xf32>
    %11 = arith.addf %7, %10 : vector<4x128xf32>
    %c0_10 = arith.constant 0 : index
    %c0_11 = arith.constant 0 : index
    %c0_12 = arith.constant 0 : index
    %12 = vector.load %arg5[%c0_10, %c0_11, %c0_12] : memref<3x4x8xbf16, #tpu.memory_space<vmem>>, vector<1x4x8xbf16>
    %13 = vector.shape_cast %12 : vector<1x4x8xbf16> to vector<4x8xbf16>
    %cst_13 = arith.constant dense<0.000000e+00> : vector<4x128xf32>
    %14 = tpu.matmul %13, %4, %cst_13 {dimension_numbers = #tpu.dot_dimension_numbers<[1], [0], [0], [1], [0, 0, 1, 1], [], []>} : vector<4x8xbf16>, vector<8x128xbf16>, vector<4x128xf32> -> vector<4x128xf32>
    %c0_14 = arith.constant 0 : index
    %c0_15 = arith.constant 0 : index
    %c0_16 = arith.constant 0 : index
    %15 = vector.load %arg6[%c0_14, %c0_15, %c0_16] : memref<3x4x1xf32, #tpu.memory_space<vmem>>, vector<1x4x1xf32>
    %16 = vector.shape_cast %15 : vector<1x4x1xf32> to vector<4x1xf32>
    %17 = vector.broadcast %16 : vector<4x1xf32> to vector<4x128xf32>
    %18 = arith.addf %14, %17 : vector<4x128xf32>
    %c0_17 = arith.constant 0 : index
    %c0_18 = arith.constant 0 : index
    %c0_19 = arith.constant 0 : index
    %19 = vector.load %arg7[%c0_17, %c0_18, %c0_19] : memref<3x4x8xbf16, #tpu.memory_space<vmem>>, vector<1x4x8xbf16>
    %20 = vector.shape_cast %19 : vector<1x4x8xbf16> to vector<4x8xbf16>
    %cst_20 = arith.constant dense<0.000000e+00> : vector<4x128xf32>
    %21 = tpu.matmul %20, %4, %cst_20 {dimension_numbers = #tpu.dot_dimension_numbers<[1], [0], [0], [1], [0, 0, 1, 1], [], []>} : vector<4x8xbf16>, vector<8x128xbf16>, vector<4x128xf32> -> vector<4x128xf32>
    %c0_21 = arith.constant 0 : index
    %c0_22 = arith.constant 0 : index
    %c0_23 = arith.constant 0 : index
    %22 = vector.load %arg8[%c0_21, %c0_22, %c0_23] : memref<3x4x1xf32, #tpu.memory_space<vmem>>, vector<1x4x1xf32>
    %23 = vector.shape_cast %22 : vector<1x4x1xf32> to vector<4x1xf32>
    %24 = vector.broadcast %23 : vector<4x1xf32> to vector<4x128xf32>
    %25 = arith.addf %21, %24 : vector<4x128xf32>
    %26 = arith.truncf %25 : vector<4x128xf32> to vector<4x128xbf16>
    %c0_24 = arith.constant 0 : index
    %c0_25 = arith.constant 0 : index
    %c0_26 = arith.constant 0 : index
    %27 = vector.load %arg12[%c0_24, %c0_25, %c0_26] : memref<3x4x128xbf16, #tpu.memory_space<vmem>>, vector<1x4x128xbf16>
    %28 = vector.shape_cast %27 : vector<1x4x128xbf16> to vector<4x128xbf16>
    %29 = vector.shape_cast %26 : vector<4x128xbf16> to vector<1x4x128xbf16>
    tpu.vector_store %arg12[%c0_24, %c0_25, %c0_26], %29 {strides = array<i32>} : memref<3x4x128xbf16, #tpu.memory_space<vmem>>, vector<1x4x128xbf16>,
    %30 = arith.truncf %11 : vector<4x128xf32> to vector<4x128xbf16>
    %31 = arith.truncf %18 : vector<4x128xf32> to vector<4x128xbf16>
    %32 = arith.truncf %25 : vector<4x128xf32> to vector<4x128xbf16>
    %c0_27 = arith.constant 0 : index
    %c0_28 = arith.constant 0 : index
    %c0_29 = arith.constant 0 : index
    %33 = vector.load %arg11[%c0_27, %c0_28, %c0_29] : memref<3x128x9xbf16, #tpu.memory_space<vmem>>, vector<1x128x9xbf16>
    %34 = vector.shape_cast %33 : vector<1x128x9xbf16> to vector<128x9xbf16>
    %c0_30 = arith.constant 0 : index
    %c0_31 = arith.constant 0 : index
    %c0_32 = arith.constant 0 : index
    %35 = vector.load %arg14[%c0_30, %c0_31, %c0_32] : memref<3x4x4xf32, #tpu.memory_space<vmem>>, vector<1x4x4xf32>
    %36 = vector.shape_cast %35 : vector<1x4x4xf32> to vector<4x4xf32>
    %cst_33 = arith.constant dense<0.000000e+00> : vector<4x4xf32>
    %37 = tpu.matmul %30, %31, %cst_33 {dimension_numbers = #tpu.dot_dimension_numbers<[1], [1], [0], [0], [0, 0, 1, 0], [], []>} : vector<4x128xbf16>, vector<4x128xbf16>, vector<4x4xf32> -> vector<4x4xf32>
    %38 = arith.addf %36, %37 : vector<4x4xf32>
    %c0_34 = arith.constant 0 : index
    %c0_35 = arith.constant 0 : index
    %c0_36 = arith.constant 0 : index
    %39 = vector.load %arg14[%c0_34, %c0_35, %c0_36] : memref<3x4x4xf32, #tpu.memory_space<vmem>>, vector<1x4x4xf32>
    %40 = vector.shape_cast %39 : vector<1x4x4xf32> to vector<4x4xf32>
    %41 = vector.shape_cast %38 : vector<4x4xf32> to vector<1x4x4xf32>
    tpu.vector_store %arg14[%c0_34, %c0_35, %c0_36], %41 {strides = array<i32>} : memref<3x4x4xf32, #tpu.memory_space<vmem>>, vector<1x4x4xf32>,
    %c0_37 = arith.constant 0 : index
    %c0_38 = arith.constant 0 : index
    %c0_39 = arith.constant 0 : index
    %42 = vector.load %arg15[%c0_37, %c0_38, %c0_39] : memref<3x4x9xf32, #tpu.memory_space<vmem>>, vector<1x4x9xf32>
    %43 = vector.shape_cast %42 : vector<1x4x9xf32> to vector<4x9xf32>
    %cst_40 = arith.constant dense<0.000000e+00> : vector<4x9xf32>
    %44 = tpu.matmul %32, %34, %cst_40 {dimension_numbers = #tpu.dot_dimension_numbers<[1], [0], [0], [1], [0, 0, 1, 1], [], []>} : vector<4x128xbf16>, vector<128x9xbf16>, vector<4x9xf32> -> vector<4x9xf32>
    %45 = arith.addf %43, %44 : vector<4x9xf32>
    %c0_41 = arith.constant 0 : index
    %c0_42 = arith.constant 0 : index
    %c0_43 = arith.constant 0 : index
    %46 = vector.load %arg15[%c0_41, %c0_42, %c0_43] : memref<3x4x9xf32, #tpu.memory_space<vmem>>, vector<1x4x9xf32>
    %47 = vector.shape_cast %46 : vector<1x4x9xf32> to vector<4x9xf32>
    %48 = vector.shape_cast %45 : vector<4x9xf32> to vector<1x4x9xf32>
    tpu.vector_store %arg15[%c0_41, %c0_42, %c0_43], %48 {strides = array<i32>} : memref<3x4x9xf32, #tpu.memory_space<vmem>>, vector<1x4x9xf32>,
    %c0_44 = arith.constant 0 : index
    %c0_45 = arith.constant 0 : index
    %c0_46 = arith.constant 0 : index
    %49 = vector.load %arg16[%c0_44, %c0_45, %c0_46] : memref<3x4x9xf32, #tpu.memory_space<vmem>>, vector<1x4x9xf32>
    %50 = vector.shape_cast %49 : vector<1x4x9xf32> to vector<4x9xf32>
    %cst_47 = arith.constant dense<0.000000e+00> : vector<4x9xf32>
    %51 = tpu.matmul %30, %34, %cst_47 {dimension_numbers = #tpu.dot_dimension_numbers<[1], [0], [0], [1], [0, 0, 1, 1], [], []>} : vector<4x128xbf16>, vector<128x9xbf16>, vector<4x9xf32> -> vector<4x9xf32>
    %52 = arith.addf %50, %51 : vector<4x9xf32>
    %c0_48 = arith.constant 0 : index
    %c0_49 = arith.constant 0 : index
    %c0_50 = arith.constant 0 : index
    %53 = vector.load %arg16[%c0_48, %c0_49, %c0_50] : memref<3x4x9xf32, #tpu.memory_space<vmem>>, vector<1x4x9xf32>
    %54 = vector.shape_cast %53 : vector<1x4x9xf32> to vector<4x9xf32>
    %55 = vector.shape_cast %52 : vector<4x9xf32> to vector<1x4x9xf32>
    tpu.vector_store %arg16[%c0_48, %c0_49, %c0_50], %55 {strides = array<i32>} : memref<3x4x9xf32, #tpu.memory_space<vmem>>, vector<1x4x9xf32>,
    %c1 = arith.constant 1 : index
    %c0_51 = arith.constant 0 : index
    %c0_52 = arith.constant 0 : index
    %56 = vector.load %arg3[%c1, %c0_51, %c0_52] : memref<3x4x16xbf16, #tpu.memory_space<vmem>>, vector<1x4x16xbf16>
    %57 = vector.shape_cast %56 : vector<1x4x16xbf16> to vector<4x16xbf16>
    %cst_53 = arith.constant dense<0.000000e+00> : vector<4x128xf32>
    %58 = tpu.matmul %57, %3, %cst_53 {dimension_numbers = #tpu.dot_dimension_numbers<[1], [0], [0], [1], [0, 0, 1, 1], [], []>} : vector<4x16xbf16>, vector<16x128xbf16>, vector<4x128xf32> -> vector<4x128xf32>
    %c1_54 = arith.constant 1 : index
    %c0_55 = arith.constant 0 : index
    %c0_56 = arith.constant 0 : index
    %59 = vector.load %arg4[%c1_54, %c0_55, %c0_56] : memref<3x4x1xf32, #tpu.memory_space<vmem>>, vector<1x4x1xf32>
    %60 = vector.shape_cast %59 : vector<1x4x1xf32> to vector<4x1xf32>
    %61 = vector.broadcast %60 : vector<4x1xf32> to vector<4x128xf32>
    %62 = arith.addf %58, %61 : vector<4x128xf32>
    %c1_57 = arith.constant 1 : index
    %c0_58 = arith.constant 0 : index
    %c0_59 = arith.constant 0 : index
    %63 = vector.load %arg5[%c1_57, %c0_58, %c0_59] : memref<3x4x8xbf16, #tpu.memory_space<vmem>>, vector<1x4x8xbf16>
    %64 = vector.shape_cast %63 : vector<1x4x8xbf16> to vector<4x8xbf16>
    %cst_60 = arith.constant dense<0.000000e+00> : vector<4x128xf32>
    %65 = tpu.matmul %64, %4, %cst_60 {dimension_numbers = #tpu.dot_dimension_numbers<[1], [0], [0], [1], [0, 0, 1, 1], [], []>} : vector<4x8xbf16>, vector<8x128xbf16>, vector<4x128xf32> -> vector<4x128xf32>
    %c1_61 = arith.constant 1 : index
    %c0_62 = arith.constant 0 : index
    %c0_63 = arith.constant 0 : index
    %66 = vector.load %arg6[%c1_61, %c0_62, %c0_63] : memref<3x4x1xf32, #tpu.memory_space<vmem>>, vector<1x4x1xf32>
    %67 = vector.shape_cast %66 : vector<1x4x1xf32> to vector<4x1xf32>
    %68 = vector.broadcast %67 : vector<4x1xf32> to vector<4x128xf32>
    %69 = arith.addf %65, %68 : vector<4x128xf32>
    %c1_64 = arith.constant 1 : index
    %c0_65 = arith.constant 0 : index
    %c0_66 = arith.constant 0 : index
    %70 = vector.load %arg7[%c1_64, %c0_65, %c0_66] : memref<3x4x8xbf16, #tpu.memory_space<vmem>>, vector<1x4x8xbf16>
    %71 = vector.shape_cast %70 : vector<1x4x8xbf16> to vector<4x8xbf16>
    %cst_67 = arith.constant dense<0.000000e+00> : vector<4x128xf32>
    %72 = tpu.matmul %71, %4, %cst_67 {dimension_numbers = #tpu.dot_dimension_numbers<[1], [0], [0], [1], [0, 0, 1, 1], [], []>} : vector<4x8xbf16>, vector<8x128xbf16>, vector<4x128xf32> -> vector<4x128xf32>
    %c1_68 = arith.constant 1 : index
    %c0_69 = arith.constant 0 : index
    %c0_70 = arith.constant 0 : index
    %73 = vector.load %arg8[%c1_68, %c0_69, %c0_70] : memref<3x4x1xf32, #tpu.memory_space<vmem>>, vector<1x4x1xf32>
    %74 = vector.shape_cast %73 : vector<1x4x1xf32> to vector<4x1xf32>
    %75 = vector.broadcast %74 : vector<4x1xf32> to vector<4x128xf32>
    %76 = arith.addf %72, %75 : vector<4x128xf32>
    %77 = arith.truncf %76 : vector<4x128xf32> to vector<4x128xbf16>
    %c1_71 = arith.constant 1 : index
    %c0_72 = arith.constant 0 : index
    %c0_73 = arith.constant 0 : index
    %78 = vector.load %arg12[%c1_71, %c0_72, %c0_73] : memref<3x4x128xbf16, #tpu.memory_space<vmem>>, vector<1x4x128xbf16>
    %79 = vector.shape_cast %78 : vector<1x4x128xbf16> to vector<4x128xbf16>
    %80 = vector.shape_cast %77 : vector<4x128xbf16> to vector<1x4x128xbf16>
    tpu.vector_store %arg12[%c1_71, %c0_72, %c0_73], %80 {strides = array<i32>} : memref<3x4x128xbf16, #tpu.memory_space<vmem>>, vector<1x4x128xbf16>,
    %81 = arith.truncf %62 : vector<4x128xf32> to vector<4x128xbf16>
    %82 = arith.truncf %69 : vector<4x128xf32> to vector<4x128xbf16>
    %83 = arith.truncf %76 : vector<4x128xf32> to vector<4x128xbf16>
    %c1_74 = arith.constant 1 : index
    %c0_75 = arith.constant 0 : index
    %c0_76 = arith.constant 0 : index
    %84 = vector.load %arg11[%c1_74, %c0_75, %c0_76] : memref<3x128x9xbf16, #tpu.memory_space<vmem>>, vector<1x128x9xbf16>
    %85 = vector.shape_cast %84 : vector<1x128x9xbf16> to vector<128x9xbf16>
    %c1_77 = arith.constant 1 : index
    %c0_78 = arith.constant 0 : index
    %c0_79 = arith.constant 0 : index
    %86 = vector.load %arg14[%c1_77, %c0_78, %c0_79] : memref<3x4x4xf32, #tpu.memory_space<vmem>>, vector<1x4x4xf32>
    %87 = vector.shape_cast %86 : vector<1x4x4xf32> to vector<4x4xf32>
    %cst_80 = arith.constant dense<0.000000e+00> : vector<4x4xf32>
    %88 = tpu.matmul %81, %82, %cst_80 {dimension_numbers = #tpu.dot_dimension_numbers<[1], [1], [0], [0], [0, 0, 1, 0], [], []>} : vector<4x128xbf16>, vector<4x128xbf16>, vector<4x4xf32> -> vector<4x4xf32>
    %89 = arith.addf %87, %88 : vector<4x4xf32>
    %c1_81 = arith.constant 1 : index
    %c0_82 = arith.constant 0 : index
    %c0_83 = arith.constant 0 : index
    %90 = vector.load %arg14[%c1_81, %c0_82, %c0_83] : memref<3x4x4xf32, #tpu.memory_space<vmem>>, vector<1x4x4xf32>
    %91 = vector.shape_cast %90 : vector<1x4x4xf32> to vector<4x4xf32>
    %92 = vector.shape_cast %89 : vector<4x4xf32> to vector<1x4x4xf32>
    tpu.vector_store %arg14[%c1_81, %c0_82, %c0_83], %92 {strides = array<i32>} : memref<3x4x4xf32, #tpu.memory_space<vmem>>, vector<1x4x4xf32>,
    %c1_84 = arith.constant 1 : index
    %c0_85 = arith.constant 0 : index
    %c0_86 = arith.constant 0 : index
    %93 = vector.load %arg15[%c1_84, %c0_85, %c0_86] : memref<3x4x9xf32, #tpu.memory_space<vmem>>, vector<1x4x9xf32>
    %94 = vector.shape_cast %93 : vector<1x4x9xf32> to vector<4x9xf32>
    %cst_87 = arith.constant dense<0.000000e+00> : vector<4x9xf32>
    %95 = tpu.matmul %83, %85, %cst_87 {dimension_numbers = #tpu.dot_dimension_numbers<[1], [0], [0], [1], [0, 0, 1, 1], [], []>} : vector<4x128xbf16>, vector<128x9xbf16>, vector<4x9xf32> -> vector<4x9xf32>
    %96 = arith.addf %94, %95 : vector<4x9xf32>
    %c1_88 = arith.constant 1 : index
    %c0_89 = arith.constant 0 : index
    %c0_90 = arith.constant 0 : index
    %97 = vector.load %arg15[%c1_88, %c0_89, %c0_90] : memref<3x4x9xf32, #tpu.memory_space<vmem>>, vector<1x4x9xf32>
    %98 = vector.shape_cast %97 : vector<1x4x9xf32> to vector<4x9xf32>
    %99 = vector.shape_cast %96 : vector<4x9xf32> to vector<1x4x9xf32>
    tpu.vector_store %arg15[%c1_88, %c0_89, %c0_90], %99 {strides = array<i32>} : memref<3x4x9xf32, #tpu.memory_space<vmem>>, vector<1x4x9xf32>,
    %c1_91 = arith.constant 1 : index
    %c0_92 = arith.constant 0 : index
    %c0_93 = arith.constant 0 : index
    %100 = vector.load %arg16[%c1_91, %c0_92, %c0_93] : memref<3x4x9xf32, #tpu.memory_space<vmem>>, vector<1x4x9xf32>
    %101 = vector.shape_cast %100 : vector<1x4x9xf32> to vector<4x9xf32>
    %cst_94 = arith.constant dense<0.000000e+00> : vector<4x9xf32>
    %102 = tpu.matmul %81, %85, %cst_94 {dimension_numbers = #tpu.dot_dimension_numbers<[1], [0], [0], [1], [0, 0, 1, 1], [], []>} : vector<4x128xbf16>, vector<128x9xbf16>, vector<4x9xf32> -> vector<4x9xf32>
    %103 = arith.addf %101, %102 : vector<4x9xf32>
    %c1_95 = arith.constant 1 : index
    %c0_96 = arith.constant 0 : index
    %c0_97 = arith.constant 0 : index
    %104 = vector.load %arg16[%c1_95, %c0_96, %c0_97] : memref<3x4x9xf32, #tpu.memory_space<vmem>>, vector<1x4x9xf32>
    %105 = vector.shape_cast %104 : vector<1x4x9xf32> to vector<4x9xf32>
    %106 = vector.shape_cast %103 : vector<4x9xf32> to vector<1x4x9xf32>
    tpu.vector_store %arg16[%c1_95, %c0_96, %c0_97], %106 {strides = array<i32>} : memref<3x4x9xf32, #tpu.memory_space<vmem>>, vector<1x4x9xf32>,
    %c2 = arith.constant 2 : index
    %c0_98 = arith.constant 0 : index
    %c0_99 = arith.constant 0 : index
    %107 = vector.load %arg3[%c2, %c0_98, %c0_99] : memref<3x4x16xbf16, #tpu.memory_space<vmem>>, vector<1x4x16xbf16>
    %108 = vector.shape_cast %107 : vector<1x4x16xbf16> to vector<4x16xbf16>
    %cst_100 = arith.constant dense<0.000000e+00> : vector<4x128xf32>
    %109 = tpu.matmul %108, %3, %cst_100 {dimension_numbers = #tpu.dot_dimension_numbers<[1], [0], [0], [1], [0, 0, 1, 1], [], []>} : vector<4x16xbf16>, vector<16x128xbf16>, vector<4x128xf32> -> vector<4x128xf32>
    %c2_101 = arith.constant 2 : index
    %c0_102 = arith.constant 0 : index
    %c0_103 = arith.constant 0 : index
    %110 = vector.load %arg4[%c2_101, %c0_102, %c0_103] : memref<3x4x1xf32, #tpu.memory_space<vmem>>, vector<1x4x1xf32>
    %111 = vector.shape_cast %110 : vector<1x4x1xf32> to vector<4x1xf32>
    %112 = vector.broadcast %111 : vector<4x1xf32> to vector<4x128xf32>
    %113 = arith.addf %109, %112 : vector<4x128xf32>
    %c2_104 = arith.constant 2 : index
    %c0_105 = arith.constant 0 : index
    %c0_106 = arith.constant 0 : index
    %114 = vector.load %arg5[%c2_104, %c0_105, %c0_106] : memref<3x4x8xbf16, #tpu.memory_space<vmem>>, vector<1x4x8xbf16>
    %115 = vector.shape_cast %114 : vector<1x4x8xbf16> to vector<4x8xbf16>
    %cst_107 = arith.constant dense<0.000000e+00> : vector<4x128xf32>
    %116 = tpu.matmul %115, %4, %cst_107 {dimension_numbers = #tpu.dot_dimension_numbers<[1], [0], [0], [1], [0, 0, 1, 1], [], []>} : vector<4x8xbf16>, vector<8x128xbf16>, vector<4x128xf32> -> vector<4x128xf32>
    %c2_108 = arith.constant 2 : index
    %c0_109 = arith.constant 0 : index
    %c0_110 = arith.constant 0 : index
    %117 = vector.load %arg6[%c2_108, %c0_109, %c0_110] : memref<3x4x1xf32, #tpu.memory_space<vmem>>, vector<1x4x1xf32>
    %118 = vector.shape_cast %117 : vector<1x4x1xf32> to vector<4x1xf32>
    %119 = vector.broadcast %118 : vector<4x1xf32> to vector<4x128xf32>
    %120 = arith.addf %116, %119 : vector<4x128xf32>
    %c2_111 = arith.constant 2 : index
    %c0_112 = arith.constant 0 : index
    %c0_113 = arith.constant 0 : index
    %121 = vector.load %arg7[%c2_111, %c0_112, %c0_113] : memref<3x4x8xbf16, #tpu.memory_space<vmem>>, vector<1x4x8xbf16>
    %122 = vector.shape_cast %121 : vector<1x4x8xbf16> to vector<4x8xbf16>
    %cst_114 = arith.constant dense<0.000000e+00> : vector<4x128xf32>
    %123 = tpu.matmul %122, %4, %cst_114 {dimension_numbers = #tpu.dot_dimension_numbers<[1], [0], [0], [1], [0, 0, 1, 1], [], []>} : vector<4x8xbf16>, vector<8x128xbf16>, vector<4x128xf32> -> vector<4x128xf32>
    %c2_115 = arith.constant 2 : index
    %c0_116 = arith.constant 0 : index
    %c0_117 = arith.constant 0 : index
    %124 = vector.load %arg8[%c2_115, %c0_116, %c0_117] : memref<3x4x1xf32, #tpu.memory_space<vmem>>, vector<1x4x1xf32>
    %125 = vector.shape_cast %124 : vector<1x4x1xf32> to vector<4x1xf32>
    %126 = vector.broadcast %125 : vector<4x1xf32> to vector<4x128xf32>
    %127 = arith.addf %123, %126 : vector<4x128xf32>
    %128 = arith.truncf %127 : vector<4x128xf32> to vector<4x128xbf16>
    %c2_118 = arith.constant 2 : index
    %c0_119 = arith.constant 0 : index
    %c0_120 = arith.constant 0 : index
    %129 = vector.load %arg12[%c2_118, %c0_119, %c0_120] : memref<3x4x128xbf16, #tpu.memory_space<vmem>>, vector<1x4x128xbf16>
    %130 = vector.shape_cast %129 : vector<1x4x128xbf16> to vector<4x128xbf16>
    %131 = vector.shape_cast %128 : vector<4x128xbf16> to vector<1x4x128xbf16>
    tpu.vector_store %arg12[%c2_118, %c0_119, %c0_120], %131 {strides = array<i32>} : memref<3x4x128xbf16, #tpu.memory_space<vmem>>, vector<1x4x128xbf16>,
    %132 = arith.truncf %113 : vector<4x128xf32> to vector<4x128xbf16>
    %133 = arith.truncf %120 : vector<4x128xf32> to vector<4x128xbf16>
    %134 = arith.truncf %127 : vector<4x128xf32> to vector<4x128xbf16>
    %c2_121 = arith.constant 2 : index
    %c0_122 = arith.constant 0 : index
    %c0_123 = arith.constant 0 : index
    %135 = vector.load %arg11[%c2_121, %c0_122, %c0_123] : memref<3x128x9xbf16, #tpu.memory_space<vmem>>, vector<1x128x9xbf16>
    %136 = vector.shape_cast %135 : vector<1x128x9xbf16> to vector<128x9xbf16>
    %c2_124 = arith.constant 2 : index
    %c0_125 = arith.constant 0 : index
    %c0_126 = arith.constant 0 : index
    %137 = vector.load %arg14[%c2_124, %c0_125, %c0_126] : memref<3x4x4xf32, #tpu.memory_space<vmem>>, vector<1x4x4xf32>
    %138 = vector.shape_cast %137 : vector<1x4x4xf32> to vector<4x4xf32>
    %cst_127 = arith.constant dense<0.000000e+00> : vector<4x4xf32>
    %139 = tpu.matmul %132, %133, %cst_127 {dimension_numbers = #tpu.dot_dimension_numbers<[1], [1], [0], [0], [0, 0, 1, 0], [], []>} : vector<4x128xbf16>, vector<4x128xbf16>, vector<4x4xf32> -> vector<4x4xf32>
    %140 = arith.addf %138, %139 : vector<4x4xf32>
    %c2_128 = arith.constant 2 : index
    %c0_129 = arith.constant 0 : index
    %c0_130 = arith.constant 0 : index
    %141 = vector.load %arg14[%c2_128, %c0_129, %c0_130] : memref<3x4x4xf32, #tpu.memory_space<vmem>>, vector<1x4x4xf32>
    %142 = vector.shape_cast %141 : vector<1x4x4xf32> to vector<4x4xf32>
    %143 = vector.shape_cast %140 : vector<4x4xf32> to vector<1x4x4xf32>
    tpu.vector_store %arg14[%c2_128, %c0_129, %c0_130], %143 {strides = array<i32>} : memref<3x4x4xf32, #tpu.memory_space<vmem>>, vector<1x4x4xf32>,
    %c2_131 = arith.constant 2 : index
    %c0_132 = arith.constant 0 : index
    %c0_133 = arith.constant 0 : index
    %144 = vector.load %arg15[%c2_131, %c0_132, %c0_133] : memref<3x4x9xf32, #tpu.memory_space<vmem>>, vector<1x4x9xf32>
    %145 = vector.shape_cast %144 : vector<1x4x9xf32> to vector<4x9xf32>
    %cst_134 = arith.constant dense<0.000000e+00> : vector<4x9xf32>
    %146 = tpu.matmul %134, %136, %cst_134 {dimension_numbers = #tpu.dot_dimension_numbers<[1], [0], [0], [1], [0, 0, 1, 1], [], []>} : vector<4x128xbf16>, vector<128x9xbf16>, vector<4x9xf32> -> vector<4x9xf32>
    %147 = arith.addf %145, %146 : vector<4x9xf32>
    %c2_135 = arith.constant 2 : index
    %c0_136 = arith.constant 0 : index
    %c0_137 = arith.constant 0 : index
    %148 = vector.load %arg15[%c2_135, %c0_136, %c0_137] : memref<3x4x9xf32, #tpu.memory_space<vmem>>, vector<1x4x9xf32>
    %149 = vector.shape_cast %148 : vector<1x4x9xf32> to vector<4x9xf32>
    %150 = vector.shape_cast %147 : vector<4x9xf32> to vector<1x4x9xf32>
    tpu.vector_store %arg15[%c2_135, %c0_136, %c0_137], %150 {strides = array<i32>} : memref<3x4x9xf32, #tpu.memory_space<vmem>>, vector<1x4x9xf32>,
    %c2_138 = arith.constant 2 : index
    %c0_139 = arith.constant 0 : index
    %c0_140 = arith.constant 0 : index
    %151 = vector.load %arg16[%c2_138, %c0_139, %c0_140] : memref<3x4x9xf32, #tpu.memory_space<vmem>>, vector<1x4x9xf32>
    %152 = vector.shape_cast %151 : vector<1x4x9xf32> to vector<4x9xf32>
    %cst_141 = arith.constant dense<0.000000e+00> : vector<4x9xf32>
    %153 = tpu.matmul %132, %136, %cst_141 {dimension_numbers = #tpu.dot_dimension_numbers<[1], [0], [0], [1], [0, 0, 1, 1], [], []>} : vector<4x128xbf16>, vector<128x9xbf16>, vector<4x9xf32> -> vector<4x9xf32>
    %154 = arith.addf %152, %153 : vector<4x9xf32>
    %c2_142 = arith.constant 2 : index
    %c0_143 = arith.constant 0 : index
    %c0_144 = arith.constant 0 : index
    %155 = vector.load %arg16[%c2_142, %c0_143, %c0_144] : memref<3x4x9xf32, #tpu.memory_space<vmem>>, vector<1x4x9xf32>
    %156 = vector.shape_cast %155 : vector<1x4x9xf32> to vector<4x9xf32>
    %157 = vector.shape_cast %154 : vector<4x9xf32> to vector<1x4x9xf32>
    tpu.vector_store %arg16[%c2_142, %c0_143, %c0_144], %157 {strides = array<i32>} : memref<3x4x9xf32, #tpu.memory_space<vmem>>, vector<1x4x9xf32>,
    %c1_i32 = arith.constant 1 : i32
    %158 = arith.cmpi eq, %arg0, %c1_i32 : i32
    %159 = arith.extui %158 : i1 to i32
    %c0_i32_145 = arith.constant 0 : i32
    %160 = arith.cmpi ne, %159, %c0_i32_145 : i32
    scf.if %160 {
      %c0_146 = arith.constant 0 : index
      %c0_147 = arith.constant 0 : index
      %c0_148 = arith.constant 0 : index
      %161 = vector.load %arg14[%c0_146, %c0_147, %c0_148] : memref<3x4x4xf32, #tpu.memory_space<vmem>>, vector<1x4x4xf32>
      %162 = vector.shape_cast %161 : vector<1x4x4xf32> to vector<4x4xf32>
      %cst_149 = arith.constant dense<0xFF800000> : vector<4xf32>
      %163 = vector.multi_reduction <maximumf>, %162, %cst_149 [1] : vector<4x4xf32> to vector<4xf32>
      %164 = vector.shape_cast %163 : vector<4xf32> to vector<4x1xf32>
      %165 = vector.broadcast %164 : vector<4x1xf32> to vector<4x4xf32>
      %166 = arith.subf %162, %165 : vector<4x4xf32>
      %167 = math.exp %166 : vector<4x4xf32>
      %cst_150 = arith.constant dense<0.000000e+00> : vector<4xf32>
      %168 = vector.multi_reduction <add>, %167, %cst_150 [1] : vector<4x4xf32> to vector<4xf32>
      %169 = vector.shape_cast %168 : vector<4xf32> to vector<4x1xf32>
      %170 = vector.broadcast %169 : vector<4x1xf32> to vector<4x4xf32>
      %171 = arith.divf %167, %170 : vector<4x4xf32>
      %c0_151 = arith.constant 0 : index
      %c0_152 = arith.constant 0 : index
      %c0_153 = arith.constant 0 : index
      %172 = vector.load %arg15[%c0_151, %c0_152, %c0_153] : memref<3x4x9xf32, #tpu.memory_space<vmem>>, vector<1x4x9xf32>
      %173 = vector.shape_cast %172 : vector<1x4x9xf32> to vector<4x9xf32>
      %cst_154 = arith.constant dense<0.000000e+00> : vector<4x9xf32>
      %174 = tpu.matmul %171, %173, %cst_154 {dimension_numbers = #tpu.dot_dimension_numbers<[1], [0], [0], [1], [0, 0, 1, 1], [], []>} : vector<4x4xf32>, vector<4x9xf32>, vector<4x9xf32> -> vector<4x9xf32>
      %c0_155 = arith.constant 0 : index
      %c0_156 = arith.constant 0 : index
      %c0_157 = arith.constant 0 : index
      %175 = vector.load %arg16[%c0_155, %c0_156, %c0_157] : memref<3x4x9xf32, #tpu.memory_space<vmem>>, vector<1x4x9xf32>
      %176 = vector.shape_cast %175 : vector<1x4x9xf32> to vector<4x9xf32>
      %177 = arith.addf %174, %176 : vector<4x9xf32>
      %c0_158 = arith.constant 0 : index
      %c0_159 = arith.constant 0 : index
      %c0_160 = arith.constant 0 : index
      %178 = vector.load %arg9[%c0_158, %c0_159, %c0_160] : memref<3x16x4xf32, #tpu.memory_space<vmem>>, vector<1x16x4xf32>
      %179 = vector.shape_cast %178 : vector<1x16x4xf32> to vector<16x4xf32>
      %cst_161 = arith.constant dense<0.000000e+00> : vector<16x9xf32>
      %180 = tpu.matmul %179, %177, %cst_161 {dimension_numbers = #tpu.dot_dimension_numbers<[1], [0], [0], [1], [0, 0, 1, 1], [], []>} : vector<16x4xf32>, vector<4x9xf32>, vector<16x9xf32> -> vector<16x9xf32>
      %c0_162 = arith.constant 0 : index
      %c0_163 = arith.constant 0 : index
      %c0_164 = arith.constant 0 : index
      %181 = vector.load %arg10[%c0_162, %c0_163, %c0_164] : memref<3x16x1xf32, #tpu.memory_space<vmem>>, vector<1x16x1xf32>
      %182 = vector.shape_cast %181 : vector<1x16x1xf32> to vector<16x1xf32>
      %183 = vector.broadcast %182 : vector<16x1xf32> to vector<16x9xf32>
      %184 = arith.addf %180, %183 : vector<16x9xf32>
      %c0_165 = arith.constant 0 : index
      %c0_166 = arith.constant 0 : index
      %c0_167 = arith.constant 0 : index
      %185 = vector.load %arg13[%c0_165, %c0_166, %c0_167] : memref<3x16x9xf32, #tpu.memory_space<vmem>>, vector<1x16x9xf32>
      %186 = vector.shape_cast %185 : vector<1x16x9xf32> to vector<16x9xf32>
      %187 = vector.shape_cast %184 : vector<16x9xf32> to vector<1x16x9xf32>
      tpu.vector_store %arg13[%c0_165, %c0_166, %c0_167], %187 {strides = array<i32>} : memref<3x16x9xf32, #tpu.memory_space<vmem>>, vector<1x16x9xf32>,
      %c1_168 = arith.constant 1 : index
      %c0_169 = arith.constant 0 : index
      %c0_170 = arith.constant 0 : index
      %188 = vector.load %arg14[%c1_168, %c0_169, %c0_170] : memref<3x4x4xf32, #tpu.memory_space<vmem>>, vector<1x4x4xf32>
      %189 = vector.shape_cast %188 : vector<1x4x4xf32> to vector<4x4xf32>
      %cst_171 = arith.constant dense<0xFF800000> : vector<4xf32>
      %190 = vector.multi_reduction <maximumf>, %189, %cst_171 [1] : vector<4x4xf32> to vector<4xf32>
      %191 = vector.shape_cast %190 : vector<4xf32> to vector<4x1xf32>
      %192 = vector.broadcast %191 : vector<4x1xf32> to vector<4x4xf32>
      %193 = arith.subf %189, %192 : vector<4x4xf32>
      %194 = math.exp %193 : vector<4x4xf32>
      %cst_172 = arith.constant dense<0.000000e+00> : vector<4xf32>
      %195 = vector.multi_reduction <add>, %194, %cst_172 [1] : vector<4x4xf32> to vector<4xf32>
      %196 = vector.shape_cast %195 : vector<4xf32> to vector<4x1xf32>
      %197 = vector.broadcast %196 : vector<4x1xf32> to vector<4x4xf32>
      %198 = arith.divf %194, %197 : vector<4x4xf32>
      %c1_173 = arith.constant 1 : index
      %c0_174 = arith.constant 0 : index
      %c0_175 = arith.constant 0 : index
      %199 = vector.load %arg15[%c1_173, %c0_174, %c0_175] : memref<3x4x9xf32, #tpu.memory_space<vmem>>, vector<1x4x9xf32>
      %200 = vector.shape_cast %199 : vector<1x4x9xf32> to vector<4x9xf32>
      %cst_176 = arith.constant dense<0.000000e+00> : vector<4x9xf32>
      %201 = tpu.matmul %198, %200, %cst_176 {dimension_numbers = #tpu.dot_dimension_numbers<[1], [0], [0], [1], [0, 0, 1, 1], [], []>} : vector<4x4xf32>, vector<4x9xf32>, vector<4x9xf32> -> vector<4x9xf32>
      %c1_177 = arith.constant 1 : index
      %c0_178 = arith.constant 0 : index
      %c0_179 = arith.constant 0 : index
      %202 = vector.load %arg16[%c1_177, %c0_178, %c0_179] : memref<3x4x9xf32, #tpu.memory_space<vmem>>, vector<1x4x9xf32>
      %203 = vector.shape_cast %202 : vector<1x4x9xf32> to vector<4x9xf32>
      %204 = arith.addf %201, %203 : vector<4x9xf32>
      %c1_180 = arith.constant 1 : index
      %c0_181 = arith.constant 0 : index
      %c0_182 = arith.constant 0 : index
      %205 = vector.load %arg9[%c1_180, %c0_181, %c0_182] : memref<3x16x4xf32, #tpu.memory_space<vmem>>, vector<1x16x4xf32>
      %206 = vector.shape_cast %205 : vector<1x16x4xf32> to vector<16x4xf32>
      %cst_183 = arith.constant dense<0.000000e+00> : vector<16x9xf32>
      %207 = tpu.matmul %206, %204, %cst_183 {dimension_numbers = #tpu.dot_dimension_numbers<[1], [0], [0], [1], [0, 0, 1, 1], [], []>} : vector<16x4xf32>, vector<4x9xf32>, vector<16x9xf32> -> vector<16x9xf32>
      %c1_184 = arith.constant 1 : index
      %c0_185 = arith.constant 0 : index
      %c0_186 = arith.constant 0 : index
      %208 = vector.load %arg10[%c1_184, %c0_185, %c0_186] : memref<3x16x1xf32, #tpu.memory_space<vmem>>, vector<1x16x1xf32>
      %209 = vector.shape_cast %208 : vector<1x16x1xf32> to vector<16x1xf32>
      %210 = vector.broadcast %209 : vector<16x1xf32> to vector<16x9xf32>
      %211 = arith.addf %207, %210 : vector<16x9xf32>
      %c1_187 = arith.constant 1 : index
      %c0_188 = arith.constant 0 : index
      %c0_189 = arith.constant 0 : index
      %212 = vector.load %arg13[%c1_187, %c0_188, %c0_189] : memref<3x16x9xf32, #tpu.memory_space<vmem>>, vector<1x16x9xf32>
      %213 = vector.shape_cast %212 : vector<1x16x9xf32> to vector<16x9xf32>
      %214 = vector.shape_cast %211 : vector<16x9xf32> to vector<1x16x9xf32>
      tpu.vector_store %arg13[%c1_187, %c0_188, %c0_189], %214 {strides = array<i32>} : memref<3x16x9xf32, #tpu.memory_space<vmem>>, vector<1x16x9xf32>,
      %c2_190 = arith.constant 2 : index
      %c0_191 = arith.constant 0 : index
      %c0_192 = arith.constant 0 : index
      %215 = vector.load %arg14[%c2_190, %c0_191, %c0_192] : memref<3x4x4xf32, #tpu.memory_space<vmem>>, vector<1x4x4xf32>
      %216 = vector.shape_cast %215 : vector<1x4x4xf32> to vector<4x4xf32>
      %cst_193 = arith.constant dense<0xFF800000> : vector<4xf32>
      %217 = vector.multi_reduction <maximumf>, %216, %cst_193 [1] : vector<4x4xf32> to vector<4xf32>
      %218 = vector.shape_cast %217 : vector<4xf32> to vector<4x1xf32>
      %219 = vector.broadcast %218 : vector<4x1xf32> to vector<4x4xf32>
      %220 = arith.subf %216, %219 : vector<4x4xf32>
      %221 = math.exp %220 : vector<4x4xf32>
      %cst_194 = arith.constant dense<0.000000e+00> : vector<4xf32>
      %222 = vector.multi_reduction <add>, %221, %cst_194 [1] : vector<4x4xf32> to vector<4xf32>
      %223 = vector.shape_cast %222 : vector<4xf32> to vector<4x1xf32>
      %224 = vector.broadcast %223 : vector<4x1xf32> to vector<4x4xf32>
      %225 = arith.divf %221, %224 : vector<4x4xf32>
      %c2_195 = arith.constant 2 : index
      %c0_196 = arith.constant 0 : index
      %c0_197 = arith.constant 0 : index
      %226 = vector.load %arg15[%c2_195, %c0_196, %c0_197] : memref<3x4x9xf32, #tpu.memory_space<vmem>>, vector<1x4x9xf32>
      %227 = vector.shape_cast %226 : vector<1x4x9xf32> to vector<4x9xf32>
      %cst_198 = arith.constant dense<0.000000e+00> : vector<4x9xf32>
      %228 = tpu.matmul %225, %227, %cst_198 {dimension_numbers = #tpu.dot_dimension_numbers<[1], [0], [0], [1], [0, 0, 1, 1], [], []>} : vector<4x4xf32>, vector<4x9xf32>, vector<4x9xf32> -> vector<4x9xf32>
      %c2_199 = arith.constant 2 : index
      %c0_200 = arith.constant 0 : index
      %c0_201 = arith.constant 0 : index
      %229 = vector.load %arg16[%c2_199, %c0_200, %c0_201] : memref<3x4x9xf32, #tpu.memory_space<vmem>>, vector<1x4x9xf32>
      %230 = vector.shape_cast %229 : vector<1x4x9xf32> to vector<4x9xf32>
      %231 = arith.addf %228, %230 : vector<4x9xf32>
      %c2_202 = arith.constant 2 : index
      %c0_203 = arith.constant 0 : index
      %c0_204 = arith.constant 0 : index
      %232 = vector.load %arg9[%c2_202, %c0_203, %c0_204] : memref<3x16x4xf32, #tpu.memory_space<vmem>>, vector<1x16x4xf32>
      %233 = vector.shape_cast %232 : vector<1x16x4xf32> to vector<16x4xf32>
      %cst_205 = arith.constant dense<0.000000e+00> : vector<16x9xf32>
      %234 = tpu.matmul %233, %231, %cst_205 {dimension_numbers = #tpu.dot_dimension_numbers<[1], [0], [0], [1], [0, 0, 1, 1], [], []>} : vector<16x4xf32>, vector<4x9xf32>, vector<16x9xf32> -> vector<16x9xf32>
      %c2_206 = arith.constant 2 : index
      %c0_207 = arith.constant 0 : index
      %c0_208 = arith.constant 0 : index
      %235 = vector.load %arg10[%c2_206, %c0_207, %c0_208] : memref<3x16x1xf32, #tpu.memory_space<vmem>>, vector<1x16x1xf32>
      %236 = vector.shape_cast %235 : vector<1x16x1xf32> to vector<16x1xf32>
      %237 = vector.broadcast %236 : vector<16x1xf32> to vector<16x9xf32>
      %238 = arith.addf %234, %237 : vector<16x9xf32>
      %c2_209 = arith.constant 2 : index
      %c0_210 = arith.constant 0 : index
      %c0_211 = arith.constant 0 : index
      %239 = vector.load %arg13[%c2_209, %c0_210, %c0_211] : memref<3x16x9xf32, #tpu.memory_space<vmem>>, vector<1x16x9xf32>
      %240 = vector.shape_cast %239 : vector<1x16x9xf32> to vector<16x9xf32>
      %241 = vector.shape_cast %238 : vector<16x9xf32> to vector<1x16x9xf32>
      tpu.vector_store %arg13[%c2_209, %c0_210, %c0_211], %241 {strides = array<i32>} : memref<3x16x9xf32, #tpu.memory_space<vmem>>, vector<1x16x9xf32>,
    } else {
    }
    return
  }
  func.func @transform_0(%arg0: i32) -> (i32, i32) {
    %c0_i32 = arith.constant 0 : i32
    %c0_i32_0 = arith.constant 0 : i32
    return %c0_i32, %arg0 : i32, i32
  }
  func.func @transform_1(%arg0: i32) -> (i32, i32) {
    %c0_i32 = arith.constant 0 : i32
    %c0_i32_0 = arith.constant 0 : i32
    return %c0_i32, %arg0 : i32, i32
  }
  func.func @transform_2(%arg0: i32) -> (i32, i32, i32) {
    %c0_i32 = arith.constant 0 : i32
    %c0_i32_0 = arith.constant 0 : i32
    %c0_i32_1 = arith.constant 0 : i32
    %c0_i32_2 = arith.constant 0 : i32
    return %c0_i32, %c0_i32_0, %c0_i32_1 : i32, i32, i32
  }
  func.func @transform_3(%arg0: i32) -> (i32, i32, i32) {
    %c0_i32 = arith.constant 0 : i32
    %c0_i32_0 = arith.constant 0 : i32
    %c0_i32_1 = arith.constant 0 : i32
    %c0_i32_2 = arith.constant 0 : i32
    return %c0_i32, %c0_i32_0, %c0_i32_1 : i32, i32, i32
  }
  func.func @transform_4(%arg0: i32) -> (i32, i32, i32) {
    %c0_i32 = arith.constant 0 : i32
    %c0_i32_0 = arith.constant 0 : i32
    %c0_i32_1 = arith.constant 0 : i32
    %c0_i32_2 = arith.constant 0 : i32
    return %c0_i32, %c0_i32_0, %c0_i32_1 : i32, i32, i32
  }
  func.func @transform_5(%arg0: i32) -> (i32, i32, i32) {
    %c0_i32 = arith.constant 0 : i32
    %c0_i32_0 = arith.constant 0 : i32
    %c0_i32_1 = arith.constant 0 : i32
    %c0_i32_2 = arith.constant 0 : i32
    return %c0_i32, %c0_i32_0, %c0_i32_1 : i32, i32, i32
  }
  func.func @transform_6(%arg0: i32) -> (i32, i32, i32) {
    %c0_i32 = arith.constant 0 : i32
    %c0_i32_0 = arith.constant 0 : i32
    %c0_i32_1 = arith.constant 0 : i32
    %c0_i32_2 = arith.constant 0 : i32
    return %c0_i32, %c0_i32_0, %c0_i32_1 : i32, i32, i32
  }
  func.func @transform_7(%arg0: i32) -> (i32, i32, i32) {
    %c0_i32 = arith.constant 0 : i32
    %c0_i32_0 = arith.constant 0 : i32
    %c0_i32_1 = arith.constant 0 : i32
    %c0_i32_2 = arith.constant 0 : i32
    return %c0_i32, %c0_i32_0, %c0_i32_1 : i32, i32, i32
  }
  func.func @transform_8(%arg0: i32) -> (i32, i32, i32) {
    %c0_i32 = arith.constant 0 : i32
    %c0_i32_0 = arith.constant 0 : i32
    %c0_i32_1 = arith.constant 0 : i32
    %c0_i32_2 = arith.constant 0 : i32
    return %c0_i32, %c0_i32_0, %c0_i32_1 : i32, i32, i32
  }
  func.func @transform_9(%arg0: i32) -> (i32, i32, i32) {
    %c0_i32 = arith.constant 0 : i32
    %c0_i32_0 = arith.constant 0 : i32
    %c0_i32_1 = arith.constant 0 : i32
    %c0_i32_2 = arith.constant 0 : i32
    return %c0_i32, %c0_i32_0, %c0_i32_1 : i32, i32, i32
  }
  func.func @transform_10(%arg0: i32) -> (i32, i32, i32) {
    %c0_i32 = arith.constant 0 : i32
    %c0_i32_0 = arith.constant 0 : i32
    %c0_i32_1 = arith.constant 0 : i32
    return %c0_i32, %arg0, %c0_i32_0 : i32, i32, i32
  }
  func.func @transform_11(%arg0: i32) -> (i32, i32, i32) {
    %c0_i32 = arith.constant 0 : i32
    %c0_i32_0 = arith.constant 0 : i32
    %c0_i32_1 = arith.constant 0 : i32
    return %c0_i32, %c0_i32_0, %arg0 : i32, i32, i32
  }
  func.func @transform_12(%arg0: i32) -> (i32, i32, i32) {
    %c0_i32 = arith.constant 0 : i32
    %c0_i32_0 = arith.constant 0 : i32
    %c0_i32_1 = arith.constant 0 : i32
    %c0_i32_2 = arith.constant 0 : i32
    return %c0_i32, %c0_i32_0, %c0_i32_1 : i32, i32, i32
  }
}

module attributes {stable_mosaic.version = 11 : i64} {
  func.func @_dynconv_alpha_kernel(%arg0: i32, %arg1: memref<3x36x128xbf16, #tpu.memory_space<vmem>>, %arg2: memref<3x4x36xbf16, #tpu.memory_space<vmem>>, %arg3: memref<3x4x1xf32, #tpu.memory_space<vmem>>, %arg4: memref<3x4x1xf32, #tpu.memory_space<vmem>>, %arg5: memref<3x1x1xf32, #tpu.memory_space<vmem>>, %arg6: memref<3x4x128xbf16, #tpu.memory_space<vmem>>, %arg7: memref<3x1x1xf32, #tpu.memory_space<vmem>>, %arg8: memref<3x4x1xf32, #tpu.memory_space<vmem>>) attributes {dimension_semantics = [#tpu.dimension_semantics<arbitrary>], iteration_bounds = array<i64: 2>, scalar_prefetch = 0 : i64, scratch_operands = 1 : i64, tpu.core_type = #tpu.core_type<tc>, window_params = [{transform_indices = @transform_0, window_bounds = array<i64: 3, 36, 128>}, {pipeline_mode = #tpu.pipeline_mode<synchronous>, transform_indices = @transform_1, window_bounds = array<i64: 3, 4, 36>}, {pipeline_mode = #tpu.pipeline_mode<synchronous>, transform_indices = @transform_2, window_bounds = array<i64: 3, 4, 1>}, {pipeline_mode = #tpu.pipeline_mode<synchronous>, transform_indices = @transform_3, window_bounds = array<i64: 3, 4, 1>}, {pipeline_mode = #tpu.pipeline_mode<synchronous>, transform_indices = @transform_4, window_bounds = array<i64: 3, 1, 1>}, {transform_indices = @transform_5, window_bounds = array<i64: 3, 4, 128>}, {pipeline_mode = #tpu.pipeline_mode<synchronous>, transform_indices = @transform_6, window_bounds = array<i64: 3, 1, 1>}]} {
    %c0_i32 = arith.constant 0 : i32
    %0 = arith.cmpi eq, %arg0, %c0_i32 : i32
    %1 = arith.extui %0 : i1 to i32
    %c0_i32_0 = arith.constant 0 : i32
    %2 = arith.cmpi ne, %1, %c0_i32_0 : i32
    scf.if %2 {
      %cst_58 = arith.constant 0.000000e+00 : f32
      %69 = vector.broadcast %cst_58 : f32 to vector<3x4x1xf32>
      %c0_59 = arith.constant 0 : index
      %c0_60 = arith.constant 0 : index
      %c0_61 = arith.constant 0 : index
      %70 = vector.load %arg8[%c0_59, %c0_60, %c0_61] : memref<3x4x1xf32, #tpu.memory_space<vmem>>, vector<3x4x1xf32>
      tpu.vector_store %arg8[%c0_59, %c0_60, %c0_61], %69 {strides = array<i32>} : memref<3x4x1xf32, #tpu.memory_space<vmem>>, vector<3x4x1xf32>,
    } else {
    }
    %c0 = arith.constant 0 : index
    %c0_1 = arith.constant 0 : index
    %c0_2 = arith.constant 0 : index
    %3 = vector.load %arg2[%c0, %c0_1, %c0_2] : memref<3x4x36xbf16, #tpu.memory_space<vmem>>, vector<1x4x36xbf16>
    %4 = vector.shape_cast %3 : vector<1x4x36xbf16> to vector<4x36xbf16>
    %c0_3 = arith.constant 0 : index
    %c0_4 = arith.constant 0 : index
    %c0_5 = arith.constant 0 : index
    %5 = vector.load %arg1[%c0_3, %c0_4, %c0_5] : memref<3x36x128xbf16, #tpu.memory_space<vmem>>, vector<1x36x128xbf16>
    %6 = vector.shape_cast %5 : vector<1x36x128xbf16> to vector<36x128xbf16>
    %cst = arith.constant dense<0.000000e+00> : vector<4x128xf32>
    %7 = tpu.matmul %4, %6, %cst {dimension_numbers = #tpu.dot_dimension_numbers<[1], [0], [0], [1], [0, 0, 1, 1], [], []>} : vector<4x36xbf16>, vector<36x128xbf16>, vector<4x128xf32> -> vector<4x128xf32>
    %c0_6 = arith.constant 0 : index
    %c0_7 = arith.constant 0 : index
    %c0_8 = arith.constant 0 : index
    %8 = vector.load %arg3[%c0_6, %c0_7, %c0_8] : memref<3x4x1xf32, #tpu.memory_space<vmem>>, vector<1x4x1xf32>
    %9 = vector.shape_cast %8 : vector<1x4x1xf32> to vector<4x1xf32>
    %10 = vector.broadcast %9 : vector<4x1xf32> to vector<4x128xf32>
    %11 = arith.addf %7, %10 : vector<4x128xf32>
    %12 = arith.truncf %11 : vector<4x128xf32> to vector<4x128xbf16>
    %c0_9 = arith.constant 0 : index
    %c0_10 = arith.constant 0 : index
    %c0_11 = arith.constant 0 : index
    %13 = vector.load %arg6[%c0_9, %c0_10, %c0_11] : memref<3x4x128xbf16, #tpu.memory_space<vmem>>, vector<1x4x128xbf16>
    %14 = vector.shape_cast %13 : vector<1x4x128xbf16> to vector<4x128xbf16>
    %15 = vector.shape_cast %12 : vector<4x128xbf16> to vector<1x4x128xbf16>
    tpu.vector_store %arg6[%c0_9, %c0_10, %c0_11], %15 {strides = array<i32>} : memref<3x4x128xbf16, #tpu.memory_space<vmem>>, vector<1x4x128xbf16>,
    %c0_12 = arith.constant 0 : index
    %c0_13 = arith.constant 0 : index
    %c0_14 = arith.constant 0 : index
    %16 = vector.load %arg8[%c0_12, %c0_13, %c0_14] : memref<3x4x1xf32, #tpu.memory_space<vmem>>, vector<1x4x1xf32>
    %17 = vector.shape_cast %16 : vector<1x4x1xf32> to vector<4x1xf32>
    %cst_15 = arith.constant dense<0.000000e+00> : vector<4xf32>
    %18 = vector.multi_reduction <add>, %11, %cst_15 [1] : vector<4x128xf32> to vector<4xf32>
    %19 = vector.shape_cast %18 : vector<4xf32> to vector<4x1xf32>
    %20 = arith.addf %17, %19 : vector<4x1xf32>
    %c0_16 = arith.constant 0 : index
    %c0_17 = arith.constant 0 : index
    %c0_18 = arith.constant 0 : index
    %21 = vector.load %arg8[%c0_16, %c0_17, %c0_18] : memref<3x4x1xf32, #tpu.memory_space<vmem>>, vector<1x4x1xf32>
    %22 = vector.shape_cast %21 : vector<1x4x1xf32> to vector<4x1xf32>
    %23 = vector.shape_cast %20 : vector<4x1xf32> to vector<1x4x1xf32>
    tpu.vector_store %arg8[%c0_16, %c0_17, %c0_18], %23 {strides = array<i32>} : memref<3x4x1xf32, #tpu.memory_space<vmem>>, vector<1x4x1xf32>,
    %c1 = arith.constant 1 : index
    %c0_19 = arith.constant 0 : index
    %c0_20 = arith.constant 0 : index
    %24 = vector.load %arg2[%c1, %c0_19, %c0_20] : memref<3x4x36xbf16, #tpu.memory_space<vmem>>, vector<1x4x36xbf16>
    %25 = vector.shape_cast %24 : vector<1x4x36xbf16> to vector<4x36xbf16>
    %c1_21 = arith.constant 1 : index
    %c0_22 = arith.constant 0 : index
    %c0_23 = arith.constant 0 : index
    %26 = vector.load %arg1[%c1_21, %c0_22, %c0_23] : memref<3x36x128xbf16, #tpu.memory_space<vmem>>, vector<1x36x128xbf16>
    %27 = vector.shape_cast %26 : vector<1x36x128xbf16> to vector<36x128xbf16>
    %cst_24 = arith.constant dense<0.000000e+00> : vector<4x128xf32>
    %28 = tpu.matmul %25, %27, %cst_24 {dimension_numbers = #tpu.dot_dimension_numbers<[1], [0], [0], [1], [0, 0, 1, 1], [], []>} : vector<4x36xbf16>, vector<36x128xbf16>, vector<4x128xf32> -> vector<4x128xf32>
    %c1_25 = arith.constant 1 : index
    %c0_26 = arith.constant 0 : index
    %c0_27 = arith.constant 0 : index
    %29 = vector.load %arg3[%c1_25, %c0_26, %c0_27] : memref<3x4x1xf32, #tpu.memory_space<vmem>>, vector<1x4x1xf32>
    %30 = vector.shape_cast %29 : vector<1x4x1xf32> to vector<4x1xf32>
    %31 = vector.broadcast %30 : vector<4x1xf32> to vector<4x128xf32>
    %32 = arith.addf %28, %31 : vector<4x128xf32>
    %33 = arith.truncf %32 : vector<4x128xf32> to vector<4x128xbf16>
    %c1_28 = arith.constant 1 : index
    %c0_29 = arith.constant 0 : index
    %c0_30 = arith.constant 0 : index
    %34 = vector.load %arg6[%c1_28, %c0_29, %c0_30] : memref<3x4x128xbf16, #tpu.memory_space<vmem>>, vector<1x4x128xbf16>
    %35 = vector.shape_cast %34 : vector<1x4x128xbf16> to vector<4x128xbf16>
    %36 = vector.shape_cast %33 : vector<4x128xbf16> to vector<1x4x128xbf16>
    tpu.vector_store %arg6[%c1_28, %c0_29, %c0_30], %36 {strides = array<i32>} : memref<3x4x128xbf16, #tpu.memory_space<vmem>>, vector<1x4x128xbf16>,
    %c1_31 = arith.constant 1 : index
    %c0_32 = arith.constant 0 : index
    %c0_33 = arith.constant 0 : index
    %37 = vector.load %arg8[%c1_31, %c0_32, %c0_33] : memref<3x4x1xf32, #tpu.memory_space<vmem>>, vector<1x4x1xf32>
    %38 = vector.shape_cast %37 : vector<1x4x1xf32> to vector<4x1xf32>
    %cst_34 = arith.constant dense<0.000000e+00> : vector<4xf32>
    %39 = vector.multi_reduction <add>, %32, %cst_34 [1] : vector<4x128xf32> to vector<4xf32>
    %40 = vector.shape_cast %39 : vector<4xf32> to vector<4x1xf32>
    %41 = arith.addf %38, %40 : vector<4x1xf32>
    %c1_35 = arith.constant 1 : index
    %c0_36 = arith.constant 0 : index
    %c0_37 = arith.constant 0 : index
    %42 = vector.load %arg8[%c1_35, %c0_36, %c0_37] : memref<3x4x1xf32, #tpu.memory_space<vmem>>, vector<1x4x1xf32>
    %43 = vector.shape_cast %42 : vector<1x4x1xf32> to vector<4x1xf32>
    %44 = vector.shape_cast %41 : vector<4x1xf32> to vector<1x4x1xf32>
    tpu.vector_store %arg8[%c1_35, %c0_36, %c0_37], %44 {strides = array<i32>} : memref<3x4x1xf32, #tpu.memory_space<vmem>>, vector<1x4x1xf32>,
    %c2 = arith.constant 2 : index
    %c0_38 = arith.constant 0 : index
    %c0_39 = arith.constant 0 : index
    %45 = vector.load %arg2[%c2, %c0_38, %c0_39] : memref<3x4x36xbf16, #tpu.memory_space<vmem>>, vector<1x4x36xbf16>
    %46 = vector.shape_cast %45 : vector<1x4x36xbf16> to vector<4x36xbf16>
    %c2_40 = arith.constant 2 : index
    %c0_41 = arith.constant 0 : index
    %c0_42 = arith.constant 0 : index
    %47 = vector.load %arg1[%c2_40, %c0_41, %c0_42] : memref<3x36x128xbf16, #tpu.memory_space<vmem>>, vector<1x36x128xbf16>
    %48 = vector.shape_cast %47 : vector<1x36x128xbf16> to vector<36x128xbf16>
    %cst_43 = arith.constant dense<0.000000e+00> : vector<4x128xf32>
    %49 = tpu.matmul %46, %48, %cst_43 {dimension_numbers = #tpu.dot_dimension_numbers<[1], [0], [0], [1], [0, 0, 1, 1], [], []>} : vector<4x36xbf16>, vector<36x128xbf16>, vector<4x128xf32> -> vector<4x128xf32>
    %c2_44 = arith.constant 2 : index
    %c0_45 = arith.constant 0 : index
    %c0_46 = arith.constant 0 : index
    %50 = vector.load %arg3[%c2_44, %c0_45, %c0_46] : memref<3x4x1xf32, #tpu.memory_space<vmem>>, vector<1x4x1xf32>
    %51 = vector.shape_cast %50 : vector<1x4x1xf32> to vector<4x1xf32>
    %52 = vector.broadcast %51 : vector<4x1xf32> to vector<4x128xf32>
    %53 = arith.addf %49, %52 : vector<4x128xf32>
    %54 = arith.truncf %53 : vector<4x128xf32> to vector<4x128xbf16>
    %c2_47 = arith.constant 2 : index
    %c0_48 = arith.constant 0 : index
    %c0_49 = arith.constant 0 : index
    %55 = vector.load %arg6[%c2_47, %c0_48, %c0_49] : memref<3x4x128xbf16, #tpu.memory_space<vmem>>, vector<1x4x128xbf16>
    %56 = vector.shape_cast %55 : vector<1x4x128xbf16> to vector<4x128xbf16>
    %57 = vector.shape_cast %54 : vector<4x128xbf16> to vector<1x4x128xbf16>
    tpu.vector_store %arg6[%c2_47, %c0_48, %c0_49], %57 {strides = array<i32>} : memref<3x4x128xbf16, #tpu.memory_space<vmem>>, vector<1x4x128xbf16>,
    %c2_50 = arith.constant 2 : index
    %c0_51 = arith.constant 0 : index
    %c0_52 = arith.constant 0 : index
    %58 = vector.load %arg8[%c2_50, %c0_51, %c0_52] : memref<3x4x1xf32, #tpu.memory_space<vmem>>, vector<1x4x1xf32>
    %59 = vector.shape_cast %58 : vector<1x4x1xf32> to vector<4x1xf32>
    %cst_53 = arith.constant dense<0.000000e+00> : vector<4xf32>
    %60 = vector.multi_reduction <add>, %53, %cst_53 [1] : vector<4x128xf32> to vector<4xf32>
    %61 = vector.shape_cast %60 : vector<4xf32> to vector<4x1xf32>
    %62 = arith.addf %59, %61 : vector<4x1xf32>
    %c2_54 = arith.constant 2 : index
    %c0_55 = arith.constant 0 : index
    %c0_56 = arith.constant 0 : index
    %63 = vector.load %arg8[%c2_54, %c0_55, %c0_56] : memref<3x4x1xf32, #tpu.memory_space<vmem>>, vector<1x4x1xf32>
    %64 = vector.shape_cast %63 : vector<1x4x1xf32> to vector<4x1xf32>
    %65 = vector.shape_cast %62 : vector<4x1xf32> to vector<1x4x1xf32>
    tpu.vector_store %arg8[%c2_54, %c0_55, %c0_56], %65 {strides = array<i32>} : memref<3x4x1xf32, #tpu.memory_space<vmem>>, vector<1x4x1xf32>,
    %c1_i32 = arith.constant 1 : i32
    %66 = arith.cmpi eq, %arg0, %c1_i32 : i32
    %67 = arith.extui %66 : i1 to i32
    %c0_i32_57 = arith.constant 0 : i32
    %68 = arith.cmpi ne, %67, %c0_i32_57 : i32
    scf.if %68 {
      %c0_58 = arith.constant 0 : index
      %c0_59 = arith.constant 0 : index
      %c0_60 = arith.constant 0 : index
      %69 = vector.load %arg4[%c0_58, %c0_59, %c0_60] : memref<3x4x1xf32, #tpu.memory_space<vmem>>, vector<1x4x1xf32>
      %70 = vector.shape_cast %69 : vector<1x4x1xf32> to vector<4x1xf32>
      %c0_61 = arith.constant 0 : index
      %c0_62 = arith.constant 0 : index
      %c0_63 = arith.constant 0 : index
      %71 = vector.load %arg8[%c0_61, %c0_62, %c0_63] : memref<3x4x1xf32, #tpu.memory_space<vmem>>, vector<1x4x1xf32>
      %72 = vector.shape_cast %71 : vector<1x4x1xf32> to vector<4x1xf32>
      %73 = arith.mulf %70, %72 : vector<4x1xf32>
      %cst_64 = arith.constant dense<0.000000e+00> : vector<1xf32>
      %74 = vector.multi_reduction <add>, %73, %cst_64 [0] : vector<4x1xf32> to vector<1xf32>
      %75 = vector.shape_cast %74 : vector<1xf32> to vector<1x1xf32>
      %cst_65 = arith.constant 3.906250e-03 : f32
      %76 = vector.broadcast %cst_65 : f32 to vector<1x1xf32>
      %77 = arith.mulf %75, %76 : vector<1x1xf32>
      %c0_66 = arith.constant 0 : index
      %c0_67 = arith.constant 0 : index
      %c0_68 = arith.constant 0 : index
      %78 = vector.load %arg5[%c0_66, %c0_67, %c0_68] : memref<3x1x1xf32, #tpu.memory_space<vmem>>, vector<1x1x1xf32>
      %79 = vector.shape_cast %78 : vector<1x1x1xf32> to vector<1x1xf32>
      %80 = arith.addf %77, %79 : vector<1x1xf32>
      %c1_69 = arith.constant 1 : index
      %c0_70 = arith.constant 0 : index
      %c0_71 = arith.constant 0 : index
      %81 = vector.load %arg4[%c1_69, %c0_70, %c0_71] : memref<3x4x1xf32, #tpu.memory_space<vmem>>, vector<1x4x1xf32>
      %82 = vector.shape_cast %81 : vector<1x4x1xf32> to vector<4x1xf32>
      %c1_72 = arith.constant 1 : index
      %c0_73 = arith.constant 0 : index
      %c0_74 = arith.constant 0 : index
      %83 = vector.load %arg8[%c1_72, %c0_73, %c0_74] : memref<3x4x1xf32, #tpu.memory_space<vmem>>, vector<1x4x1xf32>
      %84 = vector.shape_cast %83 : vector<1x4x1xf32> to vector<4x1xf32>
      %85 = arith.mulf %82, %84 : vector<4x1xf32>
      %cst_75 = arith.constant dense<0.000000e+00> : vector<1xf32>
      %86 = vector.multi_reduction <add>, %85, %cst_75 [0] : vector<4x1xf32> to vector<1xf32>
      %87 = vector.shape_cast %86 : vector<1xf32> to vector<1x1xf32>
      %cst_76 = arith.constant 3.906250e-03 : f32
      %88 = vector.broadcast %cst_76 : f32 to vector<1x1xf32>
      %89 = arith.mulf %87, %88 : vector<1x1xf32>
      %c1_77 = arith.constant 1 : index
      %c0_78 = arith.constant 0 : index
      %c0_79 = arith.constant 0 : index
      %90 = vector.load %arg5[%c1_77, %c0_78, %c0_79] : memref<3x1x1xf32, #tpu.memory_space<vmem>>, vector<1x1x1xf32>
      %91 = vector.shape_cast %90 : vector<1x1x1xf32> to vector<1x1xf32>
      %92 = arith.addf %89, %91 : vector<1x1xf32>
      %c2_80 = arith.constant 2 : index
      %c0_81 = arith.constant 0 : index
      %c0_82 = arith.constant 0 : index
      %93 = vector.load %arg4[%c2_80, %c0_81, %c0_82] : memref<3x4x1xf32, #tpu.memory_space<vmem>>, vector<1x4x1xf32>
      %94 = vector.shape_cast %93 : vector<1x4x1xf32> to vector<4x1xf32>
      %c2_83 = arith.constant 2 : index
      %c0_84 = arith.constant 0 : index
      %c0_85 = arith.constant 0 : index
      %95 = vector.load %arg8[%c2_83, %c0_84, %c0_85] : memref<3x4x1xf32, #tpu.memory_space<vmem>>, vector<1x4x1xf32>
      %96 = vector.shape_cast %95 : vector<1x4x1xf32> to vector<4x1xf32>
      %97 = arith.mulf %94, %96 : vector<4x1xf32>
      %cst_86 = arith.constant dense<0.000000e+00> : vector<1xf32>
      %98 = vector.multi_reduction <add>, %97, %cst_86 [0] : vector<4x1xf32> to vector<1xf32>
      %99 = vector.shape_cast %98 : vector<1xf32> to vector<1x1xf32>
      %cst_87 = arith.constant 3.906250e-03 : f32
      %100 = vector.broadcast %cst_87 : f32 to vector<1x1xf32>
      %101 = arith.mulf %99, %100 : vector<1x1xf32>
      %c2_88 = arith.constant 2 : index
      %c0_89 = arith.constant 0 : index
      %c0_90 = arith.constant 0 : index
      %102 = vector.load %arg5[%c2_88, %c0_89, %c0_90] : memref<3x1x1xf32, #tpu.memory_space<vmem>>, vector<1x1x1xf32>
      %103 = vector.shape_cast %102 : vector<1x1x1xf32> to vector<1x1xf32>
      %104 = arith.addf %101, %103 : vector<1x1xf32>
      %105 = arith.maximumf %80, %92 : vector<1x1xf32>
      %106 = arith.maximumf %105, %104 : vector<1x1xf32>
      %107 = arith.subf %80, %106 : vector<1x1xf32>
      %108 = math.exp %107 : vector<1x1xf32>
      %109 = arith.subf %92, %106 : vector<1x1xf32>
      %110 = math.exp %109 : vector<1x1xf32>
      %111 = arith.subf %104, %106 : vector<1x1xf32>
      %112 = math.exp %111 : vector<1x1xf32>
      %113 = arith.addf %108, %110 : vector<1x1xf32>
      %114 = arith.addf %113, %112 : vector<1x1xf32>
      %115 = arith.divf %108, %114 : vector<1x1xf32>
      %c0_91 = arith.constant 0 : index
      %c0_92 = arith.constant 0 : index
      %c0_93 = arith.constant 0 : index
      %116 = vector.load %arg7[%c0_91, %c0_92, %c0_93] : memref<3x1x1xf32, #tpu.memory_space<vmem>>, vector<1x1x1xf32>
      %117 = vector.shape_cast %116 : vector<1x1x1xf32> to vector<1x1xf32>
      %118 = vector.shape_cast %115 : vector<1x1xf32> to vector<1x1x1xf32>
      tpu.vector_store %arg7[%c0_91, %c0_92, %c0_93], %118 {strides = array<i32>} : memref<3x1x1xf32, #tpu.memory_space<vmem>>, vector<1x1x1xf32>,
      %119 = arith.divf %110, %114 : vector<1x1xf32>
      %c1_94 = arith.constant 1 : index
      %c0_95 = arith.constant 0 : index
      %c0_96 = arith.constant 0 : index
      %120 = vector.load %arg7[%c1_94, %c0_95, %c0_96] : memref<3x1x1xf32, #tpu.memory_space<vmem>>, vector<1x1x1xf32>
      %121 = vector.shape_cast %120 : vector<1x1x1xf32> to vector<1x1xf32>
      %122 = vector.shape_cast %119 : vector<1x1xf32> to vector<1x1x1xf32>
      tpu.vector_store %arg7[%c1_94, %c0_95, %c0_96], %122 {strides = array<i32>} : memref<3x1x1xf32, #tpu.memory_space<vmem>>, vector<1x1x1xf32>,
      %123 = arith.divf %112, %114 : vector<1x1xf32>
      %c2_97 = arith.constant 2 : index
      %c0_98 = arith.constant 0 : index
      %c0_99 = arith.constant 0 : index
      %124 = vector.load %arg7[%c2_97, %c0_98, %c0_99] : memref<3x1x1xf32, #tpu.memory_space<vmem>>, vector<1x1x1xf32>
      %125 = vector.shape_cast %124 : vector<1x1x1xf32> to vector<1x1xf32>
      %126 = vector.shape_cast %123 : vector<1x1xf32> to vector<1x1x1xf32>
      tpu.vector_store %arg7[%c2_97, %c0_98, %c0_99], %126 {strides = array<i32>} : memref<3x1x1xf32, #tpu.memory_space<vmem>>, vector<1x1x1xf32>,
    } else {
    }
    return
  }
  func.func @transform_0(%arg0: i32) -> (i32, i32, i32) {
    %c0_i32 = arith.constant 0 : i32
    %c0_i32_0 = arith.constant 0 : i32
    %c0_i32_1 = arith.constant 0 : i32
    return %c0_i32, %c0_i32_0, %arg0 : i32, i32, i32
  }
  func.func @transform_1(%arg0: i32) -> (i32, i32, i32) {
    %c0_i32 = arith.constant 0 : i32
    %c0_i32_0 = arith.constant 0 : i32
    %c0_i32_1 = arith.constant 0 : i32
    %c0_i32_2 = arith.constant 0 : i32
    return %c0_i32, %c0_i32_0, %c0_i32_1 : i32, i32, i32
  }
  func.func @transform_2(%arg0: i32) -> (i32, i32, i32) {
    %c0_i32 = arith.constant 0 : i32
    %c0_i32_0 = arith.constant 0 : i32
    %c0_i32_1 = arith.constant 0 : i32
    %c0_i32_2 = arith.constant 0 : i32
    return %c0_i32, %c0_i32_0, %c0_i32_1 : i32, i32, i32
  }
  func.func @transform_3(%arg0: i32) -> (i32, i32, i32) {
    %c0_i32 = arith.constant 0 : i32
    %c0_i32_0 = arith.constant 0 : i32
    %c0_i32_1 = arith.constant 0 : i32
    %c0_i32_2 = arith.constant 0 : i32
    return %c0_i32, %c0_i32_0, %c0_i32_1 : i32, i32, i32
  }
  func.func @transform_4(%arg0: i32) -> (i32, i32, i32) {
    %c0_i32 = arith.constant 0 : i32
    %c0_i32_0 = arith.constant 0 : i32
    %c0_i32_1 = arith.constant 0 : i32
    %c0_i32_2 = arith.constant 0 : i32
    return %c0_i32, %c0_i32_0, %c0_i32_1 : i32, i32, i32
  }
  func.func @transform_5(%arg0: i32) -> (i32, i32, i32) {
    %c0_i32 = arith.constant 0 : i32
    %c0_i32_0 = arith.constant 0 : i32
    %c0_i32_1 = arith.constant 0 : i32
    return %c0_i32, %c0_i32_0, %arg0 : i32, i32, i32
  }
  func.func @transform_6(%arg0: i32) -> (i32, i32, i32) {
    %c0_i32 = arith.constant 0 : i32
    %c0_i32_0 = arith.constant 0 : i32
    %c0_i32_1 = arith.constant 0 : i32
    %c0_i32_2 = arith.constant 0 : i32
    return %c0_i32, %c0_i32_0, %c0_i32_1 : i32, i32, i32
  }
}

module attributes {stable_mosaic.version = 11 : i64} {
  func.func @_alpha_mix_kernel(%arg0: i32, %arg1: memref<3x1x1xf32, #tpu.memory_space<vmem>>, %arg2: memref<3x4x128xbf16, #tpu.memory_space<vmem>>, %arg3: memref<4x128xbf16, #tpu.memory_space<vmem>>) attributes {dimension_semantics = [#tpu.dimension_semantics<parallel>], iteration_bounds = array<i64: 2>, scalar_prefetch = 0 : i64, scratch_operands = 0 : i64, tpu.core_type = #tpu.core_type<tc>, window_params = [{pipeline_mode = #tpu.pipeline_mode<synchronous>, transform_indices = @transform_0, window_bounds = array<i64: 3, 1, 1>}, {transform_indices = @transform_1, window_bounds = array<i64: 3, 4, 128>}, {transform_indices = @transform_2, window_bounds = array<i64: 4, 128>}]} {
    %c0 = arith.constant 0 : index
    %c0_0 = arith.constant 0 : index
    %c0_1 = arith.constant 0 : index
    %0 = vector.load %arg1[%c0, %c0_0, %c0_1] : memref<3x1x1xf32, #tpu.memory_space<vmem>>, vector<1x1x1xf32>
    %1 = vector.shape_cast %0 : vector<1x1x1xf32> to vector<1x1xf32>
    %c0_2 = arith.constant 0 : index
    %c0_3 = arith.constant 0 : index
    %c0_4 = arith.constant 0 : index
    %2 = vector.load %arg2[%c0_2, %c0_3, %c0_4] : memref<3x4x128xbf16, #tpu.memory_space<vmem>>, vector<1x4x128xbf16>
    %3 = vector.shape_cast %2 : vector<1x4x128xbf16> to vector<4x128xbf16>
    %4 = arith.extf %3 : vector<4x128xbf16> to vector<4x128xf32>
    %5 = vector.broadcast %1 : vector<1x1xf32> to vector<4x128xf32>
    %6 = arith.mulf %5, %4 : vector<4x128xf32>
    %c1 = arith.constant 1 : index
    %c0_5 = arith.constant 0 : index
    %c0_6 = arith.constant 0 : index
    %7 = vector.load %arg1[%c1, %c0_5, %c0_6] : memref<3x1x1xf32, #tpu.memory_space<vmem>>, vector<1x1x1xf32>
    %8 = vector.shape_cast %7 : vector<1x1x1xf32> to vector<1x1xf32>
    %c1_7 = arith.constant 1 : index
    %c0_8 = arith.constant 0 : index
    %c0_9 = arith.constant 0 : index
    %9 = vector.load %arg2[%c1_7, %c0_8, %c0_9] : memref<3x4x128xbf16, #tpu.memory_space<vmem>>, vector<1x4x128xbf16>
    %10 = vector.shape_cast %9 : vector<1x4x128xbf16> to vector<4x128xbf16>
    %11 = arith.extf %10 : vector<4x128xbf16> to vector<4x128xf32>
    %12 = vector.broadcast %8 : vector<1x1xf32> to vector<4x128xf32>
    %13 = arith.mulf %12, %11 : vector<4x128xf32>
    %14 = arith.addf %6, %13 : vector<4x128xf32>
    %c2 = arith.constant 2 : index
    %c0_10 = arith.constant 0 : index
    %c0_11 = arith.constant 0 : index
    %15 = vector.load %arg1[%c2, %c0_10, %c0_11] : memref<3x1x1xf32, #tpu.memory_space<vmem>>, vector<1x1x1xf32>
    %16 = vector.shape_cast %15 : vector<1x1x1xf32> to vector<1x1xf32>
    %c2_12 = arith.constant 2 : index
    %c0_13 = arith.constant 0 : index
    %c0_14 = arith.constant 0 : index
    %17 = vector.load %arg2[%c2_12, %c0_13, %c0_14] : memref<3x4x128xbf16, #tpu.memory_space<vmem>>, vector<1x4x128xbf16>
    %18 = vector.shape_cast %17 : vector<1x4x128xbf16> to vector<4x128xbf16>
    %19 = arith.extf %18 : vector<4x128xbf16> to vector<4x128xf32>
    %20 = vector.broadcast %16 : vector<1x1xf32> to vector<4x128xf32>
    %21 = arith.mulf %20, %19 : vector<4x128xf32>
    %22 = arith.addf %14, %21 : vector<4x128xf32>
    %23 = arith.truncf %22 : vector<4x128xf32> to vector<4x128xbf16>
    %c0_15 = arith.constant 0 : index
    %c0_16 = arith.constant 0 : index
    %24 = vector.load %arg3[%c0_15, %c0_16] : memref<4x128xbf16, #tpu.memory_space<vmem>>, vector<4x128xbf16>
    tpu.vector_store %arg3[%c0_15, %c0_16], %23 {strides = array<i32>} : memref<4x128xbf16, #tpu.memory_space<vmem>>, vector<4x128xbf16>,
    return
  }
  func.func @transform_0(%arg0: i32) -> (i32, i32, i32) {
    %c0_i32 = arith.constant 0 : i32
    %c0_i32_0 = arith.constant 0 : i32
    %c0_i32_1 = arith.constant 0 : i32
    %c0_i32_2 = arith.constant 0 : i32
    return %c0_i32, %c0_i32_0, %c0_i32_1 : i32, i32, i32
  }
  func.func @transform_1(%arg0: i32) -> (i32, i32, i32) {
    %c0_i32 = arith.constant 0 : i32
    %c0_i32_0 = arith.constant 0 : i32
    %c0_i32_1 = arith.constant 0 : i32
    return %c0_i32, %c0_i32_0, %arg0 : i32, i32, i32
  }
  func.func @transform_2(%arg0: i32) -> (i32, i32) {
    %c0_i32 = arith.constant 0 : i32
    %c0_i32_0 = arith.constant 0 : i32
    return %c0_i32, %arg0 : i32, i32
  }
}

module attributes {stable_mosaic.version = 11 : i64} {
  func.func @_fire_kernel(%arg0: i32, %arg1: memref<36x128xbf16, #tpu.memory_space<vmem>>, %arg2: memref<8x36xbf16, #tpu.memory_space<vmem>>, %arg3: memref<8x1xf32, #tpu.memory_space<vmem>>, %arg4: memref<8x1xf32, #tpu.memory_space<vmem>>, %arg5: memref<8x1xf32, #tpu.memory_space<vmem>>, %arg6: memref<8x128xf32, #tpu.memory_space<vmem>>) attributes {dimension_semantics = [#tpu.dimension_semantics<parallel>], iteration_bounds = array<i64: 2>, scalar_prefetch = 0 : i64, scratch_operands = 0 : i64, tpu.core_type = #tpu.core_type<tc>, window_params = [{transform_indices = @transform_0, window_bounds = array<i64: 36, 128>}, {pipeline_mode = #tpu.pipeline_mode<synchronous>, transform_indices = @transform_1, window_bounds = array<i64: 8, 36>}, {pipeline_mode = #tpu.pipeline_mode<synchronous>, transform_indices = @transform_2, window_bounds = array<i64: 8, 1>}, {pipeline_mode = #tpu.pipeline_mode<synchronous>, transform_indices = @transform_3, window_bounds = array<i64: 8, 1>}, {pipeline_mode = #tpu.pipeline_mode<synchronous>, transform_indices = @transform_4, window_bounds = array<i64: 8, 1>}, {transform_indices = @transform_5, window_bounds = array<i64: 8, 128>}]} {
    %c0 = arith.constant 0 : index
    %c0_0 = arith.constant 0 : index
    %0 = vector.load %arg2[%c0, %c0_0] : memref<8x36xbf16, #tpu.memory_space<vmem>>, vector<8x36xbf16>
    %c0_1 = arith.constant 0 : index
    %c0_2 = arith.constant 0 : index
    %1 = vector.load %arg1[%c0_1, %c0_2] : memref<36x128xbf16, #tpu.memory_space<vmem>>, vector<36x128xbf16>
    %cst = arith.constant dense<0.000000e+00> : vector<8x128xf32>
    %2 = tpu.matmul %0, %1, %cst {dimension_numbers = #tpu.dot_dimension_numbers<[1], [0], [0], [1], [0, 0, 1, 1], [], []>} : vector<8x36xbf16>, vector<36x128xbf16>, vector<8x128xf32> -> vector<8x128xf32>
    %c0_3 = arith.constant 0 : index
    %c0_4 = arith.constant 0 : index
    %3 = vector.load %arg3[%c0_3, %c0_4] : memref<8x1xf32, #tpu.memory_space<vmem>>, vector<8x1xf32>
    %4 = vector.broadcast %3 : vector<8x1xf32> to vector<8x128xf32>
    %5 = arith.addf %2, %4 : vector<8x128xf32>
    %c0_5 = arith.constant 0 : index
    %c0_6 = arith.constant 0 : index
    %6 = vector.load %arg4[%c0_5, %c0_6] : memref<8x1xf32, #tpu.memory_space<vmem>>, vector<8x1xf32>
    %7 = vector.broadcast %6 : vector<8x1xf32> to vector<8x128xf32>
    %8 = arith.mulf %5, %7 : vector<8x128xf32>
    %c0_7 = arith.constant 0 : index
    %c0_8 = arith.constant 0 : index
    %9 = vector.load %arg5[%c0_7, %c0_8] : memref<8x1xf32, #tpu.memory_space<vmem>>, vector<8x1xf32>
    %10 = vector.broadcast %9 : vector<8x1xf32> to vector<8x128xf32>
    %11 = arith.addf %8, %10 : vector<8x128xf32>
    %cst_9 = arith.constant 0.000000e+00 : f32
    %12 = vector.broadcast %cst_9 : f32 to vector<8x128xf32>
    %13 = arith.maximumf %11, %12 : vector<8x128xf32>
    %c0_10 = arith.constant 0 : index
    %c0_11 = arith.constant 0 : index
    %14 = vector.load %arg6[%c0_10, %c0_11] : memref<8x128xf32, #tpu.memory_space<vmem>>, vector<8x128xf32>
    tpu.vector_store %arg6[%c0_10, %c0_11], %13 {strides = array<i32>} : memref<8x128xf32, #tpu.memory_space<vmem>>, vector<8x128xf32>,
    return
  }
  func.func @transform_0(%arg0: i32) -> (i32, i32) {
    %c0_i32 = arith.constant 0 : i32
    %c0_i32_0 = arith.constant 0 : i32
    return %c0_i32, %arg0 : i32, i32
  }
  func.func @transform_1(%arg0: i32) -> (i32, i32) {
    %c0_i32 = arith.constant 0 : i32
    %c0_i32_0 = arith.constant 0 : i32
    %c0_i32_1 = arith.constant 0 : i32
    return %c0_i32, %c0_i32_0 : i32, i32
  }
  func.func @transform_2(%arg0: i32) -> (i32, i32) {
    %c0_i32 = arith.constant 0 : i32
    %c0_i32_0 = arith.constant 0 : i32
    %c0_i32_1 = arith.constant 0 : i32
    return %c0_i32, %c0_i32_0 : i32, i32
  }
  func.func @transform_3(%arg0: i32) -> (i32, i32) {
    %c0_i32 = arith.constant 0 : i32
    %c0_i32_0 = arith.constant 0 : i32
    %c0_i32_1 = arith.constant 0 : i32
    return %c0_i32, %c0_i32_0 : i32, i32
  }
  func.func @transform_4(%arg0: i32) -> (i32, i32) {
    %c0_i32 = arith.constant 0 : i32
    %c0_i32_0 = arith.constant 0 : i32
    %c0_i32_1 = arith.constant 0 : i32
    return %c0_i32, %c0_i32_0 : i32, i32
  }
  func.func @transform_5(%arg0: i32) -> (i32, i32) {
    %c0_i32 = arith.constant 0 : i32
    %c0_i32_0 = arith.constant 0 : i32
    return %c0_i32, %arg0 : i32, i32
  }
}

</mosaic_0001>

<bundles_post_ra>
// kernel: squeeze.11
= control target key start
LH: loop header
LB: loop body
LE: loop exit
PB: predicated region body
PF: predicated region fallthrough
CT: control target
= control target key end

     0   :  { %vm34_vm0 = vcmask 130048   ;;  %s201_s8 = smov 80   ;;  %s202_s9 = smov 96   ;;  %s250_s0 = inlined_call_operand.vmem [shape: bf16[1,4,256], index: 0, kind: input, shape index: {}]   ;;  %s251_s1 = inlined_call_operand.vmem [shape: bf16[4,16,16], index: 1, kind: output, shape index: {}]  }
   0x1   :  { %v162_v0 = vld [vmem:[%s250_s0] sm:$0xf]   ;;  %s200_s0 = smov 112   ;;  %s203_s10 = smov 64  }
   0x2   :  { %v16_v1 = vunpack.c.l.bf16 %v162_v0  ;;  %s204_s11 = smov 48   ;;  %s205_s12 = smov 32  }
   0x3   :  { %s206_s13 = smov 16  }
   0x4   :  { %19 = vst [vmem:[#allocation1] ss:$8 sps:$4 sm:$0xff] %v16_v1  }
   0xb   :  { %v44_v2 = vld.sshfl [vmem:[#allocation1] sm:$0xff pattern:$0xb3a29180]  }
   0xc   :  { %v33_v3 = vld [vmem:[#allocation1] sm:$0xf]   ;;  %45 = vrot.lane.b32.xlu0 %v44_v2, %s200_s0  ;;  %61 = vrot.lane.b32.xlu1 %v44_v2, %s201_s8  ;;  %v38_v4 = vld [vmem:[#allocation1 + $0x8] sm:$0xf]  }
   0xd   :  { %35 = vst.msk [vmem:[#allocation0] ss:$16 sm:$0x3] %vm34_vm0, %v33_v3   ;;  %36 = vst.msk [vmem:[#allocation0] ss:$16 sm:$0xc] %vm34_vm0, %v33_v3  }
   0xe   :  { %41 = vst.msk [vmem:[#allocation0 + $0x8] ss:$16 sm:$0x3] %vm34_vm0, %v38_v4   ;;  %43 = vst.msk [vmem:[#allocation0 + $0x8] ss:$16 sm:$0xc] %vm34_vm0, %v38_v4  }
  0x10   :  { %53 = vrot.lane.b32.xlu0 %v44_v2, %s202_s9  ;;  %69 = vrot.lane.b32.xlu1 %v44_v2, %s203_s10 }
  0x14   :  { %77 = vrot.lane.b32.xlu0 %v44_v2, %s204_s11  ;;  %85 = vrot.lane.b32.xlu1 %v44_v2, %s205_s12 }
  0x18   :  { %93 = vrot.lane.b32.xlu0 %v44_v2, %s206_s13 }
  0x7e   :  { %v46_v5 = vpop.permute.xlu0 %45   ;;  %v62_v6 = vpop.permute.xlu1 %61  }
  0x7f   :  { %49 = vst.msk [vmem:[#allocation0 + $0x1] ss:$8 sm:$0xf] %vm34_vm0, %v46_v5   ;;  %51 = vst.msk [vmem:[#allocation0 + $0x1] ss:$8 sm:$0xf0] %vm34_vm0, %v46_v5  }
  0x80   :  { %65 = vst.msk [vmem:[#allocation0 + $0x3] ss:$8 sm:$0xf] %vm34_vm0, %v62_v6   ;;  %67 = vst.msk [vmem:[#allocation0 + $0x3] ss:$8 sm:$0xf0] %vm34_vm0, %v62_v6  }
  0x82   :  { %v54_v7 = vpop.permute.xlu0 %53   ;;  %v70_v8 = vpop.permute.xlu1 %69  }
  0x83   :  { %57 = vst.msk [vmem:[#allocation0 + $0x2] ss:$8 sm:$0xf] %vm34_vm0, %v54_v7   ;;  %59 = vst.msk [vmem:[#allocation0 + $0x2] ss:$8 sm:$0xf0] %vm34_vm0, %v54_v7  }
  0x84   :  { %73 = vst.msk [vmem:[#allocation0 + $0x4] ss:$8 sm:$0xf] %vm34_vm0, %v70_v8   ;;  %75 = vst.msk [vmem:[#allocation0 + $0x4] ss:$8 sm:$0xf0] %vm34_vm0, %v70_v8  }
  0x86   :  { %v78_v9 = vpop.permute.xlu0 %77   ;;  %v86_v10 = vpop.permute.xlu1 %85  }
  0x87   :  { %81 = vst.msk [vmem:[#allocation0 + $0x5] ss:$8 sm:$0xf] %vm34_vm0, %v78_v9   ;;  %83 = vst.msk [vmem:[#allocation0 + $0x5] ss:$8 sm:$0xf0] %vm34_vm0, %v78_v9  }
  0x88   :  { %89 = vst.msk [vmem:[#allocation0 + $0x6] ss:$8 sm:$0xf] %vm34_vm0, %v86_v10   ;;  %91 = vst.msk [vmem:[#allocation0 + $0x6] ss:$8 sm:$0xf0] %vm34_vm0, %v86_v10  }
  0x8a   :  { %v94_v11 = vpop.permute.xlu0 %93  }
  0x8b   :  { %97 = vst.msk [vmem:[#allocation0 + $0x7] ss:$8 sm:$0xf] %vm34_vm0, %v94_v11   ;;  %99 = vst.msk [vmem:[#allocation0 + $0x7] ss:$8 sm:$0xf0] %vm34_vm0, %v94_v11  }
  0x92   :  { %v104_v12 = vld [vmem:[#allocation0] sm:$0xff]  ;;  %v109_v13 = vld [vmem:[#allocation0 + $0x8] sm:$0xff]  ;;  %v115_v14 = vld [vmem:[#allocation0 + $0x10] sm:$0xff] }
  0x93   :  { %v173_v15 = vpack.c.bf16 %v109_v13, %v104_v12  ;;  %v122_v16 = vld [vmem:[#allocation0 + $0x18] sm:$0xff]  ;;  %v129_v17 = vld [vmem:[#allocation0 + $0x20] sm:$0xff]  ;;  %v136_v18 = vld [vmem:[#allocation0 + $0x28] sm:$0xff] }
  0x94   :  { %v178_v19 = vpack.c.bf16 %v122_v16, %v115_v14  ;;  %v183_v20 = vpack.c.bf16 %v136_v18, %v129_v17  ;;  %v143_v21 = vld [vmem:[#allocation0 + $0x30] sm:$0xff]  ;;  %v150_v22 = vld [vmem:[#allocation0 + $0x38] sm:$0xff] }
  0x95   :  { %174 = vst [vmem:[%s251_s1] sm:$0xff] %v173_v15   ;;  %v188_v23 = vpack.c.bf16 %v150_v22, %v143_v21 }
  0x96   :  { %190 = vst [vmem:[%s251_s1 + $0x8] sm:$0xff] %v178_v19   ;;  %191 = vst [vmem:[%s251_s1 + $0x10] sm:$0xff] %v183_v20  }
  0x97   :  { %192 = vst [vmem:[%s251_s1 + $0x18] sm:$0xff] %v188_v23  }

// kernel: dcfm_forward.5
= control target key start
LH: loop header
LB: loop body
LE: loop exit
PB: predicated region body
PF: predicated region fallthrough
CT: control target
= control target key end

     0   :  { %s987_s21 = smov 0   ;;  %s989_s22 = smov 0   ;;  %s1148_s0 = inlined_call_operand.vmem [shape: bf16[3,36,256], index: 0, kind: input, shape index: {}]   ;;  %s1149_s1 = inlined_call_operand.vmem [shape: bf16[3,4,36], index: 1, kind: input, shape index: {}]   ;;  %s1150_s2 = inlined_call_operand.vmem [shape: f32[3,4,1], index: 2, kind: input, shape index: {}]   ;;  %s1151_s3 = inlined_call_operand.vmem [shape: f32[3,4,1], index: 3, kind: input, shape index: {}]   ;;  %s1152_s4 = inlined_call_operand.vmem [shape: f32[3,1,1], index: 4, kind: input, shape index: {}]   ;;  %s1153_s5 = inlined_call_operand.vmem [shape: bf16[3,4,256], index: 5, kind: output, shape index: {0}]   ;;  %s1154_s6 = inlined_call_operand.vmem [shape: f32[3,1,1], index: 6, kind: output, shape index: {1}]  }
   0x1   :  { %s991_s23 = smov 0  }
   0x2 LB: > { %s1003_s24 = sadd.s32 4294967295, %s946_s23   ;;  %s1006_s25 = sadd.s32 1, %s946_s23   ;;  %s946_s23 = sphi %s991_s23, %s1158_s23   ;;  %s942_s22 = sphi %s989_s22, %s1157_s22   ;;  %s938_s21 = sphi %s987_s21, %s1156_s21  }
   0x3   : > { %s21_s26 = ssub.s32 %s946_s23, %s1006_s25  ;;  %s24_s27 = sadd.s32 1, %s942_s22 }
   0x4   : > { %p22_p0 = scmp.eq.s32.totalorder %s21_s26, 0  ;;  %p31_p1 = scmp.ne.s32.totalorder %s942_s22, %s938_s21 }
   0x5   : > { %p32_p2 = scmp.eq.s32.totalorder %s946_s23, 0  ;;  %p145_p3 = scmp.eq.s32.totalorder %s1003_s24, 1 }
   0x6   : > { %s1016_s28 = scalar_select %p22_p0, %s942_s22, %s24_s27  }
   0x7   : > { %p33_p4 = por %p32_p2, %p31_p1  ;;  %p1018_p5 = por %p145_p3, %p31_p1 }
   0x8   : > { %p790_p6 = scmp.ge.s32.totalorder %s946_s23, 2 }
   0xa   : > { %200 = sbr.rel (%p790_p6) target bundleno = 31 (0x1f), region = 32 }
  0x11   : > { %203 = sbr.rel (!%p33_p4) target bundleno = 31 (0x1f), region = 36  ;;  %s205_s30 = sand.u32 (%p33_p4), 1, %s942_s22  }
  0x12   : > { %s791_s7 = sshll.u32 (%p33_p4), %s946_s23, 2  ;;  %s874_s8 = smul.u32 (%p33_p4), 60, %s205_s30 }
  0x13   : > { %s1028_s11 = scalar_lea.vmem (%p33_p4), %s1148_s0, %s791_s7 }
  0x14   : > { %v225_v0 = vld [vmem:[%s1028_s11] sm:$0xf] (%p33_p4)  ;;  %v227_v1 = vld [vmem:[%s1028_s11 + $0x8] sm:$0xf] (%p33_p4)  ;;  %v229_v2 = vld [vmem:[%s1028_s11 + $0x10] sm:$0xf] (%p33_p4) }
  0x15   : > { %v231_v3 = vld [vmem:[%s1028_s11 + $0x18] sm:$0xf] (%p33_p4)  ;;  %v233_v4 = vld [vmem:[%s1028_s11 + $0x20] sm:$0xf] (%p33_p4)  ;;  %s207_s12 = scalar_lea.vmem (%p33_p4), [#allocation3], %s874_s8 }
  0x16   : > { %226 = vst [vmem:[%s207_s12] sm:$0xf] (%p33_p4), %v225_v0  ;;  %228 = vst [vmem:[%s207_s12 + $0x4] sm:$0xf] (%p33_p4), %v227_v1  ;;  %v235_v5 = vld [vmem:[%s1028_s11 + $0x28] sm:$0xf] (%p33_p4) }
  0x17   : > { %230 = vst [vmem:[%s207_s12 + $0x8] sm:$0xf] (%p33_p4), %v229_v2  ;;  %232 = vst [vmem:[%s207_s12 + $0xc] sm:$0xf] (%p33_p4), %v231_v3  ;;  %v237_v6 = vld [vmem:[%s1028_s11 + $0x30] sm:$0xf] (%p33_p4) }
  0x18   : > { %234 = vst [vmem:[%s207_s12 + $0x10] sm:$0xf] %v233_v4  ;;  %v239_v7 = vld [vmem:[%s1028_s11 + $0x38] sm:$0xf]  ;;  %236 = vst [vmem:[%s207_s12 + $0x14] sm:$0xf] %v235_v5 }
  0x19   : > { %238 = vst [vmem:[%s207_s12 + $0x18] sm:$0xf] %v237_v6  ;;  %240 = vst [vmem:[%s207_s12 + $0x1c] sm:$0xf] %v239_v7  ;;  %v241_v8 = vld [vmem:[%s1028_s11 + $0x40] sm:$0xf] }
  0x1a   : > { %v243_v9 = vld [vmem:[%s1028_s11 + $0x48] sm:$0xf]  ;;  %v245_v10 = vld [vmem:[%s1028_s11 + $0x50] sm:$0xf]  ;;  %242 = vst [vmem:[%s207_s12 + $0x20] sm:$0xf] %v241_v8 }
  0x1b   : > { %244 = vst [vmem:[%s207_s12 + $0x24] sm:$0xf] %v243_v9  ;;  %246 = vst [vmem:[%s207_s12 + $0x28] sm:$0xf] %v245_v10  ;;  %v247_v11 = vld [vmem:[%s1028_s11 + $0x58] sm:$0xf] }
  0x1c   : > { %v249_v12 = vld [vmem:[%s1028_s11 + $0x60] sm:$0xf]  ;;  %v251_v13 = vld [vmem:[%s1028_s11 + $0x68] sm:$0xf]  ;;  %248 = vst [vmem:[%s207_s12 + $0x2c] sm:$0xf] %v247_v11 }
  0x1d   : > { %250 = vst [vmem:[%s207_s12 + $0x30] sm:$0xf] %v249_v12  ;;  %252 = vst [vmem:[%s207_s12 + $0x34] sm:$0xf] %v251_v13  ;;  %v253_v14 = vld [vmem:[%s1028_s11 + $0x70] sm:$0xf] }
  0x1e   : > { %254 = vst [vmem:[%s207_s12 + $0x38] sm:$0xf] %v253_v14 }
  0x1f PF: > { %p792_p7 = scmp.ge.s32.totalorder %s946_s23, 1  ;;  %p306_p8 = scmp.lt.s32.totalorder %s946_s23, 3 }
  0x21   : > { %p307_p9 = pnand %p792_p7, %p306_p8 }
  0x22   : > { %s313_s13 = sand.u32 (!%p307_p9), 1, %s938_s21   ;;  %p793_p10 = scmp.ne.s32.totalorder (!%p307_p9), %s1003_s24, 0 }
  0x23   : > { %310 = sbr.rel (%p307_p9) target bundleno = 504 (0x1f8), region = 77 }
  0x24   : > { %s875_s14 = smul.u32 (!%p307_p9), 60, %s313_s13 }
  0x25   : > { %s876_s15 = smul.u32 (!%p307_p9), 6, %s313_s13 }
  0x26   : > { %s1048_s16 = scalar_lea.vmem (!%p307_p9), [#allocation3], %s875_s14 }
  0x27   : > { %s1050_s17 = scalar_lea.vmem (!%p307_p9), [#allocation4], %s876_s15 }
  0x2a   : > { %345 = sbr.rel (%p793_p10) target bundleno = 49 (0x31), region = 85  ;;  %vm346_vm0 = vcmask (!%p793_p10), 3072   ;;  %v948_v15 = vmov (!%p793_p10), 0.0  }
  0x2b   : > { %347 = vst.msk [vmem:[#allocation2] sm:$0xf] (!%p793_p10), %vm346_vm0, %v948_v15  ;;  %348 = vst.msk [vmem:[#allocation2 + $0x4] sm:$0xf] (!%p793_p10), %vm346_vm0, %v948_v15 }
  0x2c   : > { %349 = vst.msk [vmem:[#allocation2 + $0x8] sm:$0xf] (!%p793_p10), %vm346_vm0, %v948_v15 }
  0x31 PF: > { %v907_v16 = vld [vmem:[%s1048_s16] sm:$0xff]   ;;  %v949_v17 = vmov 0.0   ;;  %v908_v18 = vld [vmem:[%s1048_s16 + $0x8] sm:$0xff]   ;;  %v909_v19 = vld [vmem:[%s1048_s16 + $0x14] sm:$0xff]   ;;  %vm950_vm1 = vmmov 0   ;;  %vm381_vm2 = vcmask 1041408  }
  0x32   : > { %844 = vmatprep.subr.bf16.mxu0 %v949_v17  ;;  %854 = vmatprep.subr.bf16.mxu1 %v949_v17  ;;  %v910_v20 = vld [vmem:[%s1048_s16 + $0x10] ss:$0 sps:$4 sm:$0x33]   ;;  %v911_v21 = vld [vmem:[%s1048_s16 + $0x1c] sm:$0xff]   ;;  %v356_v25 = vld [vmem:[%s1150_s2] sm:$0xf] }
  0x33   : > { %845 = vmatpush3.bf16.msra.mxu0 %v907_v16  ;;  %850 = vmatprep.mubr.msk.bf16.mxu0 %vm950_vm1, %v949_v17  ;;  %v912_v22 = vld [vmem:[%s1048_s16 + $0x24] ss:$0 sps:$4 sm:$0x33]   ;;  %v383_v23 = vsel %vm381_vm2, %v910_v20, 0  ;;  %v350_v26 = vld [vmem:[%s1149_s1] sm:$0x3] }
  0x34   : > { %846 = vmatprep.subr.bf16.mxu0 %v949_v17  ;;  %855 = vmatpush3.bf16.msra.mxu1 %v909_v19  ;;  %v469_v24 = vsel %vm381_vm2, %v912_v22, 0  ;;  %vm377_vm3 = vcmask 293888   ;;  %v913_v27 = vld [vmem:[%s1048_s16 + $0x28] sm:$0xff]   ;;  %v951_v28 = vmov 0   ;;  %v816_v29 = vld [vmem:[%s1150_s2 + $0x8] sm:$0xf] }
  0x35   : > { %860 = vmatprep.mubr.msk.bf16.mxu1 %vm950_vm1, %v949_v17  ;;  %856 = vmatprep.subr.bf16.mxu1 %v949_v17  ;;  %v798_v30 = vld [vmem:[%s1149_s1 + $0x2] sm:$0x3]  ;;  %v804_v31 = vld [vmem:[%s1150_s2 + $0x4] sm:$0xf]  ;;  %vm428_vm4 = vcmask 1043456   ;;  %vm433_vm5 = vcmask 3072  }
  0x36   : > { %905 = vset.pattern.permute.xlu0 %v951_v28  ;;  %906 = vset.pattern.permute.xlu1 %v951_v28  ;;  %v914_v32 = vld [vmem:[%s1048_s16 + $0x30] sm:$0xff]   ;;  %v915_v33 = vld [vmem:[%s1048_s16 + $0x38] ss:$0 sps:$4 sm:$0x33]   ;;  %v601_v2 = vld [vmem:[#allocation2 + $0x8] sm:$0xf] }
  0x37   : > { %847 = vmatpush3.bf16.msra.mxu0 %v908_v18  ;;  %359 = vperm.xlu0 %905, %v356_v25   ;;  %v555_v34 = vsel %vm381_vm2, %v915_v33, 0  ;;  %v810_v35 = vld [vmem:[%s1149_s1 + $0x4] sm:$0x3]  ;;  %v427_v60 = vld [vmem:[#allocation2] sm:$0xf]  ;;  %p822_p11 = scmp.ne.s32.totalorder %s1003_s24, 1 }
  0x38   : > { %848 = vmatprep.subr.bf16.mxu0 %v949_v17  ;;  %857 = vmatpush3.bf16.msra.mxu1 %v911_v21  ;;  %v515_v62 = vld [vmem:[#allocation2 + $0x4] sm:$0xf]  ;;  %v611_v5 = vld [vmem:[%s1151_s3] sm:$0xf] (!%p822_p11)  ;;  %v825_v11 = vld [vmem:[%s1151_s3 + $0x8] sm:$0xf] (!%p822_p11) }
  0x39   : > { %858 = vmatprep.subr.bf16.mxu1 %v949_v17  ;;  %533 = vperm.xlu1 %906, %v816_v29   ;;  %v823_v8 = vld [vmem:[%s1151_s3 + $0x4] sm:$0xf] (!%p822_p11)  ;;  %v622_v33 = vld [vmem:[%s1152_s4] sm:$0x1] (!%p822_p11)  ;;  %vm669_vm6 = vcmask (!%p822_p11), 0  }
  0x3b   : > { %849 = vmatpush3.bf16.msra.mxu0 %v383_v23  ;;  %447 = vperm.xlu0 %905, %v804_v31  }
  0x3c   : > { %864 = vmatprep.subr.bf16.mxu0 %v949_v17  ;;  %859 = vmatpush3.bf16.msra.mxu1 %v469_v24 }
  0x3e   : > { %851 = vmatmul.mubr.msk.bf16.vlgmr.msra.gmra.mrb[0].mxu0 %vm377_vm3, %v350_v26 }
  0x3f   : > { %865 = vmatpush3.bf16.msra.mxu0 %v913_v27  ;;  %870 = vmatprep.mubr.msk.bf16.mxu0 %vm950_vm1, %v949_v17 }
  0x40   : > { %861 = vmatmul.mubr.msk.bf16.vlgmr.msra.gmra.mrb[0].mxu1 %vm377_vm3, %v798_v30  ;;  %866 = vmatprep.subr.bf16.mxu0 %v949_v17 }
  0x43   : > { %867 = vmatpush3.bf16.msra.mxu0 %v914_v32 }
  0x44   : > { %868 = vmatprep.subr.bf16.mxu0 %v949_v17 }
  0x47   : > { %869 = vmatpush3.bf16.msra.mxu0 %v555_v34 }
  0x4a   : > { %871 = vmatmul.mubr.msk.bf16.vlgmr.msra.gmra.mrb[4].mxu0 %vm377_vm3, %v810_v35 }
  0xb6   : > { %v360_v36 = vpop.permute.xlu0 %359 }
  0xb8   : > { %v534_v52 = vpop.permute.xlu1 %533 }
  0xba   : > { %v448_v38 = vpop.permute.xlu0 %447 }
 0x111   : > { %v419_v37 = vpop.f32.mrb[0].mxu0 }
 0x112   : > { %v420_v39 = vadd.f32 %v419_v37, %v360_v36  ;;  %v852_v40 = vpop.f32.mrb[1].mxu0  ;;  %v824_v36 = vld [vmem:[%s1152_s4 + $0x1] sm:$0x1] (!%p822_p11) }
 0x113   : > { %v422_v41 = vpop.f32.mrb[2].mxu0  ;;  %v505_v42 = vpop.f32.mrb[0].mxu1 }
 0x114   : > { %v425_v43 = vpack.c.bf16 %v420_v39, %v420_v39  ;;  %v853_v44 = vpop.f32.mrb[3].mxu0  ;;  %v506_v45 = vadd.f32 %v505_v42, %v448_v38  ;;  %v429_v46 = vsel %vm428_vm4, %v420_v39, 0.0  ;;  %v862_v47 = vpop.f32.mrb[1].mxu1  ;;  %v826_v39 = vld [vmem:[%s1152_s4 + $0x2] sm:$0x1] (!%p822_p11) }
 0x115   : > { %430 = vadd.xlane.f32.xlu1 %v429_v46  ;;  %v508_v48 = vpop.f32.mrb[2].mxu1 }
 0x116   : > { %426 = vst [vmem:[%s1050_s17] sm:$0x3] %v425_v43  ;;  %v511_v49 = vpack.c.bf16 %v506_v45, %v506_v45  ;;  %v863_v50 = vpop.f32.mrb[3].mxu1  ;;  %v516_v51 = vsel %vm428_vm4, %v506_v45, 0.0 }
 0x117   : > { %517 = vadd.xlane.f32.xlu0 %v516_v51 }
 0x118   : > { %809 = vst [vmem:[%s1050_s17 + $0x2] sm:$0x3] %v511_v49 }
 0x11d   : > { %v591_v53 = vpop.f32.mrb[4].mxu0 }
 0x11e   : > { %v592_v54 = vadd.f32 %v591_v53, %v534_v52  ;;  %v872_v55 = vpop.f32.mrb[5].mxu0 }
 0x11f   : > { %v594_v56 = vpop.f32.mrb[6].mxu0 }
 0x120   : > { %v597_v57 = vpack.c.bf16 %v592_v54, %v592_v54  ;;  %v873_v58 = vpop.f32.mrb[7].mxu0  ;;  %v602_v59 = vsel %vm428_vm4, %v592_v54, 0.0 }
 0x121   : > { %603 = vadd.xlane.f32.xlu0 %v602_v59 }
 0x122   : > { %821 = vst [vmem:[%s1050_s17 + $0x4] sm:$0x3] %v597_v57 }
 0x1a2   : > { %v431_v61 = vpop.xlane.xlu1 %430 }
 0x1a3   : > { %v432_v63 = vadd.f32 %v431_v61, %v427_v60 }
 0x1a4   : > { %v518_v0 = vpop.xlane.xlu0 %517 }
 0x1a5   : > { %434 = vst.msk [vmem:[#allocation2] sm:$0xf] %vm433_vm5, %v432_v63  ;;  %v519_v1 = vadd.f32 %v518_v0, %v515_v62 }
 0x1a7   : > { %520 = vst.msk [vmem:[#allocation2 + $0x4] sm:$0xf] %vm433_vm5, %v519_v1 }
 0x1ab   : > { %610 = sbr.rel (%p822_p11) target bundleno = 497 (0x1f1), region = 89 }
 0x1ac   : > { %v612_v6 = vld [vmem:[#allocation2] sm:$0xf] (!%p822_p11) }
 0x1ad   : > { %v613_v7 = vmul.f32 (!%p822_p11), %v612_v6, %v611_v5 }
 0x1ae   : > { %v604_v3 = vpop.xlane.xlu0 %603  ;;  %v626_v9 = vld [vmem:[#allocation2 + $0x4] sm:$0xf] (!%p822_p11) }
 0x1af   : > { %v605_v4 = vadd.f32 %v604_v3, %v601_v2  ;;  %v627_v10 = vmul.f32 (!%p822_p11), %v823_v8, %v626_v9  ;;  %v614_v13 = vsel (!%p822_p11), %vm433_vm5, %v613_v7, 0.0 }
 0x1b0   : > { %v615_v15 = vrot.slane (!%p822_p11), %v614_v13, 4 }
 0x1b1   : > { %606 = vst.msk [vmem:[#allocation2 + $0x8] sm:$0xf] %vm433_vm5, %v605_v4  ;;  %v628_v16 = vsel (!%p822_p11), %vm433_vm5, %v627_v10, 0.0 }
 0x1b2   : > { %v629_v17 = vrot.slane %v628_v16, 4  ;;  %v616_v19 = vadd.f32 %v615_v15, %v614_v13 }
 0x1b4   : > { %v630_v21 = vadd.f32 %v629_v17, %v628_v16  ;;  %v617_v22 = vrot.slane %v616_v19, 2 }
 0x1b6   : > { %v631_v24 = vrot.slane %v630_v21, 2  ;;  %v618_v25 = vadd.f32 %v617_v22, %v616_v19 }
 0x1b8   : > { %v641_v12 = vld [vmem:[#allocation2 + $0x8] sm:$0xf]  ;;  %v632_v27 = vadd.f32 %v631_v24, %v630_v21  ;;  %v619_v28 = vrot.slane %v618_v25, 1 }
 0x1b9   : > { %v642_v14 = vmul.f32 %v825_v11, %v641_v12 }
 0x1ba   : > { %v633_v30 = vrot.slane %v632_v27, 1  ;;  %v620_v31 = vadd.f32 %v619_v28, %v618_v25 }
 0x1bb   : > { %v643_v18 = vsel %vm433_vm5, %v642_v14, 0.0 }
 0x1bc   : > { %v644_v20 = vrot.slane %v643_v18, 4  ;;  %v634_v34 = vadd.f32 %v633_v30, %v632_v27  ;;  %v621_v35 = vmul.f32 0.00390625, %v620_v31 }
 0x1be   : > { %v645_v23 = vadd.f32 %v644_v20, %v643_v18  ;;  %v635_v38 = vmul.f32 0.00390625, %v634_v34  ;;  %v623_v40 = vadd.f32 %v622_v33, %v621_v35 }
 0x1c0   : > { %v646_v26 = vrot.slane %v645_v23, 2  ;;  %v638_v42 = vadd.f32 %v824_v36, %v635_v38 }
 0x1c2   : > { %v647_v29 = vadd.f32 %v646_v26, %v645_v23  ;;  %v654_v44 = vmax.f32 %v623_v40, %v638_v42 }
 0x1c4   : > { %v648_v32 = vrot.slane %v647_v29, 1 }
 0x1c6   : > { %v649_v37 = vadd.f32 %v648_v32, %v647_v29 }
 0x1c8   : > { %v650_v41 = vmul.f32 0.00390625, %v649_v37 }
 0x1ca   : > { %v653_v43 = vadd.f32 %v826_v39, %v650_v41 }
 0x1cc   : > { %v655_v45 = vmax.f32 %v654_v44, %v653_v43 }
 0x1ce   : > { %v656_v46 = vsub.f32 %v623_v40, %v655_v45  ;;  %v659_v47 = vsub.f32 %v638_v42, %v655_v45  ;;  %v662_v48 = vsub.f32 %v653_v43, %v655_v45 }
 0x1d0   : > { %v657_v49 = vmul.f32 1.442695, %v656_v46  ;;  %v660_v50 = vmul.f32 1.442695, %v659_v47  ;;  %v663_v51 = vmul.f32 1.442695, %v662_v48 }
 0x1d2   : > { %916 = vpow2.f32 %v657_v49 }
 0x1d3   : > { %918 = vpow2.f32 %v660_v50 }
 0x1d4   : > { %920 = vpow2.f32 %v663_v51 }
 0x1dc   : > { %v917_v52 = vpop.eup %916 }
 0x1dd   : > { %v919_v53 = vpop.eup %918 }
 0x1de   : > { %v921_v54 = vpop.eup %920  ;;  %v665_v55 = vadd.f32 %v919_v53, %v917_v52 }
 0x1e0   : > { %v666_v56 = vadd.f32 %v921_v54, %v665_v55 }
 0x1e2   : > { %922 = vrcp.f32 %v666_v56 }
 0x1ec   : > { %v923_v57 = vpop.eup %922 }
 0x1ed   : > { %v668_v58 = vmul.f32 %v923_v57, %v917_v52  ;;  %v671_v59 = vmul.f32 %v923_v57, %v919_v53  ;;  %v674_v60 = vmul.f32 %v923_v57, %v921_v54 }
 0x1ef   : > { %670 = vst.msk [vmem:[%s1154_s6] sm:$0x1] %vm669_vm6, %v668_v58  ;;  %827 = vst.msk [vmem:[%s1154_s6 + $0x1] sm:$0x1] %vm669_vm6, %v671_v59 }
 0x1f0   : > { %828 = vst.msk [vmem:[%s1154_s6 + $0x2] sm:$0x1] %vm669_vm6, %v674_v60 }
 0x1f1 PF: > { %683 = sbr.rel (!%p1018_p5) target bundleno = 504 (0x1f8), region = 93  ;;  %s829_s11 = sshll.u32 (%p1018_p5), %s1003_s24, 1  ;;  %v701_v61 = vld [vmem:[%s1050_s17] sm:$0x3] (%p1018_p5)  ;;  %v703_v62 = vld [vmem:[%s1050_s17 + $0x2] sm:$0x3] (%p1018_p5) }
 0x1f2   : > { %s685_s14 = scalar_lea.vmem (%p1018_p5), %s1153_s5, %s829_s11  ;;  %v705_v63 = vld [vmem:[%s1050_s17 + $0x4] sm:$0x3] (%p1018_p5) }
 0x1f3   : > { %702 = vst [vmem:[%s685_s14] sm:$0x3] (%p1018_p5), %v701_v61  ;;  %704 = vst [vmem:[%s685_s14 + $0x4] sm:$0x3] (%p1018_p5), %v703_v62 }
 0x1f4   : > { %706 = vst [vmem:[%s685_s14 + $0x8] sm:$0x3] (%p1018_p5), %v705_v63 }
 0x1f8 PF: > { %p14_p12 = scmp.ge.s32.totalorder %s1006_s25, 4   ;;  %s1156_s21 = smov %s942_s22 }
 0x1f9   : > { %s1157_s22 = smov %s1016_s28  ;;  %s1158_s23 = smov %s1006_s25 }
 0x1fa   :  { %16 = sbr.rel (!%p14_p12) target bundleno = 2 (0x2), region = 182 }

// kernel: dcfm_forward.6
= control target key start
LH: loop header
LB: loop body
LE: loop exit
PB: predicated region body
PF: predicated region fallthrough
CT: control target
= control target key end

     0   :  { %s374_s9 = smov 0   ;;  %s376_s10 = smov 0   ;;  %s437_s0 = inlined_call_operand.vmem [shape: f32[3,1,1], index: 0, kind: input, shape index: {}]   ;;  %s438_s1 = inlined_call_operand.vmem [shape: bf16[3,4,256], index: 1, kind: input, shape index: {}]   ;;  %s439_s2 = inlined_call_operand.vmem [shape: bf16[4,256], index: 2, kind: output, shape index: {}]  }
   0x1   :  { %s378_s11 = smov 0  }
   0x2 LB: > { %s289_s12 = sadd.s32 4294967295, %s356_s11   ;;  %s391_s13 = sadd.s32 1, %s356_s11   ;;  %s356_s11 = sphi %s378_s11, %s442_s11   ;;  %s352_s10 = sphi %s376_s10, %s441_s10   ;;  %s348_s9 = sphi %s374_s9, %s440_s9  }
   0x3   : > { %s37_s14 = ssub.s32 %s356_s11, %s391_s13  ;;  %s40_s15 = sadd.s32 1, %s352_s10 }
   0x4   : > { %p38_p0 = scmp.eq.s32.totalorder %s37_s14, 0  ;;  %p47_p1 = scmp.ne.s32.totalorder %s352_s10, %s348_s9 }
   0x5   : > { %p48_p2 = scmp.eq.s32.totalorder %s356_s11, 0  ;;  %p292_p4 = scmp.ge.s32.totalorder %s356_s11, 2 }
   0x6   : > { %s400_s16 = scalar_select %p38_p0, %s352_s10, %s40_s15  }
   0x7   : > { %p49_p3 = por %p48_p2, %p47_p1  ;;  %102 = sbr.rel (%p292_p4) target bundleno = 21 (0x15), region = 20 }
   0xe   : > { %105 = sbr.rel (!%p49_p3) target bundleno = 21 (0x15), region = 24  ;;  %s107_s17 = sand.u32 (%p49_p3), 1, %s352_s10  }
   0xf   : > { %s293_s18 = sshll.u32 (%p49_p3), %s356_s11, 1  ;;  %s305_s19 = smul.u32 (%p49_p3), 6, %s107_s17 }
  0x10   : > { %s111_s22 = scalar_lea.vmem (%p49_p3), %s438_s1, %s293_s18 }
  0x11   : > { %v127_v0 = vld [vmem:[%s111_s22] sm:$0x3] (%p49_p3)  ;;  %v129_v1 = vld [vmem:[%s111_s22 + $0x4] sm:$0x3] (%p49_p3)  ;;  %v131_v2 = vld [vmem:[%s111_s22 + $0x8] sm:$0x3] (%p49_p3) }
  0x12   : > { %s109_s23 = scalar_lea.vmem (%p49_p3), [#allocation2], %s305_s19 }
  0x13   : > { %128 = vst [vmem:[%s109_s23] sm:$0x3] (%p49_p3), %v127_v0  ;;  %130 = vst [vmem:[%s109_s23 + $0x2] sm:$0x3] (%p49_p3), %v129_v1 }
  0x14   : > { %132 = vst [vmem:[%s109_s23 + $0x4] sm:$0x3] (%p49_p3), %v131_v2 }
  0x15 PF: > { %p294_p5 = scmp.ge.s32.totalorder %s356_s11, 1  ;;  %p152_p6 = scmp.lt.s32.totalorder %s356_s11, 3 }
  0x17   : > { %p153_p7 = pnand %p294_p5, %p152_p6 }
  0x18   : > { %v296_v3 = vld [vmem:[%s437_s0] ss:$0 sm:$0xff] (!%p153_p7)  ;;  %v358_v4 = vmov (!%p153_p7), 0   ;;  %v302_v5 = vld [vmem:[%s437_s0 + $0x2] ss:$0 sm:$0xff] (!%p153_p7)  ;;  %s159_s30 = sand.u32 (!%p153_p7), 1, %s348_s9  }
  0x19   : > { %156 = sbr.rel (%p153_p7) target bundleno = 167 (0xa7), region = 58  ;;  %332 = vset.pattern.permute.xlu0 (!%p153_p7), %v358_v4  ;;  %333 = vset.pattern.permute.xlu1 (!%p153_p7), %v358_v4  ;;  %v299_v6 = vld [vmem:[%s437_s0 + $0x1] ss:$0 sm:$0xff] (!%p153_p7)  ;;  %p179_p8 = scmp.lt.s32.totalorder (!%p153_p7), %s289_s12, 1 }
  0x1a   : > { %192 = vperm.xlu0 (!%p153_p7), %332, %v296_v3   ;;  %223 = vperm.xlu1 (!%p153_p7), %333, %v302_v5   ;;  %s306_s3 = smul.u32 (!%p153_p7), 6, %s159_s30 }
  0x1c   : > { %s161_s4 = scalar_lea.vmem (!%p153_p7), [#allocation2], %s306_s3 }
  0x1d   : > { %v184_v7 = vld [vmem:[%s161_s4] sm:$0x3] (!%p153_p7)  ;;  %v298_v8 = vld [vmem:[%s161_s4 + $0x2] sm:$0x3] (!%p153_p7)  ;;  %v301_v9 = vld [vmem:[%s161_s4 + $0x4] sm:$0x3] (!%p153_p7) }
  0x1e   : > { %207 = vperm.xlu0 (!%p153_p7), %332, %v299_v6   ;;  %v185_v11 = vunpack.c.l.bf16 (!%p153_p7), %v184_v7  ;;  %v200_v12 = vunpack.c.l.bf16 (!%p153_p7), %v298_v8  ;;  %v216_v13 = vunpack.c.l.bf16 (!%p153_p7), %v301_v9 }
  0x20   : > { %s444_s12 = smov (!%p179_p8, %s289_s12), 1 }
  0x21   : > { %s295_s5 = sshll.u32 %s444_s12, 1 }
  0x22   : > { %s182_s8 = scalar_lea.vmem %s439_s2, %s295_s5 }
  0x99   : > { %v193_v10 = vpop.permute.xlu0 %192  ;;  %v224_v14 = vpop.permute.xlu1 %223 }
  0x9a   : > { %v195_v16 = vmul.f32 %v193_v10, %v185_v11  ;;  %v226_v18 = vmul.f32 %v224_v14, %v216_v13 }
  0x9d   : > { %v208_v15 = vpop.permute.xlu0 %207 }
  0x9e   : > { %v210_v17 = vmul.f32 %v208_v15, %v200_v12 }
  0xa0   : > { %v211_v19 = vadd.f32 %v210_v17, %v195_v16 }
  0xa2   : > { %v227_v20 = vadd.f32 %v226_v18, %v211_v19 }
  0xa4   : > { %v228_v21 = vpack.c.bf16 %v227_v20, %v227_v20 }
  0xa6   : > { %229 = vst [vmem:[%s182_s8] sm:$0x3] %v228_v21 }
  0xa7 PF: > { %p9_p9 = scmp.ge.s32.totalorder %s391_s13, 4   ;;  %s440_s9 = smov %s352_s10 }
  0xa8   : > { %s441_s10 = smov %s400_s16  ;;  %s442_s11 = smov %s391_s13 }
  0xa9   :  { %11 = sbr.rel (!%p9_p9) target bundleno = 2 (0x2), region = 101 }

// kernel: dcfm_forward.4
= control target key start
LH: loop header
LB: loop body
LE: loop exit
PB: predicated region body
PF: predicated region fallthrough
CT: control target
= control target key end

     0   :  { %s3147_s21 = smov 0   ;;  %s3149_s22 = smov 0   ;;  %s3646_s0 = inlined_call_operand.vmem [shape: bf16[16,256], index: 0, kind: input, shape index: {}]   ;;  %s3647_s1 = inlined_call_operand.vmem [shape: bf16[8,256], index: 1, kind: input, shape index: {}]   ;;  %s3648_s2 = inlined_call_operand.vmem [shape: bf16[3,4,16], index: 2, kind: input, shape index: {}]   ;;  %s3649_s3 = inlined_call_operand.vmem [shape: f32[3,4,1], index: 3, kind: input, shape index: {}]   ;;  %s3650_s4 = inlined_call_operand.vmem [shape: bf16[3,4,8], index: 4, kind: input, shape index: {}]   ;;  %s3651_s5 = inlined_call_operand.vmem [shape: f32[3,4,1], index: 5, kind: input, shape index: {}]   ;;  %s3652_s6 = inlined_call_operand.vmem [shape: bf16[3,4,8], index: 6, kind: input, shape index: {}]   ;;  %s3653_s7 = inlined_call_operand.vmem [shape: f32[3,4,1], index: 7, kind: input, shape index: {}]   ;;  %s3654_s8 = inlined_call_operand.vmem [shape: f32[3,16,4], index: 8, kind: input, shape index: {}]   ;;  %s3655_s9 = inlined_call_operand.vmem [shape: f32[3,16,1], index: 9, kind: input, shape index: {}]   ;;  %s3656_s10 = inlined_call_operand.vmem [shape: bf16[3,256,9], index: 10, kind: input, shape index: {}]   ;;  %s3657_s11 = inlined_call_operand.vmem [shape: bf16[3,4,256], index: 11, kind: output, shape index: {0}]   ;;  %s3658_s12 = inlined_call_operand.vmem [shape: f32[3,16,9], index: 12, kind: output, shape index: {1}]  }
   0x1   :  { %s3151_s23 = smov 0  }
   0x2 LB: > { %s3163_s24 = sadd.s32 4294967295, %s3073_s23   ;;  %s3166_s25 = sadd.s32 1, %s3073_s23   ;;  %s3073_s23 = sphi %s3151_s23, %s3665_s23   ;;  %s3069_s22 = sphi %s3149_s22, %s3668_s22   ;;  %s3065_s21 = sphi %s3147_s21, %s3667_s21  }
   0x3   : > { %3661 = sst [smem:[#allocation8_spill]] %s3166_s25  ;;  %s27_s26 = ssub.s32 %s3073_s23, %s3166_s25 }
   0x4   : > { %s30_s27 = sadd.s32 1, %s3069_s22  ;;  %p28_p0 = scmp.eq.s32.totalorder %s27_s26, 0 }
   0x5   : > { %p37_p1 = scmp.ne.s32.totalorder %s3069_s22, %s3065_s21  ;;  %p38_p2 = scmp.eq.s32.totalorder %s3073_s23, 0 }
   0x6   : > { %p287_p3 = scmp.eq.s32.totalorder %s3163_s24, 1  ;;  %p2540_p6 = scmp.ge.s32.totalorder %s3073_s23, 2 }
   0x7   : > { %s3176_s28 = scalar_select %p28_p0, %s3069_s22, %s30_s27  }
   0x8   : > { %p3178_p4 = por %p38_p2, %p37_p1  ;;  %p3182_p5 = por %p287_p3, %p37_p1 }
   0x9   : > { %3662 = sst [smem:[#allocation9_spill]] %s3176_s28  ;;  %354 = sbr.rel (%p2540_p6) target bundleno = 40 (0x28), region = 48 }
  0x10   : > { %357 = sbr.rel (!%p3178_p4) target bundleno = 23 (0x17), region = 52  ;;  %s359_s13 = sand.u32 (%p3178_p4), 1, %s3069_s22  }
  0x11   : > { %s2542_s14 = sshll.u32 (%p3178_p4), %s3073_s23, 2  ;;  %s2541_s15 = sshll.u32 (%p3178_p4), %s359_s13, 3 }
  0x12   : > { %s363_s18 = scalar_lea.vmem (%p3178_p4), %s3646_s0, %s2542_s14  ;;  %s361_s19 = scalar_lea.vmem (%p3178_p4), [#allocation5], %s2541_s15 }
  0x13   : > { %v379_v0 = vld [vmem:[%s363_s18] sm:$0xf] (%p3178_p4)  ;;  %v381_v1 = vld [vmem:[%s363_s18 + $0x8] sm:$0xf] (%p3178_p4) }
  0x14   : > { %380 = vst [vmem:[%s361_s19] sm:$0xf] (%p3178_p4), %v379_v0  ;;  %382 = vst [vmem:[%s361_s19 + $0x4] sm:$0xf] (%p3178_p4), %v381_v1 }
  0x17 PF: > { %416 = sbr.rel (!%p3178_p4) target bundleno = 40 (0x28), region = 97  ;;  %s418_s20 = sand.u32 (%p3178_p4), 1, %s3069_s22  }
  0x18   : > { %s2660_s26 = sshll.u32 (%p3178_p4), %s3073_s23, 6  ;;  %s2976_s27 = smul.u32 (%p3178_p4), 192, %s418_s20 }
  0x19   : > { %s3201_s25 = scalar_lea.vmem (%p3178_p4), %s3656_s10, %s2660_s26 }
  0x1a   : > { %v439_v2 = vld [vmem:[%s3201_s25] sm:$0xff] (%p3178_p4)   ;;  %v443_v3 = vld [vmem:[%s3201_s25 + $0x8] sm:$0xff] (%p3178_p4)   ;;  %v447_v4 = vld [vmem:[%s3201_s25 + $0x10] sm:$0xff] (%p3178_p4)   ;;  %s3209_s28 = scalar_lea.vmem (%p3178_p4), [#allocation6], %s2976_s27 }
  0x1b   : > { %v451_v5 = vld [vmem:[%s3201_s25 + $0x18] sm:$0xff] (%p3178_p4)   ;;  %v455_v6 = vld [vmem:[%s3201_s25 + $0x20] sm:$0xff] (%p3178_p4)   ;;  %v459_v7 = vld [vmem:[%s3201_s25 + $0x28] sm:$0xff] (%p3178_p4)   ;;  %440 = vst [vmem:[%s3209_s28] sm:$0xff] (%p3178_p4), %v439_v2  }
  0x1c   : > { %444 = vst [vmem:[%s3209_s28 + $0x8] sm:$0xff] (%p3178_p4), %v443_v3   ;;  %448 = vst [vmem:[%s3209_s28 + $0x10] sm:$0xff] (%p3178_p4), %v447_v4   ;;  %v463_v8 = vld [vmem:[%s3201_s25 + $0x30] sm:$0xff] (%p3178_p4)   ;;  %v467_v9 = vld [vmem:[%s3201_s25 + $0x38] sm:$0xff] (%p3178_p4)  }
  0x1d   : > { %452 = vst [vmem:[%s3209_s28 + $0x18] sm:$0xff] (%p3178_p4), %v451_v5   ;;  %456 = vst [vmem:[%s3209_s28 + $0x20] sm:$0xff] (%p3178_p4), %v455_v6   ;;  %v471_v10 = vld [vmem:[%s3201_s25 + $0x80] sm:$0xff] (%p3178_p4)   ;;  %v475_v11 = vld [vmem:[%s3201_s25 + $0x88] sm:$0xff] (%p3178_p4)  }
  0x1e   : > { %460 = vst [vmem:[%s3209_s28 + $0x28] sm:$0xff] %v459_v7   ;;  %464 = vst [vmem:[%s3209_s28 + $0x30] sm:$0xff] %v463_v8   ;;  %v479_v12 = vld [vmem:[%s3201_s25 + $0x90] sm:$0xff]   ;;  %v483_v13 = vld [vmem:[%s3201_s25 + $0x98] sm:$0xff]  }
  0x1f   : > { %468 = vst [vmem:[%s3209_s28 + $0x38] sm:$0xff] %v467_v9   ;;  %472 = vst [vmem:[%s3209_s28 + $0x40] sm:$0xff] %v471_v10   ;;  %v487_v14 = vld [vmem:[%s3201_s25 + $0xa0] sm:$0xff]   ;;  %v491_v15 = vld [vmem:[%s3201_s25 + $0xa8] sm:$0xff]  }
  0x20   : > { %476 = vst [vmem:[%s3209_s28 + $0x48] sm:$0xff] %v475_v11   ;;  %480 = vst [vmem:[%s3209_s28 + $0x50] sm:$0xff] %v479_v12   ;;  %v495_v16 = vld [vmem:[%s3201_s25 + $0xb0] sm:$0xff]   ;;  %v499_v17 = vld [vmem:[%s3201_s25 + $0xb8] sm:$0xff]  }
  0x21   : > { %484 = vst [vmem:[%s3209_s28 + $0x58] sm:$0xff] %v483_v13   ;;  %488 = vst [vmem:[%s3209_s28 + $0x60] sm:$0xff] %v487_v14   ;;  %v503_v18 = vld [vmem:[%s3201_s25 + $0x100] sm:$0xff]   ;;  %v507_v19 = vld [vmem:[%s3201_s25 + $0x108] sm:$0xff]  }
  0x22   : > { %492 = vst [vmem:[%s3209_s28 + $0x68] sm:$0xff] %v491_v15   ;;  %496 = vst [vmem:[%s3209_s28 + $0x70] sm:$0xff] %v495_v16   ;;  %v511_v20 = vld [vmem:[%s3201_s25 + $0x110] sm:$0xff]   ;;  %v515_v21 = vld [vmem:[%s3201_s25 + $0x118] sm:$0xff]  }
  0x23   : > { %500 = vst [vmem:[%s3209_s28 + $0x78] sm:$0xff] %v499_v17   ;;  %504 = vst [vmem:[%s3209_s28 + $0x80] sm:$0xff] %v503_v18   ;;  %v519_v22 = vld [vmem:[%s3201_s25 + $0x120] sm:$0xff]   ;;  %v523_v23 = vld [vmem:[%s3201_s25 + $0x128] sm:$0xff]  }
  0x24   : > { %508 = vst [vmem:[%s3209_s28 + $0x88] sm:$0xff] %v507_v19   ;;  %512 = vst [vmem:[%s3209_s28 + $0x90] sm:$0xff] %v511_v20   ;;  %v527_v24 = vld [vmem:[%s3201_s25 + $0x130] sm:$0xff]   ;;  %v531_v25 = vld [vmem:[%s3201_s25 + $0x138] sm:$0xff]  }
  0x25   : > { %516 = vst [vmem:[%s3209_s28 + $0x98] sm:$0xff] %v515_v21   ;;  %520 = vst [vmem:[%s3209_s28 + $0xa0] sm:$0xff] %v519_v22  }
  0x26   : > { %524 = vst [vmem:[%s3209_s28 + $0xa8] sm:$0xff] %v523_v23   ;;  %528 = vst [vmem:[%s3209_s28 + $0xb0] sm:$0xff] %v527_v24  }
  0x27   : > { %532 = vst [vmem:[%s3209_s28 + $0xb8] sm:$0xff] %v531_v25  }
  0x28 PF: > { %p2545_p7 = scmp.ge.s32.totalorder %s3073_s23, 1  ;;  %p652_p8 = scmp.lt.s32.totalorder %s3073_s23, 3 }
  0x2a   : > { %p653_p9 = pnand %p2545_p7, %p652_p8 }
  0x2b   : > { %s659_s29 = sand.u32 (!%p653_p9), 1, %s3065_s21   ;;  %p714_p10 = scmp.lt.s32.totalorder (!%p653_p9), %s3163_s24, 1 }
  0x2c   : > { %656 = sbr.rel (%p653_p9) target bundleno = 1793 (0x701), region = 138  ;;  %s2546_s14 = sshll.u32 (!%p653_p9), %s659_s29, 3 }
  0x2d   : > { %s2977_s15 = smul.u32 (!%p653_p9), 192, %s659_s29  ;;  %s661_s26 = scalar_lea.vmem (!%p653_p9), [#allocation5], %s2546_s14 }
  0x2e   : > { %s2978_s16 = smul.u32 (!%p653_p9), 6, %s659_s29  ;;  %p2548_p11 = scmp.ne.s32.totalorder (!%p653_p9), %s3163_s24, 0 }
  0x2f   : > { %s3261_s27 = scalar_lea.vmem (!%p653_p9), [#allocation6], %s2977_s15 }
  0x30   : > { %s3263_s23 = scalar_lea.vmem (!%p653_p9), [#allocation7], %s2978_s16 }
  0x33   : > { %s715_s25 = scalar_select %p714_p10, %s3163_s24, 1 }
  0x34   : > { %723 = sbr.rel (%p2548_p11) target bundleno = 59 (0x3b), region = 150  ;;  %vm724_vm0 = vcmask (!%p2548_p11), 27648   ;;  %vm728_vm1 = vcmask (!%p2548_p11), 68608   ;;  %v3075_v26 = vmov (!%p2548_p11), 0.0  }
  0x35   : > { %s2547_s17 = sshll.u32 %s715_s25, 2  ;;  %725 = vst.msk [vmem:[#allocation2] sm:$0xf] (!%p2548_p11), %vm724_vm0, %v3075_v26  ;;  %726 = vst.msk [vmem:[#allocation2 + $0x4] sm:$0xf] (!%p2548_p11), %vm724_vm0, %v3075_v26 }
  0x36   : > { %s717_s20 = scalar_lea.vmem %s3647_s1, %s2547_s17  ;;  %727 = vst.msk [vmem:[#allocation2 + $0x8] sm:$0xf] (!%p2548_p11), %vm724_vm0, %v3075_v26 }
  0x37   : > { %729 = vst.msk [vmem:[#allocation3] sm:$0xf] (!%p2548_p11), %vm728_vm1, %v3075_v26  ;;  %730 = vst.msk [vmem:[#allocation3 + $0x4] sm:$0xf] (!%p2548_p11), %vm728_vm1, %v3075_v26 }
  0x38   : > { %731 = vst.msk [vmem:[#allocation3 + $0x8] sm:$0xf] (!%p2548_p11), %vm728_vm1, %v3075_v26  ;;  %732 = vst.msk [vmem:[#allocation4] sm:$0xf] (!%p2548_p11), %vm728_vm1, %v3075_v26 }
  0x39   : > { %733 = vst.msk [vmem:[#allocation4 + $0x4] sm:$0xf] (!%p2548_p11), %vm728_vm1, %v3075_v26  ;;  %734 = vst.msk [vmem:[#allocation4 + $0x8] sm:$0xf] (!%p2548_p11), %vm728_vm1, %v3075_v26 }
  0x3b PF: > { %v737_v27 = vld [vmem:[%s717_s20] sm:$0xf]  ;;  %vm806_vm2 = vcmask 1043456   ;;  %v3076_v28 = vmov 0.0   ;;  %v3271_v30 = vld [vmem:[%s661_s26] sm:$0xff]   ;;  %vm3077_vm3 = vmmov 0  }
  0x3c   : > { %2760 = vmatprep.subr.bf16.mxu1 %v3076_v28  ;;  %2754 = vmatprep.subr.bf16.mxu0 %v3076_v28  ;;  %v3269_v29 = vsel %vm806_vm2, %v737_v27, 0  ;;  %v795_v31 = vld [vmem:[%s3650_s4] sm:$0x3]  ;;  %vm802_vm4 = vcmask 64512   ;;  %vm751_vm5 = vcmask 130048   ;;  %v3078_v34 = vmov 0  }
  0x3d   : > { %2761 = vmatpush3.bf16.msra.mxu1 %v3269_v29  ;;  %2762 = vmatprep.mubr.msk.bf16.mxu1 %vm3077_vm3, %v3076_v28  ;;  %v738_v32 = vld [vmem:[%s3648_s2] sm:$0x3]  ;;  %v2562_v37 = vld [vmem:[%s3649_s3 + $0x4] sm:$0xf]  ;;  %v3013_v40 = vld [vmem:[%s3261_s27] sm:$0xff]   ;;  %vm962_vm6 = vcmask 27648  }
  0x3e   : > { %2755 = vmatpush3.bf16.msra.mxu0 %v3271_v30  ;;  %2756 = vmatprep.mubr.msk.bf16.mxu0 %vm3077_vm3, %v3076_v28  ;;  %v796_v33 = vld [vmem:[%s3651_s5] sm:$0xf]  ;;  %v2565_v38 = vld [vmem:[%s3651_s5 + $0x4] sm:$0xf]  ;;  %v2599_v41 = vld [vmem:[%s3651_s5 + $0x8] sm:$0xf] }
  0x3f   : > { %2766 = vmatprep.subr.bf16.mxu0 %v3076_v28  ;;  %3010 = vset.pattern.permute.xlu0 %v3078_v34  ;;  %v851_v35 = vld [vmem:[%s3653_s7] sm:$0xf]  ;;  %v2568_v42 = vld [vmem:[%s3653_s7 + $0x4] sm:$0xf]  ;;  %v2602_v44 = vld [vmem:[%s3653_s7 + $0x8] sm:$0xf] }
  0x40   : > { %2763 = vmatmul.mubr.msk.bf16.vlgmr.msra.gmra.mrb[0].mxu1 %vm802_vm4, %v795_v31  ;;  %799 = vperm.xlu0 %3010, %v796_v33   ;;  %v739_v36 = vld [vmem:[%s3649_s3] sm:$0xf]  ;;  %v2596_v45 = vld [vmem:[%s3649_s3 + $0x8] sm:$0xf]  ;;  %v3016_v47 = vld [vmem:[%s3261_s27 + $0x18] sm:$0xff]   ;;  %vm1054_vm7 = vcmask 68608  }
  0x41   : > { %2757 = vmatmul.mubr.msk.bf16.vlgmr.msra.gmra.mrb[0].mxu0 %vm751_vm5, %v738_v32  ;;  %3011 = vset.pattern.permute.xlu1 %v3078_v34  ;;  %v850_v39 = vld [vmem:[%s3652_s6] sm:$0x3]  ;;  %v3015_v46 = vld [vmem:[%s3261_s27 + $0x10] sm:$0xff]   ;;  %v3017_v48 = vld [vmem:[%s3261_s27 + $0x20] sm:$0xff]   ;;  %p2629_p12 = scmp.ne.s32.totalorder %s3163_s24, 1 }
  0x42   : > { %2767 = vmatpush3.bf16.msra.mxu0 %v3269_v29  ;;  %2768 = vmatprep.mubr.msk.bf16.mxu0 %vm3077_vm3, %v3076_v28  ;;  %v3014_v43 = vld [vmem:[%s3261_s27 + $0x8] sm:$0xff]   ;;  %v3019_v50 = vld [vmem:[%s3261_s27 + $0x30] sm:$0xff]   ;;  %v3020_v51 = vld [vmem:[%s3261_s27 + $0x38] sm:$0xff]   ;;  %vm3080_vm8 = vmmov (!%p2629_p12), 0   ;;  %vm1833_vm9 = vcmask (!%p2629_p12), 31744   ;;  %vm2008_vm10 = vcmask (!%p2629_p12), 72704  }
  0x43   : > { %854 = vperm.xlu1 %3011, %v851_v35   ;;  %2778 = vmatprep.subr.bf16.mxu0 %v3076_v28  ;;  %v3018_v49 = vld [vmem:[%s3261_s27 + $0x28] sm:$0xff]   ;;  %v3368_v11 = vld [vmem:[%s3261_s27 + $0x40] sm:$0xff]   ;;  %v3395_v14 = vld [vmem:[%s3261_s27 + $0x50] sm:$0xff]  }
  0x44   : > { %742 = vperm.xlu0 %3010, %v739_v36   ;;  %2772 = vmatprep.subr.bf16.mxu1 %v3076_v28  ;;  %v2561_v9 = vld [vmem:[%s3648_s2 + $0x2] sm:$0x3]  ;;  %v3400_v15 = vld [vmem:[%s3261_s27 + $0x58] sm:$0xff]   ;;  %v3405_v16 = vld [vmem:[%s3261_s27 + $0x60] sm:$0xff]  }
  0x45   : > { %2774 = vmatprep.mubr.msk.bf16.mxu1 %vm3077_vm3, %v3076_v28  ;;  %v2567_v10 = vld [vmem:[%s3652_s6 + $0x2] sm:$0x3]  ;;  %v3415_v18 = vld [vmem:[%s3261_s27 + $0x70] sm:$0xff]   ;;  %v3420_v19 = vld [vmem:[%s3261_s27 + $0x78] sm:$0xff]  }
  0x46   : > { %v3374_v12 = vld [vmem:[%s3261_s27 + $0x48] sm:$0xff]   ;;  %v964_v22 = vld [vmem:[#allocation3] sm:$0xf] }
  0x47   : > { %1157 = vperm.xlu1 %3011, %v2565_v38   ;;  %v2564_v13 = vld [vmem:[%s3650_s4 + $0x2] sm:$0x3] }
  0x48   : > { %1105 = vperm.xlu0 %3010, %v2562_v37   ;;  %v3410_v17 = vld [vmem:[%s3261_s27 + $0x68] sm:$0xff]  }
  0x49   : > { %2769 = vmatmul.mubr.msk.bf16.vlgmr.msra.gmra.mrb[4].mxu0 %vm802_vm4, %v850_v39  ;;  %v920_v20 = vld [vmem:[#allocation2] sm:$0xf] }
  0x4a   : > { %2779 = vmatpush3.bf16.msra.mxu0 %v3013_v40  ;;  %2794 = vmatprep.mubr.msk.bf16.mxu0 %vm3077_vm3, %v3076_v28 }
  0x4b   : > { %1209 = vperm.xlu1 %3011, %v2568_v42   ;;  %2780 = vmatprep.subr.bf16.mxu0 %v3076_v28 }
  0x4c   : > { %1515 = vperm.xlu0 %3010, %v2599_v41  }
  0x4e   : > { %2781 = vmatpush3.bf16.msra.mxu0 %v3014_v43 }
  0x4f   : > { %1463 = vperm.xlu1 %3011, %v2596_v45   ;;  %2782 = vmatprep.subr.bf16.mxu0 %v3076_v28 }
  0x50   : > { %1567 = vperm.xlu0 %3010, %v2602_v44  }
  0x52   : > { %2783 = vmatpush3.bf16.msra.mxu0 %v3015_v46 }
  0x53   : > { %2784 = vmatprep.subr.bf16.mxu0 %v3076_v28 }
  0x56   : > { %2785 = vmatpush3.bf16.msra.mxu0 %v3016_v47 }
  0x57   : > { %2786 = vmatprep.subr.bf16.mxu0 %v3076_v28 }
  0x5a   : > { %2787 = vmatpush3.bf16.msra.mxu0 %v3017_v48 }
  0x5b   : > { %2788 = vmatprep.subr.bf16.mxu0 %v3076_v28 }
  0x5e   : > { %2789 = vmatpush3.bf16.msra.mxu0 %v3018_v49 }
  0x5f   : > { %2790 = vmatprep.subr.bf16.mxu0 %v3076_v28 }
  0x62   : > { %2791 = vmatpush3.bf16.msra.mxu0 %v3019_v50 }
  0x63   : > { %2792 = vmatprep.subr.bf16.mxu0 %v3076_v28 }
  0x66   : > { %2793 = vmatpush3.bf16.msra.mxu0 %v3020_v51 }
  0x67   : > { %2818 = vmatprep.subr.bf16.mxu0 %v3076_v28 }
  0xbf   : > { %v800_v52 = vpop.permute.xlu0 %799 }
  0xc2   : > { %v855_v1 = vpop.permute.xlu1 %854 }
  0xc3   : > { %v743_v63 = vpop.permute.xlu0 %742 }
  0xc6   : > { %v1158_v37 = vpop.permute.xlu1 %1157 }
 0x113   : > { %v844_v53 = vpop.f32.mrb[0].mxu1 }
 0x114   : > { %v845_v54 = vadd.f32 %v844_v53, %v800_v52  ;;  %v789_v55 = vpop.f32.mrb[0].mxu0  ;;  %v2764_v56 = vpop.f32.mrb[1].mxu1  ;;  %v2601_v53 = vld [vmem:[%s3652_s6 + $0x4] sm:$0x3] }
 0x115   : > { %v847_v57 = vpop.f32.mrb[2].mxu1  ;;  %v2758_v58 = vpop.f32.mrb[1].mxu0  ;;  %v790_v0 = vadd.f32 %v789_v55, %v743_v63  ;;  %v3449_v56 = vld [vmem:[%s3261_s27 + $0x88] sm:$0xff]  }
 0x116   : > { %v903_v59 = vpack.c.bf16 %v845_v54, %v845_v54  ;;  %v2765_v60 = vpop.f32.mrb[3].mxu1  ;;  %v792_v61 = vpop.f32.mrb[2].mxu0  ;;  %v3444_v54 = vld [vmem:[%s3261_s27 + $0x80] sm:$0xff]  }
 0x117   : > { %v2759_v62 = vpop.f32.mrb[3].mxu0  ;;  %v902_v3 = vpack.c.bf16 %v790_v0, %v790_v0  ;;  %v1106_v63 = vpop.permute.xlu0 %1105 }
 0x118   : > { %2773 = vmatpush3.bf16.xpose.msra.mxu1 %v903_v59  ;;  %v3456_v62 = vld [vmem:[%s3261_s27 + $0x90] sm:$0xff]  }
 0x119   : > { %2798 = vmatprep.subr.bf16.mxu1 %v3076_v28 }
 0x11c   : > { %v894_v2 = vpop.f32.mrb[4].mxu0 }
 0x11d   : > { %v895_v4 = vadd.f32 %v894_v2, %v855_v1  ;;  %v2770_v5 = vpop.f32.mrb[5].mxu0  ;;  %v2598_v2 = vld [vmem:[%s3650_s4 + $0x4] sm:$0x3] }
 0x11e   : > { %v897_v6 = vpop.f32.mrb[6].mxu0  ;;  %v3506_v5 = vld [vmem:[%s3261_s27 + $0xb0] sm:$0xff]  }
 0x11f   : > { %v900_v7 = vpack.c.bf16 %v895_v4, %v895_v4  ;;  %2775 = vmatmul.mubr.bf16.vlgmr.msra.gmra.mrb[4].mxu1 %v902_v3  ;;  %v2771_v8 = vpop.f32.mrb[7].mxu0  ;;  %v3501_v4 = vld [vmem:[%s3261_s27 + $0xa8] sm:$0xff]   ;;  %v3511_v6 = vld [vmem:[%s3261_s27 + $0xb8] sm:$0xff]  }
 0x120   : > { %2799 = vmatpush3.bf16.msra.mxu1 %v3013_v40  ;;  %2814 = vmatprep.mubr.msk.bf16.mxu1 %vm3077_vm3, %v3076_v28  ;;  %v1210_v40 = vpop.permute.xlu1 %1209 }
 0x121   : > { %901 = vst [vmem:[%s3263_s23] sm:$0x3] %v900_v7  ;;  %2795 = vmatmul.mubr.bf16.vlgmr.msra.gmra.mrb[8].mxu0 %v900_v7  ;;  %2800 = vmatprep.subr.bf16.mxu1 %v3076_v28  ;;  %v1322_v7 = vld [vmem:[#allocation3 + $0x4] sm:$0xf] }
 0x122   : > { %2819 = vmatpush3.bf16.msra.mxu0 %v3271_v30  ;;  %2820 = vmatprep.mubr.msk.bf16.mxu0 %vm3077_vm3, %v3076_v28 }
 0x123   : > { %2830 = vmatprep.subr.bf16.mxu0 %v3076_v28 }
 0x124   : > { %2801 = vmatpush3.bf16.msra.mxu1 %v3014_v43 }
 0x125   : > { %2802 = vmatprep.subr.bf16.mxu1 %v3076_v28 }
 0x128   : > { %2803 = vmatpush3.bf16.msra.mxu1 %v3015_v46 }
 0x129   : > { %2821 = vmatmul.mubr.msk.bf16.vlgmr.msra.gmra.mrb[12].mxu0 %vm751_vm5, %v2561_v9  ;;  %2804 = vmatprep.subr.bf16.mxu1 %v3076_v28 }
 0x12a   : > { %2831 = vmatpush3.bf16.msra.mxu0 %v3269_v29  ;;  %2832 = vmatprep.mubr.msk.bf16.mxu0 %vm3077_vm3, %v3076_v28 }
 0x12b   : > { %2842 = vmatprep.subr.bf16.mxu0 %v3076_v28 }
 0x12c   : > { %2805 = vmatpush3.bf16.msra.mxu1 %v3016_v47  ;;  %v2595_v47 = vld [vmem:[%s3648_s2 + $0x4] sm:$0x3] }
 0x12d   : > { %2806 = vmatprep.subr.bf16.mxu1 %v3076_v28 }
 0x130   : > { %2807 = vmatpush3.bf16.msra.mxu1 %v3017_v48  ;;  %v1056_v48 = vld [vmem:[#allocation4] sm:$0xf] }
 0x131   : > { %2833 = vmatmul.mubr.msk.bf16.vlgmr.msra.gmra.mrb[16].mxu0 %vm802_vm4, %v2567_v10  ;;  %2808 = vmatprep.subr.bf16.mxu1 %v3076_v28 }
 0x132   : > { %2843 = vmatpush3.bf16.msra.mxu0 %v3368_v11  ;;  %2858 = vmatprep.mubr.msk.bf16.mxu0 %vm3077_vm3, %v3076_v28 }
 0x133   : > { %2844 = vmatprep.subr.bf16.mxu0 %v3076_v28 }
 0x134   : > { %2809 = vmatpush3.bf16.msra.mxu1 %v3018_v49 }
 0x135   : > { %2810 = vmatprep.subr.bf16.mxu1 %v3076_v28 }
 0x136   : > { %2845 = vmatpush3.bf16.msra.mxu0 %v3374_v12 }
 0x137   : > { %2846 = vmatprep.subr.bf16.mxu0 %v3076_v28 }
 0x138   : > { %2811 = vmatpush3.bf16.msra.mxu1 %v3019_v50 }
 0x139   : > { %2812 = vmatprep.subr.bf16.mxu1 %v3076_v28 }
 0x13a   : > { %2847 = vmatpush3.bf16.msra.mxu0 %v3395_v14 }
 0x13b   : > { %2848 = vmatprep.subr.bf16.mxu0 %v3076_v28 }
 0x13c   : > { %2813 = vmatpush3.bf16.msra.mxu1 %v3020_v51 }
 0x13d   : > { %2824 = vmatprep.subr.bf16.mxu1 %v3076_v28 }
 0x13e   : > { %2849 = vmatpush3.bf16.msra.mxu0 %v3400_v15 }
 0x13f   : > { %2815 = vmatmul.mubr.bf16.vlgmr.msra.gmra.mrb[8].mxu1 %v902_v3  ;;  %2850 = vmatprep.subr.bf16.mxu0 %v3076_v28  ;;  %v3491_v3 = vld [vmem:[%s3261_s27 + $0x98] sm:$0xff]  }
 0x140   : > { %2825 = vmatpush3.bf16.msra.mxu1 %v3269_v29  ;;  %2826 = vmatprep.mubr.msk.bf16.mxu1 %vm3077_vm3, %v3076_v28 }
 0x141   : > { %2836 = vmatprep.subr.bf16.mxu1 %v3076_v28 }
 0x142   : > { %2851 = vmatpush3.bf16.msra.mxu0 %v3405_v16 }
 0x143   : > { %2852 = vmatprep.subr.bf16.mxu0 %v3076_v28 }
 0x146   : > { %2853 = vmatpush3.bf16.msra.mxu0 %v3410_v17 }
 0x147   : > { %2827 = vmatmul.mubr.msk.bf16.vlgmr.msra.gmra.mrb[12].mxu1 %vm802_vm4, %v2564_v13  ;;  %2854 = vmatprep.subr.bf16.mxu0 %v3076_v28 }
 0x148   : > { %2838 = vmatprep.mubr.msk.bf16.mxu1 %vm3077_vm3, %v3076_v28 }
 0x14a   : > { %2855 = vmatpush3.bf16.msra.mxu0 %v3415_v18 }
 0x14b   : > { %2856 = vmatprep.subr.bf16.mxu0 %v3076_v28 }
 0x14e   : > { %2857 = vmatpush3.bf16.msra.mxu0 %v3420_v19 }
 0x14f   : > { %2882 = vmatprep.subr.bf16.mxu0 %v3076_v28 }
 0x1f2   : > { %v955_v21 = vpop.f32.mrb[4].mxu1 }
 0x1f3   : > { %v961_v23 = vadd.f32 %v955_v21, %v920_v20  ;;  %v2776_v24 = vpop.f32.mrb[5].mxu1 }
 0x1f4   : > { %v958_v25 = vpop.f32.mrb[6].mxu1  ;;  %v1047_v26 = vpop.f32.mrb[8].mxu0 }
 0x1f5   : > { %963 = vst.msk [vmem:[#allocation2] sm:$0xf] %vm962_vm6, %v961_v23  ;;  %v2777_v27 = vpop.f32.mrb[7].mxu1  ;;  %v1053_v31 = vadd.f32 %v1047_v26, %v964_v22  ;;  %v2796_v32 = vpop.f32.mrb[9].mxu0  ;;  %v1278_v25 = vld [vmem:[#allocation2 + $0x4] sm:$0xf] }
 0x1f6   : > { %v1050_v33 = vpop.f32.mrb[10].mxu0 }
 0x1f7   : > { %1055 = vst.msk [vmem:[#allocation3] sm:$0xf] %vm1054_vm7, %v1053_v31  ;;  %v2797_v34 = vpop.f32.mrb[11].mxu0 }
 0x1f8   : > { %v1414_v34 = vld [vmem:[#allocation4 + $0x4] sm:$0xf] }
 0x1fc   : > { %v1145_v35 = vpop.f32.mrb[12].mxu0 }
 0x1fd   : > { %v2822_v36 = vpop.f32.mrb[13].mxu0  ;;  %v1146_v0 = vadd.f32 %v1145_v35, %v1106_v63 }
 0x1fe   : > { %v1148_v38 = vpop.f32.mrb[14].mxu0 }
 0x1ff   : > { %v2823_v39 = vpop.f32.mrb[15].mxu0  ;;  %v1258_v1 = vpack.c.bf16 %v1146_v0, %v1146_v0 }
 0x204   : > { %v1249_v41 = vpop.f32.mrb[16].mxu0 }
 0x205   : > { %v1250_v42 = vadd.f32 %v1249_v41, %v1210_v40  ;;  %v2834_v43 = vpop.f32.mrb[17].mxu0 }
 0x206   : > { %v1252_v44 = vpop.f32.mrb[18].mxu0 }
 0x207   : > { %v1255_v45 = vpack.c.bf16 %v1250_v42, %v1250_v42  ;;  %v2835_v46 = vpop.f32.mrb[19].mxu0 }
 0x208   : > { %v1464_v46 = vpop.permute.xlu1 %1463 }
 0x209   : > { %2570 = vst [vmem:[%s3263_s23 + $0x2] sm:$0x3] %v1255_v45  ;;  %2859 = vmatmul.mubr.bf16.vlgmr.msra.gmra.mrb[20].mxu0 %v1255_v45 }
 0x20a   : > { %2883 = vmatpush3.bf16.msra.mxu0 %v3271_v30  ;;  %2884 = vmatprep.mubr.msk.bf16.mxu0 %vm3077_vm3, %v3076_v28 }
 0x20b   : > { %2894 = vmatprep.subr.bf16.mxu0 %v3076_v28 }
 0x211   : > { %2885 = vmatmul.mubr.msk.bf16.vlgmr.msra.gmra.mrb[24].mxu0 %vm751_vm5, %v2595_v47 }
 0x212   : > { %v1091_v49 = vpop.f32.mrb[8].mxu1  ;;  %2895 = vmatpush3.bf16.msra.mxu0 %v3269_v29  ;;  %2896 = vmatprep.mubr.msk.bf16.mxu0 %vm3077_vm3, %v3076_v28 }
 0x213   : > { %v1097_v30 = vadd.f32 %v1091_v49, %v1056_v48  ;;  %v2816_v50 = vpop.f32.mrb[9].mxu1  ;;  %2906 = vmatprep.subr.bf16.mxu0 %v3076_v28  ;;  %v1680_v49 = vld [vmem:[#allocation3 + $0x8] sm:$0xf] }
 0x214   : > { %v1094_v51 = vpop.f32.mrb[10].mxu1 }
 0x215   : > { %1098 = vst.msk [vmem:[#allocation4] sm:$0xf] %vm1054_vm7, %v1097_v30  ;;  %v2817_v52 = vpop.f32.mrb[11].mxu1 }
 0x219   : > { %2897 = vmatmul.mubr.msk.bf16.vlgmr.msra.gmra.mrb[28].mxu0 %vm802_vm4, %v2601_v53 }
 0x21a   : > { %v1197_v55 = vpop.f32.mrb[12].mxu1  ;;  %2907 = vmatpush3.bf16.msra.mxu0 %v3444_v54  ;;  %2922 = vmatprep.mubr.msk.bf16.mxu0 %vm3077_vm3, %v3076_v28 }
 0x21b   : > { %v1198_v57 = vadd.f32 %v1197_v55, %v1158_v37  ;;  %v2828_v58 = vpop.f32.mrb[13].mxu1  ;;  %2908 = vmatprep.subr.bf16.mxu0 %v3076_v28 }
 0x21c   : > { %v1200_v59 = vpop.f32.mrb[14].mxu1 }
 0x21d   : > { %v1259_v60 = vpack.c.bf16 %v1198_v57, %v1198_v57  ;;  %v2829_v61 = vpop.f32.mrb[15].mxu1 }
 0x21e   : > { %2909 = vmatpush3.bf16.msra.mxu0 %v3449_v56 }
 0x21f   : > { %2837 = vmatpush3.bf16.xpose.msra.mxu1 %v1259_v60  ;;  %2910 = vmatprep.subr.bf16.mxu0 %v3076_v28 }
 0x220   : > { %2862 = vmatprep.subr.bf16.mxu1 %v3076_v28 }
 0x222   : > { %2911 = vmatpush3.bf16.msra.mxu0 %v3456_v62 }
 0x223   : > { %2912 = vmatprep.subr.bf16.mxu0 %v3076_v28 }
 0x226   : > { %2839 = vmatmul.mubr.bf16.vlgmr.msra.gmra.mrb[16].mxu1 %v1258_v1  ;;  %2913 = vmatpush3.bf16.msra.mxu0 %v3491_v3 }
 0x227   : > { %2863 = vmatpush3.bf16.msra.mxu1 %v3368_v11  ;;  %2878 = vmatprep.mubr.msk.bf16.mxu1 %vm3077_vm3, %v3076_v28 }
 0x228   : > { %2864 = vmatprep.subr.bf16.mxu1 %v3076_v28  ;;  %2914 = vmatprep.subr.bf16.mxu0 %v3076_v28 }
 0x22b   : > { %2865 = vmatpush3.bf16.msra.mxu1 %v3374_v12 }
 0x22c   : > { %2866 = vmatprep.subr.bf16.mxu1 %v3076_v28 }
 0x22f   : > { %2867 = vmatpush3.bf16.msra.mxu1 %v3395_v14 }
 0x230   : > { %2868 = vmatprep.subr.bf16.mxu1 %v3076_v28 }
 0x233   : > { %2869 = vmatpush3.bf16.msra.mxu1 %v3400_v15  ;;  %v1516_v15 = vpop.permute.xlu0 %1515 }
 0x234   : > { %2870 = vmatprep.subr.bf16.mxu1 %v3076_v28 }
 0x237   : > { %2871 = vmatpush3.bf16.msra.mxu1 %v3405_v16 }
 0x238   : > { %2872 = vmatprep.subr.bf16.mxu1 %v3076_v28 }
 0x23b   : > { %2873 = vmatpush3.bf16.msra.mxu1 %v3410_v17 }
 0x23c   : > { %2874 = vmatprep.subr.bf16.mxu1 %v3076_v28 }
 0x23f   : > { %2875 = vmatpush3.bf16.msra.mxu1 %v3415_v18  ;;  %v1568_v18 = vpop.permute.xlu0 %1567 }
 0x240   : > { %2876 = vmatprep.subr.bf16.mxu1 %v3076_v28 }
 0x243   : > { %2877 = vmatpush3.bf16.msra.mxu1 %v3420_v19 }
 0x244   : > { %2888 = vmatprep.subr.bf16.mxu1 %v3076_v28 }
 0x246   : > { %2879 = vmatmul.mubr.bf16.vlgmr.msra.gmra.mrb[20].mxu1 %v1258_v1  ;;  %v1819_v1 = vld [vmem:[#allocation2] sm:$0xf] (!%p2629_p12) }
 0x247   : > { %2889 = vmatpush3.bf16.msra.mxu1 %v3269_v29  ;;  %2890 = vmatprep.mubr.msk.bf16.mxu1 %vm3077_vm3, %v3076_v28  ;;  %v3496_v29 = vld [vmem:[%s3261_s27 + $0xa0] sm:$0xff]  }
 0x248   : > { %2900 = vmatprep.subr.bf16.mxu1 %v3076_v28  ;;  %2915 = vmatpush3.bf16.msra.mxu0 %v3496_v29 }
 0x249   : > { %2916 = vmatprep.subr.bf16.mxu0 %v3076_v28 }
 0x24c   : > { %2917 = vmatpush3.bf16.msra.mxu0 %v3501_v4 }
 0x24d   : > { %2918 = vmatprep.subr.bf16.mxu0 %v3076_v28 }
 0x24e   : > { %2891 = vmatmul.mubr.msk.bf16.vlgmr.msra.gmra.mrb[24].mxu1 %vm802_vm4, %v2598_v2 }
 0x24f   : > { %2902 = vmatprep.mubr.msk.bf16.mxu1 %vm3077_vm3, %v3076_v28 }
 0x250   : > { %2919 = vmatpush3.bf16.msra.mxu0 %v3506_v5 }
 0x251   : > { %2920 = vmatprep.subr.bf16.mxu0 %v3076_v28 }
 0x254   : > { %2921 = vmatpush3.bf16.msra.mxu0 %v3511_v6 }
 0x2dc   : > { %v1405_v8 = vpop.f32.mrb[20].mxu0 }
 0x2dd   : > { %v1411_v9 = vadd.f32 %v1405_v8, %v1322_v7  ;;  %v2860_v10 = vpop.f32.mrb[21].mxu0 }
 0x2de   : > { %v1408_v11 = vpop.f32.mrb[22].mxu0 }
 0x2df   : > { %1412 = vst.msk [vmem:[#allocation3 + $0x4] sm:$0xf] %vm1054_vm7, %v1411_v9  ;;  %v2861_v12 = vpop.f32.mrb[23].mxu0 }
 0x2e4   : > { %v1503_v13 = vpop.f32.mrb[24].mxu0 }
 0x2e5   : > { %v2886_v14 = vpop.f32.mrb[25].mxu0  ;;  %v1504_v47 = vadd.f32 %v1503_v13, %v1464_v46 }
 0x2e6   : > { %v1506_v16 = vpop.f32.mrb[26].mxu0 }
 0x2e7   : > { %v2887_v17 = vpop.f32.mrb[27].mxu0  ;;  %v1616_v48 = vpack.c.bf16 %v1504_v47, %v1504_v47 }
 0x2ec   : > { %v1607_v19 = vpop.f32.mrb[28].mxu0 }
 0x2ed   : > { %v1608_v20 = vadd.f32 %v1607_v19, %v1568_v18  ;;  %v2898_v21 = vpop.f32.mrb[29].mxu0 }
 0x2ee   : > { %v1610_v22 = vpop.f32.mrb[30].mxu0  ;;  %v3079_v21 = vmov (!%p2629_p12), 0.0  }
 0x2ef   : > { %v1613_v23 = vpack.c.bf16 %v1608_v20, %v1608_v20  ;;  %v2899_v24 = vpop.f32.mrb[31].mxu0  ;;  %2946 = vmatprep.subr.mxu0 (!%p2629_p12), %v3079_v21  ;;  %v1831_v22 = vld [vmem:[#allocation3] sm:$0xf] (!%p2629_p12) }
 0x2f1   : > { %2604 = vst [vmem:[%s3263_s23 + $0x4] sm:$0x3] %v1613_v23  ;;  %2923 = vmatmul.mubr.bf16.vlgmr.msra.gmra.mrb[32].mxu0 %v1613_v23 }
 0x2f2   : > { %2947 = vmatpush3.msk.msra.mxu0 (!%p2629_p12), %vm806_vm2, %v1831_v22  ;;  %2948 = vmatprep.mubr.msk.f32.mxu0 (!%p2629_p12), %vm3080_vm8, %v3079_v21 }
 0x2f3   : > { %2956 = vmatprep.subr.mxu0 (!%p2629_p12), %v3079_v21 }
 0x2f9   : > { %v1313_v26 = vpop.f32.mrb[16].mxu1 }
 0x2fa   : > { %v1319_v27 = vadd.f32 %v1313_v26, %v1278_v25  ;;  %v2840_v31 = vpop.f32.mrb[17].mxu1 }
 0x2fb   : > { %v1316_v32 = vpop.f32.mrb[18].mxu1  ;;  %v2023_v31 = vld [vmem:[#allocation3 + $0x4] sm:$0xf] (!%p2629_p12) }
 0x2fc   : > { %1320 = vst.msk [vmem:[#allocation2 + $0x4] sm:$0xf] %vm962_vm6, %v1319_v27  ;;  %v2841_v33 = vpop.f32.mrb[19].mxu1 }
 0x319   : > { %v1449_v35 = vpop.f32.mrb[20].mxu1 }
 0x31a   : > { %v1455_v36 = vadd.f32 %v1449_v35, %v1414_v34  ;;  %v2880_v37 = vpop.f32.mrb[21].mxu1 }
 0x31b   : > { %v1452_v38 = vpop.f32.mrb[22].mxu1  ;;  %v1910_v37 = vld [vmem:[%s3654_s8] sm:$0xff] (!%p2629_p12) }
 0x31c   : > { %1456 = vst.msk [vmem:[#allocation4 + $0x4] sm:$0xf] %vm1054_vm7, %v1455_v36  ;;  %v2881_v39 = vpop.f32.mrb[23].mxu1  ;;  %v1913_v38 = vld [vmem:[%s3655_s9 + $0x8] sm:$0xff] (!%p2629_p12) }
 0x31d   : > { %v3081_v39 = vmov (!%p2629_p12), 0  }
 0x31e   : > { %3038 = vset.pattern.permute.xlu1 (!%p2629_p12), %v3081_v39  ;;  %3037 = vset.pattern.permute.xlu0 (!%p2629_p12), %v3081_v39 }
 0x321   : > { %v1555_v40 = vpop.f32.mrb[24].mxu1 }
 0x322   : > { %v1556_v41 = vadd.f32 %v1555_v40, %v1516_v15  ;;  %v2892_v42 = vpop.f32.mrb[25].mxu1  ;;  %v1912_v40 = vld [vmem:[%s3655_s9] sm:$0xff] (!%p2629_p12) }
 0x323   : > { %v1558_v43 = vpop.f32.mrb[26].mxu1  ;;  %v2640_v42 = vld [vmem:[%s3655_s9 + $0x18] sm:$0xff] (!%p2629_p12) }
 0x324   : > { %v1617_v44 = vpack.c.bf16 %v1556_v41, %v1556_v41  ;;  %v2893_v45 = vpop.f32.mrb[27].mxu1  ;;  %v2639_v41 = vld [vmem:[%s3655_s9 + $0x10] sm:$0xff] (!%p2629_p12)  ;;  %v2650_v43 = vld [vmem:[%s3655_s9 + $0x20] sm:$0xff] (!%p2629_p12) }
 0x325   : > { %v1832_v45 = vld [vmem:[#allocation4] sm:$0xf] (!%p2629_p12) }
 0x326   : > { %2901 = vmatpush3.bf16.xpose.msra.mxu1 %v1617_v44  ;;  %v2651_v44 = vld [vmem:[%s3655_s9 + $0x28] sm:$0xff] (!%p2629_p12) }
 0x327   : > { %2926 = vmatprep.subr.bf16.mxu1 %v3076_v28 }
 0x32d   : > { %2903 = vmatmul.mubr.bf16.vlgmr.msra.gmra.mrb[28].mxu1 %v1616_v48 }
 0x32e   : > { %2927 = vmatpush3.bf16.msra.mxu1 %v3444_v54  ;;  %2942 = vmatprep.mubr.msk.bf16.mxu1 %vm3077_vm3, %v3076_v28  ;;  %v1636_v54 = vld [vmem:[#allocation2 + $0x8] sm:$0xf] }
 0x32f   : > { %2928 = vmatprep.subr.bf16.mxu1 %v3076_v28 }
 0x332   : > { %2929 = vmatpush3.bf16.msra.mxu1 %v3449_v56 }
 0x333   : > { %2930 = vmatprep.subr.bf16.mxu1 %v3076_v28 }
 0x336   : > { %2931 = vmatpush3.bf16.msra.mxu1 %v3456_v62 }
 0x337   : > { %2932 = vmatprep.subr.bf16.mxu1 %v3076_v28 }
 0x33a   : > { %2933 = vmatpush3.bf16.msra.mxu1 %v3491_v3  ;;  %v2011_v3 = vld [vmem:[#allocation2 + $0x4] sm:$0xf] (!%p2629_p12) }
 0x33b   : > { %2934 = vmatprep.subr.bf16.mxu1 %v3076_v28 }
 0x33e   : > { %2935 = vmatpush3.bf16.msra.mxu1 %v3496_v29  ;;  %v1820_v29 = vsel (!%p2629_p12), %vm962_vm6, %v1819_v1, -inf }
 0x33f   : > { %2936 = vmatprep.subr.bf16.mxu1 %v3076_v28  ;;  %1821 = vmax.xlane.f32.xlu0 (!%p2629_p12), %v1820_v29 }
 0x342   : > { %2937 = vmatpush3.bf16.msra.mxu1 %v3501_v4 }
 0x343   : > { %2938 = vmatprep.subr.bf16.mxu1 %v3076_v28 }
 0x346   : > { %2939 = vmatpush3.bf16.msra.mxu1 %v3506_v5  ;;  %v2012_v5 = vsel (!%p2629_p12), %vm962_vm6, %v2011_v3, -inf }
 0x347   : > { %2940 = vmatprep.subr.bf16.mxu1 %v3076_v28  ;;  %v1772_v28 = vld [vmem:[#allocation4 + $0x8] sm:$0xf]  ;;  %2013 = vmax.xlane.f32.xlu0 (!%p2629_p12), %v2012_v5 }
 0x34a   : > { %2941 = vmatpush3.bf16.msra.mxu1 %v3511_v6 }
 0x34d   : > { %2943 = vmatmul.mubr.bf16.vlgmr.msra.gmra.mrb[32].mxu1 %v1616_v48 }
 0x34e   : > { %2953 = vmatprep.mubr.msk.f32.mxu1 (!%p2629_p12), %vm1833_vm9, %v1910_v37 }
 0x3c4   : > { %v1763_v30 = vpop.f32.mrb[32].mxu0 }
 0x3c5   : > { %v1769_v50 = vadd.f32 %v1763_v30, %v1680_v49  ;;  %v2924_v51 = vpop.f32.mrb[33].mxu0  ;;  %v1911_v49 = vld [vmem:[%s3654_s8 + $0x8] sm:$0xff] (!%p2629_p12)  ;;  %v2024_v30 = vld [vmem:[#allocation4 + $0x4] sm:$0xf] (!%p2629_p12) }
 0x3c6   : > { %v1766_v52 = vpop.f32.mrb[34].mxu0 }
 0x3c7   : > { %1770 = vst.msk [vmem:[#allocation3 + $0x8] sm:$0xf] %vm1054_vm7, %v1769_v50  ;;  %v2925_v53 = vpop.f32.mrb[35].mxu0  ;;  %v2637_v50 = vld [vmem:[%s3654_s8 + $0x10] sm:$0xff] (!%p2629_p12) }
 0x3cc   : > { %v1822_v6 = vpop.xlane.xlu0 (!%p2629_p12), %1821 }
 0x3cd   : > { %v1823_v8 = vsub.f32 (!%p2629_p12), %v1819_v1, %v1822_v6 }
 0x3ce   : > { %v2216_v34 = vld [vmem:[#allocation3 + $0x8] sm:$0xf] (!%p2629_p12) }
 0x3cf   : > { %v1824_v10 = vmul.f32 (!%p2629_p12), 1.442695, %v1823_v8 }
 0x3d1   : > { %3039 = vpow2.f32 (!%p2629_p12), %v1824_v10 }
 0x3d4   : > { %v2014_v12 = vpop.xlane.xlu0 (!%p2629_p12), %2013 }
 0x3d5   : > { %v2015_v13 = vsub.f32 (!%p2629_p12), %v2011_v3, %v2014_v12 }
 0x3d7   : > { %v2016_v14 = vmul.f32 (!%p2629_p12), 1.442695, %v2015_v13 }
 0x3db   : > { %v3040_v15 = vpop.eup (!%p2629_p12), %3039 }
 0x3dc   : > { %v1826_v17 = vsel (!%p2629_p12), %vm962_vm6, %v3040_v15, 0.0 }
 0x400   : > { %v1671_v55 = vpop.f32.mrb[28].mxu1 }
 0x401   : > { %v1677_v56 = vadd.f32 %v1671_v55, %v1636_v54  ;;  %v2904_v57 = vpop.f32.mrb[29].mxu1  ;;  %v2638_v55 = vld [vmem:[%s3654_s8 + $0x18] sm:$0xff] (!%p2629_p12) }
 0x402   : > { %v1674_v58 = vpop.f32.mrb[30].mxu1 }
 0x403   : > { %1678 = vst.msk [vmem:[#allocation2 + $0x8] sm:$0xf] %vm962_vm6, %v1677_v56  ;;  %v2905_v59 = vpop.f32.mrb[31].mxu1  ;;  %v2648_v56 = vld [vmem:[%s3654_s8 + $0x20] sm:$0xff] (!%p2629_p12) }
 0x40a   : > { %v2204_v2 = vld [vmem:[#allocation2 + $0x8] sm:$0xf] (!%p2629_p12) }
 0x40b   : > { %v2205_v4 = vsel (!%p2629_p12), %vm962_vm6, %v2204_v2, -inf }
 0x40c   : > { %2206 = vmax.xlane.f32.xlu1 (!%p2629_p12), %v2205_v4 }
 0x410   : > { %1827 = vadd.xlane.f32.xlu1 (!%p2629_p12), %v1826_v17 }
 0x41d   : > { %1818 = sbr.rel (%p2629_p12) target bundleno = 1786 (0x6fa), region = 154 }
 0x420   : > { %v1807_v60 = vpop.f32.mrb[32].mxu1 }
 0x421   : > { %v1813_v61 = vadd.f32 %v1807_v60, %v1772_v28  ;;  %v2944_v62 = vpop.f32.mrb[33].mxu1  ;;  %v2649_v28 = vld [vmem:[%s3654_s8 + $0x28] sm:$0xff] (!%p2629_p12) }
 0x422   : > { %v1810_v63 = vpop.f32.mrb[34].mxu1 }
 0x423   : > { %1814 = vst.msk [vmem:[#allocation4 + $0x8] sm:$0xf] %vm1054_vm7, %v1813_v61  ;;  %v2945_v0 = vpop.f32.mrb[35].mxu1 }
 0x42a   : > { %v2217_v54 = vld [vmem:[#allocation4 + $0x8] sm:$0xf] }
 0x499   : > { %v2207_v7 = vpop.xlane.xlu1 %2206 }
 0x49a   : > { %v2208_v9 = vsub.f32 %v2204_v2, %v2207_v7 }
 0x49c   : > { %v2209_v11 = vmul.f32 1.442695, %v2208_v9 }
 0x49d   : > { %v1828_v23 = vpop.xlane.xlu1 %1827 }
 0x49e   : > { %3041 = vpow2.f32 %v2209_v11 }
 0x49f   : > { %3043 = vpow2.f32 %v2016_v14 }
 0x4a0   : > { %3045 = vrcp.f32 %v1828_v23 }
 0x4a8   : > { %v3042_v16 = vpop.eup %3041 }
 0x4a9   : > { %v2211_v18 = vsel %vm962_vm6, %v3042_v16, 0.0  ;;  %v3044_v19 = vpop.eup %3043 }
 0x4aa   : > { %v2018_v20 = vsel %vm962_vm6, %v3044_v19, 0.0  ;;  %2212 = vadd.xlane.f32.xlu1 %v2211_v18  ;;  %v3046_v26 = vpop.eup %3045 }
 0x4ab   : > { %2019 = vadd.xlane.f32.xlu0 %v2018_v20  ;;  %v1830_v27 = vmul.f32 %v3046_v26, %v3040_v15 }
 0x4ad   : > { %2949 = vmatmul.mubr.msk.f32.vlgmr.msra.gmra.mrb[0].mxu0 %vm1833_vm9, %v1830_v27 }
 0x4ae   : > { %2957 = vmatpush3.msk.msra.mxu0 %vm806_vm2, %v2023_v31  ;;  %2958 = vmatprep.mubr.msk.f32.mxu0 %vm3080_vm8, %v3079_v21 }
 0x4af   : > { %2966 = vmatprep.subr.mxu0 %v3079_v21 }
 0x4bb   : > { %1921 = vperm.xlu1 %3038, %v1913_v38  }
 0x4bf   : > { %2109 = vperm.xlu1 %3038, %v2639_v41  }
 0x4c1   : > { %1916 = vperm.xlu0 %3037, %v1912_v40  }
 0x4c3   : > { %2114 = vperm.xlu1 %3038, %v2640_v42  }
 0x4c7   : > { %2302 = vperm.xlu1 %3038, %v2650_v43  }
 0x4cb   : > { %2307 = vperm.xlu1 %3038, %v2651_v44  }
 0x537   : > { %v2213_v25 = vpop.xlane.xlu1 %2212 }
 0x538   : > { %v2020_v24 = vpop.xlane.xlu0 %2019 }
 0x539   : > { %3047 = vrcp.f32 %v2020_v24 }
 0x53a   : > { %3049 = vrcp.f32 %v2213_v25 }
 0x53b   : > { %v1922_v60 = vpop.permute.xlu1 %1921 }
 0x53f   : > { %v2110_v61 = vpop.permute.xlu1 %2109 }
 0x540   : > { %v1917_v63 = vpop.permute.xlu0 %1916 }
 0x543   : > { %v3048_v32 = vpop.eup %3047  ;;  %v2115_v62 = vpop.permute.xlu1 %2114 }
 0x544   : > { %v2022_v33 = vmul.f32 %v3048_v32, %v3044_v19  ;;  %v3050_v35 = vpop.eup %3049 }
 0x545   : > { %v2215_v36 = vmul.f32 %v3050_v35, %v3042_v16 }
 0x546   : > { %2959 = vmatmul.mubr.msk.f32.vlgmr.msra.gmra.mrb[2].mxu0 %vm1833_vm9, %v2022_v33 }
 0x547   : > { %2967 = vmatpush3.msk.msra.mxu0 %vm806_vm2, %v2216_v34  ;;  %2968 = vmatprep.mubr.msk.f32.mxu0 %vm3080_vm8, %v3079_v21  ;;  %v2303_v29 = vpop.permute.xlu1 %2302 }
 0x54a   : > { %2969 = vmatmul.mubr.msk.f32.vlgmr.msra.gmra.mrb[4].mxu0 %vm1833_vm9, %v2215_v36 }
 0x54b   : > { %v2308_v8 = vpop.permute.xlu1 %2307 }
 0x580   : > { %v1906_v46 = vpop.f32.mrb[0].mxu0 }
 0x581   : > { %v1907_v47 = vadd.f32 %v1906_v46, %v1832_v45  ;;  %v2950_v48 = vpop.f32.mrb[1].mxu0 }
 0x583   : > { %2951 = vmatprep.subr.msk.mxu1 %vm806_vm2, %v1907_v47 }
 0x584   : > { %2952 = vmatpush3.msk.msra.mxu1 %vm806_vm2, %v1907_v47 }
 0x585   : > { %2954 = vmatmul.mubr.msk.f32.vlgmr.msra.gmra.mrb[0].mxu1 %vm1833_vm9, %v1911_v49 }
 0x586   : > { %2963 = vmatprep.mubr.msk.f32.mxu1 %vm1833_vm9, %v2637_v50 }
 0x619   : > { %v2097_v51 = vpop.f32.mrb[2].mxu0 }
 0x61a   : > { %v2098_v52 = vadd.f32 %v2097_v51, %v2024_v30  ;;  %v2960_v53 = vpop.f32.mrb[3].mxu0 }
 0x61c   : > { %2961 = vmatprep.subr.msk.mxu1 %vm806_vm2, %v2098_v52 }
 0x61d   : > { %2962 = vmatpush3.msk.msra.mxu1 %vm806_vm2, %v2098_v52  ;;  %v2290_v57 = vpop.f32.mrb[4].mxu0 }
 0x61e   : > { %v2291_v58 = vadd.f32 %v2290_v57, %v2217_v54  ;;  %2964 = vmatmul.mubr.msk.f32.vlgmr.msra.gmra.mrb[2].mxu1 %vm1833_vm9, %v2638_v55  ;;  %v2970_v59 = vpop.f32.mrb[5].mxu0 }
 0x61f   : > { %2973 = vmatprep.mubr.msk.f32.mxu1 %vm1833_vm9, %v2648_v56 }
 0x620   : > { %2971 = vmatprep.subr.msk.mxu1 %vm806_vm2, %v2291_v58 }
 0x621   : > { %2972 = vmatpush3.msk.msra.mxu1 %vm806_vm2, %v2291_v58 }
 0x622   : > { %2974 = vmatmul.mubr.msk.f32.vlgmr.msra.gmra.mrb[4].mxu1 %vm1833_vm9, %v2649_v28 }
 0x658   : > { %v2955_v0 = vpop.f32.mrb[0].mxu1 }
 0x659   : > { %v2005_v1 = vadd.f32 %v2955_v0, %v1922_v60  ;;  %v1999_v2 = vpop.f32.mrb[1].mxu1 }
 0x65a   : > { %v2000_v3 = vadd.f32 %v1999_v2, %v1917_v63 }
 0x65b   : > { %2010 = vst.msk [vmem:[%s3658_s12 + $0x8] sm:$0xff] %vm2008_vm10, %v2005_v1 }
 0x65c   : > { %2009 = vst.msk [vmem:[%s3658_s12] sm:$0xff] %vm2008_vm10, %v2000_v3 }
 0x6f1   : > { %v2965_v4 = vpop.f32.mrb[2].mxu1 }
 0x6f2   : > { %v2198_v5 = vadd.f32 %v2965_v4, %v2115_v62  ;;  %v2192_v6 = vpop.f32.mrb[3].mxu1 }
 0x6f3   : > { %v2193_v7 = vadd.f32 %v2192_v6, %v2110_v61 }
 0x6f4   : > { %2645 = vst.msk [vmem:[%s3658_s12 + $0x18] sm:$0xff] %vm2008_vm10, %v2198_v5 }
 0x6f5   : > { %2644 = vst.msk [vmem:[%s3658_s12 + $0x10] sm:$0xff] %vm2008_vm10, %v2193_v7  ;;  %v2975_v9 = vpop.f32.mrb[4].mxu1 }
 0x6f6   : > { %v2391_v10 = vadd.f32 %v2975_v9, %v2308_v8  ;;  %v2385_v11 = vpop.f32.mrb[5].mxu1 }
 0x6f7   : > { %v2386_v12 = vadd.f32 %v2385_v11, %v2303_v29 }
 0x6f8   : > { %2656 = vst.msk [vmem:[%s3658_s12 + $0x28] sm:$0xff] %vm2008_vm10, %v2391_v10 }
 0x6f9   : > { %2655 = vst.msk [vmem:[%s3658_s12 + $0x20] sm:$0xff] %vm2008_vm10, %v2386_v12 }
 0x6fa PF: > { %2403 = sbr.rel (!%p3182_p5) target bundleno = 1793 (0x701), region = 158  ;;  %s2657_s14 = sshll.u32 (%p3182_p5), %s3163_s24, 1  ;;  %v2421_v13 = vld [vmem:[%s3263_s23] sm:$0x3] (%p3182_p5)  ;;  %v2423_v14 = vld [vmem:[%s3263_s23 + $0x2] sm:$0x3] (%p3182_p5) }
 0x6fb   : > { %s2405_s25 = scalar_lea.vmem (%p3182_p5), %s3657_s11, %s2657_s14  ;;  %v2425_v15 = vld [vmem:[%s3263_s23 + $0x4] sm:$0x3] (%p3182_p5) }
 0x6fc   : > { %2422 = vst [vmem:[%s2405_s25] sm:$0x3] (%p3182_p5), %v2421_v13  ;;  %2424 = vst [vmem:[%s2405_s25 + $0x4] sm:$0x3] (%p3182_p5), %v2423_v14 }
 0x6fd   : > { %2426 = vst [vmem:[%s2405_s25 + $0x8] sm:$0x3] (%p3182_p5), %v2425_v15 }
 0x701 PF: > { %s3665_s23 = sld [smem:[#allocation8_spill]]  ;;  %s3666_s30 = sld [smem:[#allocation9_spill]] }
 0x702   : > { %s3667_s21 = smov %s3069_s22 }
 0x707   : > { %p20_p13 = scmp.ge.s32.totalorder %s3665_s23, 4   ;;  %s3668_s22 = smov %s3666_s30 }
 0x709   :  { %22 = sbr.rel (!%p20_p13) target bundleno = 2 (0x2), region = 270 }

// kernel: dcfm_forward.7
= control target key start
LH: loop header
LB: loop body
LE: loop exit
PB: predicated region body
PF: predicated region fallthrough
CT: control target
= control target key end

     0   :  { %s549_s18 = smov 0   ;;  %s551_s19 = smov 0   ;;  %s615_s0 = inlined_call_operand.vmem [shape: bf16[36,256], index: 0, kind: input, shape index: {}]   ;;  %s616_s1 = inlined_call_operand.vmem [shape: bf16[8,36], index: 1, kind: input, shape index: {}]   ;;  %s617_s2 = inlined_call_operand.vmem [shape: f32[8,1], index: 2, kind: input, shape index: {}]   ;;  %s618_s3 = inlined_call_operand.vmem [shape: f32[8,1], index: 3, kind: input, shape index: {}]   ;;  %s619_s4 = inlined_call_operand.vmem [shape: f32[8,1], index: 4, kind: input, shape index: {}]   ;;  %s620_s5 = inlined_call_operand.vmem [shape: f32[8,256], index: 5, kind: output, shape index: {}]  }
   0x1   :  { %s553_s20 = smov 0  }
   0x2 LB: > { %s431_s21 = sadd.s32 4294967295, %s514_s20   ;;  %s566_s22 = sadd.s32 1, %s514_s20   ;;  %s514_s20 = sphi %s553_s20, %s623_s20   ;;  %s510_s19 = sphi %s551_s19, %s622_s19   ;;  %s506_s18 = sphi %s549_s18, %s621_s18  }
   0x3   : > { %s19_s23 = ssub.s32 %s514_s20, %s566_s22  ;;  %s22_s24 = sadd.s32 1, %s510_s19 }
   0x4   : > { %p20_p0 = scmp.eq.s32.totalorder %s19_s23, 0  ;;  %p29_p1 = scmp.ne.s32.totalorder %s510_s19, %s506_s18 }
   0x5   : > { %p30_p2 = scmp.eq.s32.totalorder %s514_s20, 0  ;;  %p434_p4 = scmp.ge.s32.totalorder %s514_s20, 2 }
   0x6   : > { %s575_s25 = scalar_select %p20_p0, %s510_s19, %s22_s24  }
   0x7   : > { %p31_p3 = por %p30_p2, %p29_p1  ;;  %177 = sbr.rel (%p434_p4) target bundleno = 22 (0x16), region = 32 }
   0xe   : > { %180 = sbr.rel (!%p31_p3) target bundleno = 22 (0x16), region = 36  ;;  %s182_s26 = sand.u32 (%p31_p3), 1, %s510_s19  }
   0xf   : > { %s435_s27 = sshll.u32 (%p31_p3), %s514_s20, 2  ;;  %s458_s28 = smul.u32 (%p31_p3), 20, %s182_s26 }
  0x10   : > { %s186_s6 = scalar_lea.vmem (%p31_p3), %s615_s0, %s435_s27 }
  0x11   : > { %v202_v0 = vld [vmem:[%s186_s6] sm:$0xf] (%p31_p3)  ;;  %v204_v1 = vld [vmem:[%s186_s6 + $0x8] sm:$0xf] (%p31_p3)  ;;  %v206_v2 = vld [vmem:[%s186_s6 + $0x10] sm:$0xf] (%p31_p3) }
  0x12   : > { %v208_v3 = vld [vmem:[%s186_s6 + $0x18] sm:$0xf] (%p31_p3)  ;;  %v210_v4 = vld [vmem:[%s186_s6 + $0x20] sm:$0xf] (%p31_p3)  ;;  %s184_s7 = scalar_lea.vmem (%p31_p3), [#allocation2], %s458_s28 }
  0x13   : > { %203 = vst [vmem:[%s184_s7] sm:$0xf] (%p31_p3), %v202_v0  ;;  %205 = vst [vmem:[%s184_s7 + $0x4] sm:$0xf] (%p31_p3), %v204_v1 }
  0x14   : > { %207 = vst [vmem:[%s184_s7 + $0x8] sm:$0xf] (%p31_p3), %v206_v2  ;;  %209 = vst [vmem:[%s184_s7 + $0xc] sm:$0xf] (%p31_p3), %v208_v3 }
  0x15   : > { %211 = vst [vmem:[%s184_s7 + $0x10] sm:$0xf] %v210_v4 }
  0x16 PF: > { %p436_p5 = scmp.ge.s32.totalorder %s514_s20, 1  ;;  %p243_p6 = scmp.lt.s32.totalorder %s514_s20, 3 }
  0x18   : > { %p244_p7 = pnand %p436_p5, %p243_p6 }
  0x19   : > { %s250_s8 = sand.u32 (!%p244_p7), 1, %s506_s18   ;;  %v516_v5 = vmov (!%p244_p7), 0.0   ;;  %vm517_vm0 = vmmov (!%p244_p7), 0   ;;  %v287_v6 = vld [vmem:[%s617_s2] sm:$0xff] (!%p244_p7)  ;;  %v518_v8 = vmov (!%p244_p7), 0   ;;  %vm312_vm1 = vcmask (!%p244_p7), 1041408  }
  0x1a   : > { %247 = sbr.rel (%p244_p7) target bundleno = 263 (0x107), region = 77  ;;  %448 = vmatprep.subr.bf16.mxu0 (!%p244_p7), %v516_v5  ;;  %454 = vmatprep.mubr.msk.bf16.mxu0 (!%p244_p7), %vm517_vm0, %v516_v5  ;;  %v363_v7 = vld [vmem:[%s619_s4] sm:$0xff] (!%p244_p7)  ;;  %vm308_vm2 = vcmask (!%p244_p7), 293888   ;;  %p276_p8 = scmp.lt.s32.totalorder (!%p244_p7), %s431_s21, 1 }
  0x1b   : > { %s459_s9 = smul.u32 (!%p244_p7), 20, %s250_s8  ;;  %487 = vset.pattern.permute.xlu0 (!%p244_p7), %v518_v8  ;;  %488 = vset.pattern.permute.xlu1 (!%p244_p7), %v518_v8  ;;  %v356_v9 = vld [vmem:[%s618_s3] sm:$0xff] (!%p244_p7) }
  0x1c   : > { %290 = vperm.xlu0 (!%p244_p7), %487, %v287_v6   ;;  %366 = vperm.xlu1 (!%p244_p7), %488, %v363_v7   ;;  %v281_v14 = vld [vmem:[%s616_s1] sm:$0xf] (!%p244_p7) }
  0x1d   : > { %s252_s16 = scalar_lea.vmem (!%p244_p7), [#allocation2], %s459_s9 }
  0x1e   : > { %v489_v10 = vld [vmem:[%s252_s16] sm:$0xff] (!%p244_p7)   ;;  %v490_v11 = vld [vmem:[%s252_s16 + $0x8] sm:$0xff] (!%p244_p7)   ;;  %v491_v12 = vld [vmem:[%s252_s16 + $0x10] ss:$0 sps:$4 sm:$0x33] (!%p244_p7)  }
  0x1f   : > { %449 = vmatpush3.bf16.msra.mxu0 (!%p244_p7), %v489_v10  ;;  %v314_v13 = vsel (!%p244_p7), %vm312_vm1, %v491_v12, 0 }
  0x20   : > { %450 = vmatprep.subr.bf16.mxu0 (!%p244_p7), %v516_v5  ;;  %359 = vperm.xlu0 (!%p244_p7), %487, %v356_v9  }
  0x21   : > { %s625_s21 = smov (!%p276_p8, %s431_s21), 1 }
  0x22   : > { %s437_s23 = sshll.u32 %s625_s21, 3 }
  0x23   : > { %451 = vmatpush3.bf16.msra.mxu0 %v490_v11  ;;  %s279_s27 = scalar_lea.vmem %s620_s5, %s437_s23 }
  0x24   : > { %452 = vmatprep.subr.bf16.mxu0 %v516_v5 }
  0x27   : > { %453 = vmatpush3.bf16.msra.mxu0 %v314_v13 }
  0x2a   : > { %455 = vmatmul.mubr.msk.bf16.vlgmr.msra.gmra.mrb[0].mxu0 %vm308_vm2, %v281_v14 }
  0x9b   : > { %v291_v15 = vpop.permute.xlu0 %290  ;;  %v367_v19 = vpop.permute.xlu1 %366 }
  0x9f   : > { %v360_v20 = vpop.permute.xlu0 %359 }
  0xfd   : > { %v350_v16 = vpop.f32.mrb[0].mxu0 }
  0xfe   : > { %v351_v17 = vadd.f32 %v350_v16, %v291_v15  ;;  %v456_v18 = vpop.f32.mrb[1].mxu0 }
  0xff   : > { %v353_v21 = vpop.f32.mrb[2].mxu0 }
 0x100   : > { %v457_v22 = vpop.f32.mrb[3].mxu0  ;;  %v362_v23 = vmul.f32 %v360_v20, %v351_v17 }
 0x102   : > { %v369_v24 = vadd.f32 %v367_v19, %v362_v23 }
 0x104   : > { %v370_v25 = vmax.f32 %v369_v24, 0.0 }
 0x106   : > { %371 = vst [vmem:[%s279_s27] sm:$0xff] %v370_v25 }
 0x107 PF: > { %p12_p9 = scmp.ge.s32.totalorder %s566_s22, 4   ;;  %s621_s18 = smov %s510_s19 }
 0x108   : > { %s622_s19 = smov %s575_s25  ;;  %s623_s20 = smov %s566_s22 }
 0x109   :  { %14 = sbr.rel (!%p12_p9) target bundleno = 2 (0x2), region = 116 }

</bundles_post_ra>
